<compile_context>
chip_gen: v7x
topology: tpu7x:2x2x1
jax: 0.10.0
libtpu: 0.0.40
codegen_flags: <defaults>
</compile_context>

<pallas_src>
import functools

import jax
import jax.numpy as jnp
from jax.experimental import pallas as pl
from jax.experimental.pallas import tpu as pltpu


def _cdiv(a, b):
    return (a + b - 1) // b


def _round_up(a, m):
    return _cdiv(a, m) * m


_LANE = 128


# ---------------------------------------------------------------------------
# Pallas kernel: row-tiled  A @ W + bias  (+ optional ReLU), lane-dense N=128
# ---------------------------------------------------------------------------
def _matmul_bias_kernel(a_ref, w_ref, b_ref, o_ref, *, relu):
    acc = jnp.dot(a_ref[...], w_ref[...], preferred_element_type=jnp.float32)
    acc = acc + b_ref[...]
    if relu:
        acc = jnp.maximum(acc, 0.0)
    o_ref[...] = acc.astype(o_ref.dtype)


def matmul_bias(a, w, b, *, relu):
    """a: (M, K) f32, w: (K, N) f32, b: (N,) f32 or None -> (M, N) f32."""
    M, K = a.shape
    Kw, N = w.shape
    assert K == Kw and N <= _LANE

    # bf16 operands on the MXU, f32 accumulation inside the kernel.
    a16 = a.astype(jnp.bfloat16)
    w16 = w.astype(jnp.bfloat16)

    # Pad K to a multiple of 128 lanes when it exceeds one vreg row
    # (conv1: 147 -> 256). Small K (16) stays as a full-dim block.
    Kp = K if K <= _LANE else _round_up(K, _LANE)
    if Kp != K:
        a16 = jnp.pad(a16, ((0, 0), (0, Kp - K)))
        w16 = jnp.pad(w16, ((0, Kp - K), (0, 0)))

    # Lane-dense output: pad N to 128 zero columns, slice back afterwards.
    w16 = jnp.pad(w16, ((0, 0), (0, _LANE - N)))
    if b is None:
        bias = jnp.zeros((1, _LANE), jnp.float32)
    else:
        bias = jnp.pad(b.astype(jnp.float32), (0, _LANE - N)).reshape(1, _LANE)

    # >= 2 parallel row tiles (keeps both TensorCores busy on v7x) of up to
    # ~1024 rows; last tile may be ragged — Pallas masks the boundary stores.
    nsteps = max(2, _cdiv(M, 1024))
    tm = _round_up(_cdiv(M, nsteps), 16)
    grid = _cdiv(M, tm)

    out = pl.pallas_call(
        functools.partial(_matmul_bias_kernel, relu=relu),
        out_shape=jax.ShapeDtypeStruct((M, _LANE), jnp.float32),
        grid_spec=pltpu.PrefetchScalarGridSpec(
            num_scalar_prefetch=0,
            grid=(grid,),
            in_specs=[
                pl.BlockSpec((tm, Kp), lambda i: (i, 0)),      # A row tile
                pl.BlockSpec((Kp, _LANE), lambda i: (0, 0)),   # resident weight
                pl.BlockSpec((1, _LANE), lambda i: (0, 0)),    # bias row
            ],
            out_specs=pl.BlockSpec((tm, _LANE), lambda i: (i, 0)),
        ),
        compiler_params=pltpu.CompilerParams(
            dimension_semantics=("parallel",)),
    )(a16, w16, bias)
    return out[:, :N]


# ---------------------------------------------------------------------------
# Glue: NHWC im2col + conv / sub-pixel transposed-conv wrappers
# (all FLOPs happen inside the Pallas matmul kernel above)
# ---------------------------------------------------------------------------
def _im2col_nhwc(x, k, s):
    """x: (B, H, W, C) (already padded) -> ((B*Ho*Wo, k*k*C), Ho, Wo).

    Patch layout along the last axis is (ky, kx, c): contiguous in NHWC, so
    extraction is strided slices + one channel concat (no transposes).
    """
    B, H, W, C = x.shape
    Ho = (H - k) // s + 1
    Wo = (W - k) // s + 1
    cols = []
    for ky in range(k):
        for kx in range(k):
            cols.append(
                x[:, ky:ky + s * (Ho - 1) + 1:s, kx:kx + s * (Wo - 1) + 1:s, :])
    p = jnp.concatenate(cols, axis=-1)               # (B, Ho, Wo, k*k*C)
    return p.reshape(B * Ho * Wo, k * k * C), Ho, Wo
# TODO(synk): fuse the patch extraction into the Pallas kernel (whole NHWC
# image resident in VMEM + in-kernel pl.ds slicing) to drop the per-layer HBM
# round-trip of the patch matrix.


def conv2d_nhwc(x, w, b, *, stride, padding=0, relu=False):
    """x: (B,H,W,Cin); w: (Cout,Cin,k,k) (PyTorch Conv2d layout)."""
    Cout, Cin, k, _ = w.shape
    if padding:
        x = jnp.pad(x, ((0, 0), (padding, padding), (padding, padding), (0, 0)))
    B = x.shape[0]
    a, Ho, Wo = _im2col_nhwc(x, k, stride)
    wmat = jnp.transpose(w, (2, 3, 1, 0)).reshape(k * k * Cin, Cout)
    y = matmul_bias(a, wmat, b, relu=relu)           # (B*Ho*Wo, Cout)
    return y.reshape(B, Ho, Wo, Cout)


def _pixel_shuffle2(y, B, Ho, Wo, Cout):
    """(B*Ho*Wo, 2*2*Cout) with cols ordered (p, q, co) -> (B, 2Ho, 2Wo, Cout)."""
    y = y.reshape(B, Ho, Wo, 2, 2, Cout)
    y = jnp.transpose(y, (0, 1, 3, 2, 4, 5))         # (b, m, p, n, q, co)
    return y.reshape(B, 2 * Ho, 2 * Wo, Cout)


def conv_transpose2d_k4s2_nhwc(x, w, b, *, relu=False):
    """ConvTranspose2d(k=4, stride=2) via sub-pixel phase decomposition.

    x: (B,H,W,Cin); w: (Cin,Cout,4,4) (PyTorch ConvTranspose2d layout).
    Output (B, 2H+2, 2W+2, Cout). Output phase (p, q) is a 2x2/stride-1 conv
    of the 1-padded input; all 4 phases share one patch matrix, so they fuse
    into a single matmul with a (2*2*Cin, 4*Cout) weight + pixel shuffle.
    """
    Cin, Cout, k, _ = w.shape            # k == 4, stride == 2
    B, H, W, _ = x.shape
    xp = jnp.pad(x, ((0, 0), (1, 1), (1, 1), (0, 0)))
    a, Ho, Wo = _im2col_nhwc(xp, 2, 1)   # Ho = H + 1, Wo = W + 1, K = 4*Cin
    # w_sub[ky, kx, ci, p, q, co] = w[ci, co, 2*(1-ky)+p, 2*(1-kx)+q]
    w_r = w.reshape(Cin, Cout, 2, 2, 2, 2)           # (ci, co, a, p, bb, q)
    w_r = jnp.flip(w_r, axis=(2, 4))                 # a -> ky=1-a, bb -> kx=1-bb
    wmat = jnp.transpose(w_r, (2, 4, 0, 3, 5, 1)).reshape(4 * Cin, 4 * Cout)
    bias4 = jnp.tile(b, 4)                           # same bias for each phase
    y = matmul_bias(a, wmat, bias4, relu=relu)       # (B*Ho*Wo, 4*Cout)
    return _pixel_shuffle2(y, B, Ho, Wo, Cout)       # (B, 2H+2, 2W+2, Cout)


def conv_transpose2d_k2s2_op1_nhwc(x, w, b):
    """ConvTranspose2d(k=2, stride=2, output_padding=1): four pure 1x1 convs.

    x: (B,H,W,Cin); w: (Cin,Cout,2,2). Output (B, 2H+1, 2W+1, Cout); the extra
    output_padding row/column receives bias only (bias added after padding).
    """
    Cin, Cout, k, _ = w.shape            # k == 2, stride == 2
    B, H, W, _ = x.shape
    a = x.reshape(B * H * W, Cin)
    wmat = jnp.transpose(w, (0, 2, 3, 1)).reshape(Cin, 4 * Cout)  # (ci)x(p,q,co)
    y = matmul_bias(a, wmat, None, relu=False)       # bias added below
    y = _pixel_shuffle2(y, B, H, W, Cout)            # (B, 2H, 2W, Cout)
    y = jnp.pad(y, ((0, 0), (0, 1), (0, 1), (0, 0)))
    return y + b.reshape(1, 1, 1, Cout).astype(y.dtype)


# ---------------------------------------------------------------------------
# ConvAutoEncoder forward (mode='pnf', batch_norm=False)
# ---------------------------------------------------------------------------
def init_params(key):
    """Deterministic parameter init (shapes match the PyTorch module)."""
    ks = jax.random.split(key, 8)

    def u(k, shape, fan_in):
        bound = 1.0 / jnp.sqrt(fan_in)
        return jax.random.uniform(k, shape, jnp.float32, -bound, bound)

    params = {
        # conv1: Conv2d(3, 16, 7, stride=2)
        "w1": u(ks[0], (16, 3, 7, 7), 3 * 7 * 7),
        "b1": u(ks[1], (16,), 3 * 7 * 7),
        # conv2: Conv2d(16, 4, 4, stride=2, padding=1)
        "w2": u(ks[2], (4, 16, 4, 4), 16 * 4 * 4),
        "b2": u(ks[3], (4,), 16 * 4 * 4),
        # conv_t2: ConvTranspose2d(4, 16, 4, stride=2)
        "wt2": u(ks[4], (4, 16, 4, 4), 4 * 4 * 4),
        "bt2": u(ks[5], (16,), 4 * 4 * 4),
        # conv_t1: ConvTranspose2d(16, 3, 2, stride=2, output_padding=1)
        "wt1": u(ks[6], (16, 3, 2, 2), 16 * 2 * 2),
        "bt1": u(ks[7], (3,), 16 * 2 * 2),
    }
    return params


def conv_autoencoder_forward(params, x):
    batch_size = x.shape[0]
    x = x.reshape(batch_size, 3, 69, 69)
    h = jnp.transpose(x, (0, 2, 3, 1))                                  # NCHW -> NHWC once
    h = conv2d_nhwc(h, params["w1"], params["b1"], stride=2, relu=True)             # (B,32,32,16)
    h = conv2d_nhwc(h, params["w2"], params["b2"], stride=2, padding=1, relu=True)  # (B,16,16,4)
    h = conv_transpose2d_k4s2_nhwc(h, params["wt2"], params["bt2"], relu=True)      # (B,34,34,16)
    out = conv_transpose2d_k2s2_op1_nhwc(h, params["wt1"], params["bt1"])           # (B,69,69,3)
    out = jnp.transpose(out, (0, 3, 1, 2))                              # NHWC -> NCHW
    return out.reshape(batch_size, 3, 69, 69)


# ---------------------------------------------------------------------------
# Pure-XLA f32 reference (validation only)
# ---------------------------------------------------------------------------
def _reference_forward(params, x):
    dn = ("NCHW", "OIHW", "NCHW")
    hp = jax.lax.Precision.HIGHEST

    def conv(h, w, stride, pad):
        return jax.lax.conv_general_dilated(
            h, w, (stride, stride), pad, dimension_numbers=dn, precision=hp)

    def convt(h, w, stride, k, out_pad):
        w_conv = jnp.flip(w, axis=(2, 3)).transpose(1, 0, 2, 3)
        pad = ((k - 1, k - 1 + out_pad),) * 2
        return jax.lax.conv_general_dilated(
            h, w_conv, (1, 1), pad, lhs_dilation=(stride, stride),
            dimension_numbers=dn, precision=hp)

    h = jax.nn.relu(conv(x, params["w1"], 2, "VALID")
                    + params["b1"].reshape(1, -1, 1, 1))
    h = jax.nn.relu(conv(h, params["w2"], 2, ((1, 1), (1, 1)))
                    + params["b2"].reshape(1, -1, 1, 1))
    h = jax.nn.relu(convt(h, params["wt2"], 2, 4, 0)
                    + params["bt2"].reshape(1, -1, 1, 1))
    out = convt(h, params["wt1"], 2, 2, 1) + params["bt1"].reshape(1, -1, 1, 1)
    return out


if __name__ == "__main__":
    key = jax.random.PRNGKey(0)
    pkey, xkey = jax.random.split(key)
    params = init_params(pkey)

    # input consistent with the module's hard-coded view(batch, 3, 69, 69)
    x = jax.random.normal(xkey, (2, 3, 69, 69), jnp.float32)

    out = jax.jit(conv_autoencoder_forward)(params, x)
    out = jax.block_until_ready(out)

    assert out.shape == (2, 3, 69, 69), out.shape
    assert out.dtype == jnp.float32
    assert bool(jnp.all(jnp.isfinite(out)))

    # numerical check vs an f32 XLA reference (bf16 MXU operands -> loose tol)
    ref = jax.block_until_ready(jax.jit(_reference_forward)(params, x))
    max_err = float(jnp.max(jnp.abs(out - ref)))
    assert max_err < 5e-2, max_err

    print("KERNEL_OK")
</pallas_src>

<mosaic_0001>
module attributes {stable_mosaic.version = 11 : i64} {
  func.func @_matmul_bias_kernel(%arg0: i32, %arg1: memref<1024x256xbf16, #tpu.memory_space<vmem>>, %arg2: memref<256x128xbf16, #tpu.memory_space<vmem>>, %arg3: memref<1x128xf32, #tpu.memory_space<vmem>>, %arg4: memref<1024x128xf32, #tpu.memory_space<vmem>>) attributes {dimension_semantics = [#tpu.dimension_semantics<parallel>], iteration_bounds = array<i64: 2>, scalar_prefetch = 0 : i64, scratch_operands = 0 : i64, tpu.core_type = #tpu.core_type<tc>, window_params = [{transform_indices = @transform_0, window_bounds = array<i64: 1024, 256>}, {pipeline_mode = #tpu.pipeline_mode<synchronous>, transform_indices = @transform_1, window_bounds = array<i64: 256, 128>}, {pipeline_mode = #tpu.pipeline_mode<synchronous>, transform_indices = @transform_2, window_bounds = array<i64: 1, 128>}, {transform_indices = @transform_3, window_bounds = array<i64: 1024, 128>}]} {
    %c0 = arith.constant 0 : index
    %c0_0 = arith.constant 0 : index
    %0 = vector.load %arg1[%c0, %c0_0] : memref<1024x256xbf16, #tpu.memory_space<vmem>>, vector<1024x256xbf16>
    %c0_1 = arith.constant 0 : index
    %c0_2 = arith.constant 0 : index
    %1 = vector.load %arg2[%c0_1, %c0_2] : memref<256x128xbf16, #tpu.memory_space<vmem>>, vector<256x128xbf16>
    %cst = arith.constant dense<0.000000e+00> : vector<1024x128xf32>
    %2 = tpu.matmul %0, %1, %cst {dimension_numbers = #tpu.dot_dimension_numbers<[1], [0], [0], [1], [0, 0, 1, 1], [], []>} : vector<1024x256xbf16>, vector<256x128xbf16>, vector<1024x128xf32> -> vector<1024x128xf32>
    %c0_3 = arith.constant 0 : index
    %c0_4 = arith.constant 0 : index
    %3 = vector.load %arg3[%c0_3, %c0_4] : memref<1x128xf32, #tpu.memory_space<vmem>>, vector<1x128xf32>
    %4 = vector.broadcast %3 : vector<1x128xf32> to vector<1024x128xf32>
    %5 = arith.addf %2, %4 : vector<1024x128xf32>
    %cst_5 = arith.constant 0.000000e+00 : f32
    %6 = vector.broadcast %cst_5 : f32 to vector<1024x128xf32>
    %7 = arith.maximumf %5, %6 : vector<1024x128xf32>
    %c0_6 = arith.constant 0 : index
    %c0_7 = arith.constant 0 : index
    %8 = vector.load %arg4[%c0_6, %c0_7] : memref<1024x128xf32, #tpu.memory_space<vmem>>, vector<1024x128xf32>
    tpu.vector_store %arg4[%c0_6, %c0_7], %7 {strides = array<i32>} : memref<1024x128xf32, #tpu.memory_space<vmem>>, vector<1024x128xf32>,
    return
  }
  func.func @transform_0(%arg0: i32) -> (i32, i32) {
    %c0_i32 = arith.constant 0 : i32
    %c0_i32_0 = arith.constant 0 : i32
    return %arg0, %c0_i32 : i32, i32
  }
  func.func @transform_1(%arg0: i32) -> (i32, i32) {
    %c0_i32 = arith.constant 0 : i32
    %c0_i32_0 = arith.constant 0 : i32
    %c0_i32_1 = arith.constant 0 : i32
    return %c0_i32, %c0_i32_0 : i32, i32
  }
  func.func @transform_2(%arg0: i32) -> (i32, i32) {
    %c0_i32 = arith.constant 0 : i32
    %c0_i32_0 = arith.constant 0 : i32
    %c0_i32_1 = arith.constant 0 : i32
    return %c0_i32, %c0_i32_0 : i32, i32
  }
  func.func @transform_3(%arg0: i32) -> (i32, i32) {
    %c0_i32 = arith.constant 0 : i32
    %c0_i32_0 = arith.constant 0 : i32
    return %arg0, %c0_i32 : i32, i32
  }
}

module attributes {stable_mosaic.version = 11 : i64} {
  func.func @_matmul_bias_kernel(%arg0: i32, %arg1: memref<256x256xbf16, #tpu.memory_space<vmem>>, %arg2: memref<256x128xbf16, #tpu.memory_space<vmem>>, %arg3: memref<1x128xf32, #tpu.memory_space<vmem>>, %arg4: memref<256x128xf32, #tpu.memory_space<vmem>>) attributes {dimension_semantics = [#tpu.dimension_semantics<parallel>], iteration_bounds = array<i64: 2>, scalar_prefetch = 0 : i64, scratch_operands = 0 : i64, tpu.core_type = #tpu.core_type<tc>, window_params = [{transform_indices = @transform_0, window_bounds = array<i64: 256, 256>}, {pipeline_mode = #tpu.pipeline_mode<synchronous>, transform_indices = @transform_1, window_bounds = array<i64: 256, 128>}, {pipeline_mode = #tpu.pipeline_mode<synchronous>, transform_indices = @transform_2, window_bounds = array<i64: 1, 128>}, {transform_indices = @transform_3, window_bounds = array<i64: 256, 128>}]} {
    %c0 = arith.constant 0 : index
    %c0_0 = arith.constant 0 : index
    %0 = vector.load %arg1[%c0, %c0_0] : memref<256x256xbf16, #tpu.memory_space<vmem>>, vector<256x256xbf16>
    %c0_1 = arith.constant 0 : index
    %c0_2 = arith.constant 0 : index
    %1 = vector.load %arg2[%c0_1, %c0_2] : memref<256x128xbf16, #tpu.memory_space<vmem>>, vector<256x128xbf16>
    %cst = arith.constant dense<0.000000e+00> : vector<256x128xf32>
    %2 = tpu.matmul %0, %1, %cst {dimension_numbers = #tpu.dot_dimension_numbers<[1], [0], [0], [1], [0, 0, 1, 1], [], []>} : vector<256x256xbf16>, vector<256x128xbf16>, vector<256x128xf32> -> vector<256x128xf32>
    %c0_3 = arith.constant 0 : index
    %c0_4 = arith.constant 0 : index
    %3 = vector.load %arg3[%c0_3, %c0_4] : memref<1x128xf32, #tpu.memory_space<vmem>>, vector<1x128xf32>
    %4 = vector.broadcast %3 : vector<1x128xf32> to vector<256x128xf32>
    %5 = arith.addf %2, %4 : vector<256x128xf32>
    %cst_5 = arith.constant 0.000000e+00 : f32
    %6 = vector.broadcast %cst_5 : f32 to vector<256x128xf32>
    %7 = arith.maximumf %5, %6 : vector<256x128xf32>
    %c0_6 = arith.constant 0 : index
    %c0_7 = arith.constant 0 : index
    %8 = vector.load %arg4[%c0_6, %c0_7] : memref<256x128xf32, #tpu.memory_space<vmem>>, vector<256x128xf32>
    tpu.vector_store %arg4[%c0_6, %c0_7], %7 {strides = array<i32>} : memref<256x128xf32, #tpu.memory_space<vmem>>, vector<256x128xf32>,
    return
  }
  func.func @transform_0(%arg0: i32) -> (i32, i32) {
    %c0_i32 = arith.constant 0 : i32
    %c0_i32_0 = arith.constant 0 : i32
    return %arg0, %c0_i32 : i32, i32
  }
  func.func @transform_1(%arg0: i32) -> (i32, i32) {
    %c0_i32 = arith.constant 0 : i32
    %c0_i32_0 = arith.constant 0 : i32
    %c0_i32_1 = arith.constant 0 : i32
    return %c0_i32, %c0_i32_0 : i32, i32
  }
  func.func @transform_2(%arg0: i32) -> (i32, i32) {
    %c0_i32 = arith.constant 0 : i32
    %c0_i32_0 = arith.constant 0 : i32
    %c0_i32_1 = arith.constant 0 : i32
    return %c0_i32, %c0_i32_0 : i32, i32
  }
  func.func @transform_3(%arg0: i32) -> (i32, i32) {
    %c0_i32 = arith.constant 0 : i32
    %c0_i32_0 = arith.constant 0 : i32
    return %arg0, %c0_i32 : i32, i32
  }
}

module attributes {stable_mosaic.version = 11 : i64} {
  func.func @_matmul_bias_kernel(%arg0: i32, %arg1: memref<304x16xbf16, #tpu.memory_space<vmem>>, %arg2: memref<16x128xbf16, #tpu.memory_space<vmem>>, %arg3: memref<1x128xf32, #tpu.memory_space<vmem>>, %arg4: memref<304x128xf32, #tpu.memory_space<vmem>>) attributes {dimension_semantics = [#tpu.dimension_semantics<parallel>], iteration_bounds = array<i64: 2>, scalar_prefetch = 0 : i64, scratch_operands = 0 : i64, tpu.core_type = #tpu.core_type<tc>, window_params = [{transform_indices = @transform_0, window_bounds = array<i64: 304, 16>}, {pipeline_mode = #tpu.pipeline_mode<synchronous>, transform_indices = @transform_1, window_bounds = array<i64: 16, 128>}, {pipeline_mode = #tpu.pipeline_mode<synchronous>, transform_indices = @transform_2, window_bounds = array<i64: 1, 128>}, {transform_indices = @transform_3, window_bounds = array<i64: 304, 128>}]} {
    %c0 = arith.constant 0 : index
    %c0_0 = arith.constant 0 : index
    %0 = vector.load %arg1[%c0, %c0_0] : memref<304x16xbf16, #tpu.memory_space<vmem>>, vector<304x16xbf16>
    %c0_1 = arith.constant 0 : index
    %c0_2 = arith.constant 0 : index
    %1 = vector.load %arg2[%c0_1, %c0_2] : memref<16x128xbf16, #tpu.memory_space<vmem>>, vector<16x128xbf16>
    %cst = arith.constant dense<0.000000e+00> : vector<304x128xf32>
    %2 = tpu.matmul %0, %1, %cst {dimension_numbers = #tpu.dot_dimension_numbers<[1], [0], [0], [1], [0, 0, 1, 1], [], []>} : vector<304x16xbf16>, vector<16x128xbf16>, vector<304x128xf32> -> vector<304x128xf32>
    %c0_3 = arith.constant 0 : index
    %c0_4 = arith.constant 0 : index
    %3 = vector.load %arg3[%c0_3, %c0_4] : memref<1x128xf32, #tpu.memory_space<vmem>>, vector<1x128xf32>
    %4 = vector.broadcast %3 : vector<1x128xf32> to vector<304x128xf32>
    %5 = arith.addf %2, %4 : vector<304x128xf32>
    %cst_5 = arith.constant 0.000000e+00 : f32
    %6 = vector.broadcast %cst_5 : f32 to vector<304x128xf32>
    %7 = arith.maximumf %5, %6 : vector<304x128xf32>
    %c0_6 = arith.constant 0 : index
    %c0_7 = arith.constant 0 : index
    %8 = vector.load %arg4[%c0_6, %c0_7] : memref<304x128xf32, #tpu.memory_space<vmem>>, vector<304x128xf32>
    tpu.vector_store %arg4[%c0_6, %c0_7], %7 {strides = array<i32>} : memref<304x128xf32, #tpu.memory_space<vmem>>, vector<304x128xf32>,
    return
  }
  func.func @transform_0(%arg0: i32) -> (i32, i32) {
    %c0_i32 = arith.constant 0 : i32
    %c0_i32_0 = arith.constant 0 : i32
    return %arg0, %c0_i32 : i32, i32
  }
  func.func @transform_1(%arg0: i32) -> (i32, i32) {
    %c0_i32 = arith.constant 0 : i32
    %c0_i32_0 = arith.constant 0 : i32
    %c0_i32_1 = arith.constant 0 : i32
    return %c0_i32, %c0_i32_0 : i32, i32
  }
  func.func @transform_2(%arg0: i32) -> (i32, i32) {
    %c0_i32 = arith.constant 0 : i32
    %c0_i32_0 = arith.constant 0 : i32
    %c0_i32_1 = arith.constant 0 : i32
    return %c0_i32, %c0_i32_0 : i32, i32
  }
  func.func @transform_3(%arg0: i32) -> (i32, i32) {
    %c0_i32 = arith.constant 0 : i32
    %c0_i32_0 = arith.constant 0 : i32
    return %arg0, %c0_i32 : i32, i32
  }
}

module attributes {stable_mosaic.version = 11 : i64} {
  func.func @_matmul_bias_kernel(%arg0: i32, %arg1: memref<784x16xbf16, #tpu.memory_space<vmem>>, %arg2: memref<16x128xbf16, #tpu.memory_space<vmem>>, %arg3: memref<1x128xf32, #tpu.memory_space<vmem>>, %arg4: memref<784x128xf32, #tpu.memory_space<vmem>>) attributes {dimension_semantics = [#tpu.dimension_semantics<parallel>], iteration_bounds = array<i64: 3>, scalar_prefetch = 0 : i64, scratch_operands = 0 : i64, tpu.core_type = #tpu.core_type<tc>, window_params = [{transform_indices = @transform_0, window_bounds = array<i64: 784, 16>}, {pipeline_mode = #tpu.pipeline_mode<synchronous>, transform_indices = @transform_1, window_bounds = array<i64: 16, 128>}, {pipeline_mode = #tpu.pipeline_mode<synchronous>, transform_indices = @transform_2, window_bounds = array<i64: 1, 128>}, {transform_indices = @transform_3, window_bounds = array<i64: 784, 128>}]} {
    %c0 = arith.constant 0 : index
    %c0_0 = arith.constant 0 : index
    %0 = vector.load %arg1[%c0, %c0_0] : memref<784x16xbf16, #tpu.memory_space<vmem>>, vector<784x16xbf16>
    %c0_1 = arith.constant 0 : index
    %c0_2 = arith.constant 0 : index
    %1 = vector.load %arg2[%c0_1, %c0_2] : memref<16x128xbf16, #tpu.memory_space<vmem>>, vector<16x128xbf16>
    %cst = arith.constant dense<0.000000e+00> : vector<784x128xf32>
    %2 = tpu.matmul %0, %1, %cst {dimension_numbers = #tpu.dot_dimension_numbers<[1], [0], [0], [1], [0, 0, 1, 1], [], []>} : vector<784x16xbf16>, vector<16x128xbf16>, vector<784x128xf32> -> vector<784x128xf32>
    %c0_3 = arith.constant 0 : index
    %c0_4 = arith.constant 0 : index
    %3 = vector.load %arg3[%c0_3, %c0_4] : memref<1x128xf32, #tpu.memory_space<vmem>>, vector<1x128xf32>
    %4 = vector.broadcast %3 : vector<1x128xf32> to vector<784x128xf32>
    %5 = arith.addf %2, %4 : vector<784x128xf32>
    %c0_5 = arith.constant 0 : index
    %c0_6 = arith.constant 0 : index
    %6 = vector.load %arg4[%c0_5, %c0_6] : memref<784x128xf32, #tpu.memory_space<vmem>>, vector<784x128xf32>
    tpu.vector_store %arg4[%c0_5, %c0_6], %5 {strides = array<i32>} : memref<784x128xf32, #tpu.memory_space<vmem>>, vector<784x128xf32>,
    return
  }
  func.func @transform_0(%arg0: i32) -> (i32, i32) {
    %c0_i32 = arith.constant 0 : i32
    %c0_i32_0 = arith.constant 0 : i32
    return %arg0, %c0_i32 : i32, i32
  }
  func.func @transform_1(%arg0: i32) -> (i32, i32) {
    %c0_i32 = arith.constant 0 : i32
    %c0_i32_0 = arith.constant 0 : i32
    %c0_i32_1 = arith.constant 0 : i32
    return %c0_i32, %c0_i32_0 : i32, i32
  }
  func.func @transform_2(%arg0: i32) -> (i32, i32) {
    %c0_i32 = arith.constant 0 : i32
    %c0_i32_0 = arith.constant 0 : i32
    %c0_i32_1 = arith.constant 0 : i32
    return %c0_i32, %c0_i32_0 : i32, i32
  }
  func.func @transform_3(%arg0: i32) -> (i32, i32) {
    %c0_i32 = arith.constant 0 : i32
    %c0_i32_0 = arith.constant 0 : i32
    return %arg0, %c0_i32 : i32, i32
  }
}

</mosaic_0001>

<bundles_post_ra>
// kernel: conv_autoencoder_forward.4
= control target key start
LH: loop header
LB: loop body
LE: loop exit
PB: predicated region body
PF: predicated region fallthrough
CT: control target
= control target key end

     0   :  { %s2375_s12 = smov 0   ;;  %s2877_s0 = inlined_call_operand.vmem [shape: bf16[2048,256], index: 0, kind: input, shape index: {}]   ;;  %s2878_s1 = inlined_call_operand.vmem [shape: bf16[256,128], index: 1, kind: input, shape index: {}]   ;;  %s2879_s2 = inlined_call_operand.vmem [shape: f32[1,128], index: 2, kind: input, shape index: {}]   ;;  %s2880_s3 = inlined_call_operand.vmem [shape: f32[2048,128], index: 3, kind: output, shape index: {}]  }
   0x1 LB: > { %s1938_s13 = sadd.s32 4294967295, %s2352_s12   ;;  %p1942_p0 = scmp.ge.s32.totalorder %s2352_s12, 1  ;;  %s2352_s12 = sphi %s2375_s12, %s13_s12  }
   0x2   : > { %p139_p1 = scmp.lt.s32.totalorder %s2352_s12, 3 }
   0x4   : > { %p140_p2 = pnand %p1942_p0, %p139_p1 }
   0x5   : > { %v2137_v0 = vld [vmem:[%s2878_s1] sm:$0xff] (!%p140_p2)   ;;  %v2354_v1 = vmov (!%p140_p2), 0   ;;  %s1943_s16 = sshll.u32 (!%p140_p2), %s1938_s13, 7  ;;  %v2138_v2 = vld [vmem:[%s2878_s1 + $0x8] sm:$0xff] (!%p140_p2)   ;;  %v2139_v3 = vld [vmem:[%s2878_s1 + $0x10] sm:$0xff] (!%p140_p2)  }
   0x6   : > { %143 = sbr.rel (%p140_p2) target bundleno = 537 (0x219), region = 32  ;;  %1081 = vmatprep.subr.bf16.mxu0 (!%p140_p2), %v2354_v1  ;;  %2096 = vmatprep.subr.bf16.mxu1 (!%p140_p2), %v2354_v1  ;;  %p165_p3 = scmp.lt.s32.totalorder (!%p140_p2), %s1943_s16, 255  ;;  %v2140_v4 = vld [vmem:[%s2878_s1 + $0x18] sm:$0xff] (!%p140_p2)   ;;  %v2141_v5 = vld [vmem:[%s2878_s1 + $0x20] sm:$0xff] (!%p140_p2)   ;;  %v2142_v7 = vld [vmem:[%s2878_s1 + $0x28] sm:$0xff] (!%p140_p2)  }
   0x7   : > { %1082 = vmatpush1.bf16.msra.mxu0 (!%p140_p2), %v2137_v0  ;;  %2112 = vmatpush1.bf16.msra.mxu1 (!%p140_p2), %v2137_v0  ;;  %v2143_v9 = vld [vmem:[%s2878_s1 + $0x30] sm:$0xff] (!%p140_p2)   ;;  %v2144_v10 = vld [vmem:[%s2878_s1 + $0x38] sm:$0xff] (!%p140_p2)   ;;  %v2145_v11 = vld [vmem:[%s2878_s1 + $0x40] sm:$0xff] (!%p140_p2)  }
   0x8   : > { %1083 = vmatprep.subr.bf16.mxu0 (!%p140_p2), %v2354_v1  ;;  %2097 = vmatprep.subr.bf16.mxu1 (!%p140_p2), %v2354_v1  ;;  %v2146_v12 = vld [vmem:[%s2878_s1 + $0x48] sm:$0xff] (!%p140_p2)   ;;  %v2147_v13 = vld [vmem:[%s2878_s1 + $0x50] sm:$0xff] (!%p140_p2)   ;;  %v2148_v14 = vld [vmem:[%s2878_s1 + $0x58] sm:$0xff] (!%p140_p2)  }
   0x9   : > { %v2149_v15 = vld [vmem:[%s2878_s1 + $0x60] sm:$0xff] (!%p140_p2)   ;;  %v2150_v16 = vld [vmem:[%s2878_s1 + $0x68] sm:$0xff] (!%p140_p2)   ;;  %v2151_v17 = vld [vmem:[%s2878_s1 + $0x70] sm:$0xff] (!%p140_p2)  }
   0xa   : > { %v2152_v18 = vld [vmem:[%s2878_s1 + $0x78] sm:$0xff] (!%p140_p2)  }
   0xb   : > { %1084 = vmatpush1.bf16.msra.mxu0 (!%p140_p2), %v2138_v2  ;;  %2113 = vmatpush1.bf16.msra.mxu1 (!%p140_p2), %v2138_v2 }
   0xc   : > { %1085 = vmatprep.subr.bf16.mxu0 (!%p140_p2), %v2354_v1  ;;  %2098 = vmatprep.subr.bf16.mxu1 (!%p140_p2), %v2354_v1 }
   0xd   : > { %s2882_s16 = smov (!%p165_p3, %s1943_s16), 255 }
   0xe   : > { %s2095_s23 = sshll.u32 %s2882_s16, 3 }
   0xf   : > { %1086 = vmatpush1.bf16.msra.mxu0 %v2139_v3  ;;  %2114 = vmatpush1.bf16.msra.mxu1 %v2139_v3  ;;  %s2414_s28 = scalar_lea.vmem %s2877_s0, %s2095_s23  ;;  %s2597_s5 = scalar_lea.vmem %s2880_s3, %s2095_s23 }
  0x10   : > { %1087 = vmatprep.subr.bf16.mxu0 %v2354_v1  ;;  %2099 = vmatprep.subr.bf16.mxu1 %v2354_v1  ;;  %v2155_v6 = vld [vmem:[%s2414_s28 + $0x4] ss:$8 sps:$4 sm:$0xff]   ;;  %v2153_v19 = vld [vmem:[%s2414_s28] ss:$8 sps:$4 sm:$0xff]   ;;  %v2159_v21 = vld [vmem:[%s2414_s28 + $0x14] ss:$8 sps:$4 sm:$0xff]  }
  0x11   : > { %v2158_v8 = vld [vmem:[%s2414_s28 + $0x204] ss:$8 sps:$4 sm:$0xff]   ;;  %1113 = vmatprep.mubr.bf16.mxu0 %v2155_v6  ;;  %v2156_v20 = vld [vmem:[%s2414_s28 + $0x200] ss:$8 sps:$4 sm:$0xff]   ;;  %v2161_v22 = vld [vmem:[%s2414_s28 + $0x214] ss:$8 sps:$4 sm:$0xff]  }
  0x12   : > { %1369 = vmatprep.mubr.bf16.mxu1 %v2158_v8  ;;  %v2163_v23 = vld [vmem:[%s2414_s28 + $0x10] ss:$8 sps:$4 sm:$0xff]   ;;  %v2165_v25 = vld [vmem:[%s2414_s28 + $0x24] ss:$8 sps:$4 sm:$0xff]   ;;  %v2169_v27 = vld [vmem:[%s2414_s28 + $0x20] ss:$8 sps:$4 sm:$0xff]  }
  0x13   : > { %1088 = vmatpush1.bf16.msra.mxu0 %v2140_v4  ;;  %2115 = vmatpush1.bf16.msra.mxu1 %v2140_v4  ;;  %v2164_v24 = vld [vmem:[%s2414_s28 + $0x210] ss:$8 sps:$4 sm:$0xff]   ;;  %v2167_v26 = vld [vmem:[%s2414_s28 + $0x224] ss:$8 sps:$4 sm:$0xff]   ;;  %v2170_v28 = vld [vmem:[%s2414_s28 + $0x220] ss:$8 sps:$4 sm:$0xff]  }
  0x14   : > { %1089 = vmatprep.subr.bf16.mxu0 %v2354_v1  ;;  %2100 = vmatprep.subr.bf16.mxu1 %v2354_v1  ;;  %v2171_v29 = vld [vmem:[%s2414_s28 + $0x34] ss:$8 sps:$4 sm:$0xff]   ;;  %v2175_v31 = vld [vmem:[%s2414_s28 + $0x30] ss:$8 sps:$4 sm:$0xff]   ;;  %v2177_v33 = vld [vmem:[%s2414_s28 + $0x44] ss:$8 sps:$4 sm:$0xff]  }
  0x15   : > { %v2173_v30 = vld [vmem:[%s2414_s28 + $0x234] ss:$8 sps:$4 sm:$0xff]   ;;  %v2176_v32 = vld [vmem:[%s2414_s28 + $0x230] ss:$8 sps:$4 sm:$0xff]   ;;  %v2179_v34 = vld [vmem:[%s2414_s28 + $0x244] ss:$8 sps:$4 sm:$0xff]  }
  0x16   : > { %v2181_v35 = vld [vmem:[%s2414_s28 + $0x40] ss:$8 sps:$4 sm:$0xff]   ;;  %v2183_v37 = vld [vmem:[%s2414_s28 + $0x54] ss:$8 sps:$4 sm:$0xff]   ;;  %v2187_v39 = vld [vmem:[%s2414_s28 + $0x50] ss:$8 sps:$4 sm:$0xff]  }
  0x17   : > { %1090 = vmatpush1.bf16.msra.mxu0 %v2141_v5  ;;  %2116 = vmatpush1.bf16.msra.mxu1 %v2141_v5  ;;  %v2182_v36 = vld [vmem:[%s2414_s28 + $0x240] ss:$8 sps:$4 sm:$0xff]   ;;  %v2185_v38 = vld [vmem:[%s2414_s28 + $0x254] ss:$8 sps:$4 sm:$0xff]   ;;  %v2188_v40 = vld [vmem:[%s2414_s28 + $0x250] ss:$8 sps:$4 sm:$0xff]  }
  0x18   : > { %1091 = vmatprep.subr.bf16.mxu0 %v2354_v1  ;;  %2101 = vmatprep.subr.bf16.mxu1 %v2354_v1  ;;  %v2189_v41 = vld [vmem:[%s2414_s28 + $0x64] ss:$8 sps:$4 sm:$0xff]   ;;  %v2193_v43 = vld [vmem:[%s2414_s28 + $0x60] ss:$8 sps:$4 sm:$0xff]   ;;  %v2195_v45 = vld [vmem:[%s2414_s28 + $0x74] ss:$8 sps:$4 sm:$0xff]  }
  0x19   : > { %v2191_v42 = vld [vmem:[%s2414_s28 + $0x264] ss:$8 sps:$4 sm:$0xff]   ;;  %v2194_v44 = vld [vmem:[%s2414_s28 + $0x260] ss:$8 sps:$4 sm:$0xff]   ;;  %v2197_v46 = vld [vmem:[%s2414_s28 + $0x274] ss:$8 sps:$4 sm:$0xff]  }
  0x1a   : > { %v2199_v47 = vld [vmem:[%s2414_s28 + $0x70] ss:$8 sps:$4 sm:$0xff]   ;;  %v2201_v49 = vld [vmem:[%s2414_s28 + $0x84] ss:$8 sps:$4 sm:$0xff]   ;;  %v2205_v51 = vld [vmem:[%s2414_s28 + $0x80] ss:$8 sps:$4 sm:$0xff]  }
  0x1b   : > { %1092 = vmatpush1.bf16.msra.mxu0 %v2142_v7  ;;  %2117 = vmatpush1.bf16.msra.mxu1 %v2142_v7  ;;  %v2200_v48 = vld [vmem:[%s2414_s28 + $0x270] ss:$8 sps:$4 sm:$0xff]   ;;  %v2203_v50 = vld [vmem:[%s2414_s28 + $0x284] ss:$8 sps:$4 sm:$0xff]   ;;  %v2206_v52 = vld [vmem:[%s2414_s28 + $0x280] ss:$8 sps:$4 sm:$0xff]  }
  0x1c   : > { %1093 = vmatprep.subr.bf16.mxu0 %v2354_v1  ;;  %2102 = vmatprep.subr.bf16.mxu1 %v2354_v1  ;;  %v2207_v53 = vld [vmem:[%s2414_s28 + $0x94] ss:$8 sps:$4 sm:$0xff]   ;;  %v2211_v55 = vld [vmem:[%s2414_s28 + $0x90] ss:$8 sps:$4 sm:$0xff]   ;;  %v2213_v57 = vld [vmem:[%s2414_s28 + $0xa4] ss:$8 sps:$4 sm:$0xff]  }
  0x1d   : > { %v2209_v54 = vld [vmem:[%s2414_s28 + $0x294] ss:$8 sps:$4 sm:$0xff]   ;;  %v2212_v56 = vld [vmem:[%s2414_s28 + $0x290] ss:$8 sps:$4 sm:$0xff]   ;;  %v2215_v58 = vld [vmem:[%s2414_s28 + $0x2a4] ss:$8 sps:$4 sm:$0xff]  }
  0x1e   : > { %v2217_v59 = vld [vmem:[%s2414_s28 + $0xa0] ss:$8 sps:$4 sm:$0xff]   ;;  %v2219_v61 = vld [vmem:[%s2414_s28 + $0xb4] ss:$8 sps:$4 sm:$0xff]   ;;  %v2223_v63 = vld [vmem:[%s2414_s28 + $0xb0] ss:$8 sps:$4 sm:$0xff]  }
  0x1f   : > { %1094 = vmatpush1.bf16.msra.mxu0 %v2143_v9  ;;  %2118 = vmatpush1.bf16.msra.mxu1 %v2143_v9  ;;  %v2218_v60 = vld [vmem:[%s2414_s28 + $0x2a0] ss:$8 sps:$4 sm:$0xff]   ;;  %v2221_v62 = vld [vmem:[%s2414_s28 + $0x2b4] ss:$8 sps:$4 sm:$0xff]   ;;  %v2224_v0 = vld [vmem:[%s2414_s28 + $0x2b0] ss:$8 sps:$4 sm:$0xff]  }
  0x20   : > { %1095 = vmatprep.subr.bf16.mxu0 %v2354_v1  ;;  %2103 = vmatprep.subr.bf16.mxu1 %v2354_v1  ;;  %v2227_v2 = vld [vmem:[%s2414_s28 + $0x2c4] ss:$8 sps:$4 sm:$0xff]   ;;  %v2229_v3 = vld [vmem:[%s2414_s28 + $0xc0] ss:$8 sps:$4 sm:$0xff]   ;;  %v2231_v5 = vld [vmem:[%s2414_s28 + $0xd4] ss:$8 sps:$4 sm:$0xff]  }
  0x21   : > { %v2230_v4 = vld [vmem:[%s2414_s28 + $0x2c0] ss:$8 sps:$4 sm:$0xff]   ;;  %v2233_v6 = vld [vmem:[%s2414_s28 + $0x2d4] ss:$8 sps:$4 sm:$0xff]   ;;  %v2235_v7 = vld [vmem:[%s2414_s28 + $0xd0] ss:$8 sps:$4 sm:$0xff]  }
  0x22   : > { %v2236_v8 = vld [vmem:[%s2414_s28 + $0x2d0] ss:$8 sps:$4 sm:$0xff]   ;;  %v2237_v9 = vld [vmem:[%s2414_s28 + $0xe4] ss:$8 sps:$4 sm:$0xff]  }
  0x23   : > { %1096 = vmatpush1.bf16.msra.mxu0 %v2144_v10  ;;  %2119 = vmatpush1.bf16.msra.mxu1 %v2144_v10  ;;  %v2239_v10 = vld [vmem:[%s2414_s28 + $0x2e4] ss:$8 sps:$4 sm:$0xff]  }
  0x24   : > { %1097 = vmatprep.subr.bf16.mxu0 %v2354_v1  ;;  %2104 = vmatprep.subr.bf16.mxu1 %v2354_v1 }
  0x27   : > { %1098 = vmatpush1.bf16.msra.mxu0 %v2145_v11  ;;  %2120 = vmatpush1.bf16.msra.mxu1 %v2145_v11  ;;  %v2241_v11 = vld [vmem:[%s2414_s28 + $0xe0] ss:$8 sps:$4 sm:$0xff]  }
  0x28   : > { %1099 = vmatprep.subr.bf16.mxu0 %v2354_v1  ;;  %2105 = vmatprep.subr.bf16.mxu1 %v2354_v1 }
  0x2b   : > { %1100 = vmatpush1.bf16.msra.mxu0 %v2146_v12  ;;  %2121 = vmatpush1.bf16.msra.mxu1 %v2146_v12  ;;  %v2242_v12 = vld [vmem:[%s2414_s28 + $0x2e0] ss:$8 sps:$4 sm:$0xff]  }
  0x2c   : > { %1101 = vmatprep.subr.bf16.mxu0 %v2354_v1  ;;  %2106 = vmatprep.subr.bf16.mxu1 %v2354_v1 }
  0x2f   : > { %1102 = vmatpush1.bf16.msra.mxu0 %v2147_v13  ;;  %2122 = vmatpush1.bf16.msra.mxu1 %v2147_v13  ;;  %v2243_v13 = vld [vmem:[%s2414_s28 + $0xf4] ss:$8 sps:$4 sm:$0xff]  }
  0x30   : > { %1103 = vmatprep.subr.bf16.mxu0 %v2354_v1  ;;  %2107 = vmatprep.subr.bf16.mxu1 %v2354_v1 }
  0x33   : > { %1104 = vmatpush1.bf16.msra.mxu0 %v2148_v14  ;;  %2123 = vmatpush1.bf16.msra.mxu1 %v2148_v14  ;;  %v2245_v14 = vld [vmem:[%s2414_s28 + $0x2f4] ss:$8 sps:$4 sm:$0xff]  }
  0x34   : > { %1105 = vmatprep.subr.bf16.mxu0 %v2354_v1  ;;  %2108 = vmatprep.subr.bf16.mxu1 %v2354_v1 }
  0x37   : > { %1106 = vmatpush1.bf16.msra.mxu0 %v2149_v15  ;;  %2124 = vmatpush1.bf16.msra.mxu1 %v2149_v15  ;;  %v2247_v15 = vld [vmem:[%s2414_s28 + $0xf0] ss:$8 sps:$4 sm:$0xff]  }
  0x38   : > { %1107 = vmatprep.subr.bf16.mxu0 %v2354_v1  ;;  %2109 = vmatprep.subr.bf16.mxu1 %v2354_v1 }
  0x3b   : > { %1108 = vmatpush1.bf16.msra.mxu0 %v2150_v16  ;;  %2125 = vmatpush1.bf16.msra.mxu1 %v2150_v16  ;;  %v2248_v16 = vld [vmem:[%s2414_s28 + $0x2f0] ss:$8 sps:$4 sm:$0xff]  }
  0x3c   : > { %1109 = vmatprep.subr.bf16.mxu0 %v2354_v1  ;;  %2110 = vmatprep.subr.bf16.mxu1 %v2354_v1 }
  0x3f   : > { %1110 = vmatpush1.bf16.msra.mxu0 %v2151_v17  ;;  %2126 = vmatpush1.bf16.msra.mxu1 %v2151_v17  ;;  %v2249_v17 = vld [vmem:[%s2414_s28 + $0x104] ss:$8 sps:$4 sm:$0xff]  }
  0x40   : > { %1111 = vmatprep.subr.bf16.mxu0 %v2354_v1  ;;  %2111 = vmatprep.subr.bf16.mxu1 %v2354_v1  ;;  %v2225_v1 = vld [vmem:[%s2414_s28 + $0xc4] ss:$8 sps:$4 sm:$0xff]  }
  0x43   : > { %1112 = vmatpush1.bf16.msra.mxu0 %v2152_v18  ;;  %2127 = vmatpush1.bf16.msra.mxu1 %v2152_v18  ;;  %v2251_v18 = vld [vmem:[%s2414_s28 + $0x304] ss:$8 sps:$4 sm:$0xff]  }
  0x46   : > { %1114 = vmatmul.mubr.bf16.vlgmr.msra.gmra.mrb[0].mxu0 %v2153_v19  ;;  %1370 = vmatmul.mubr.bf16.vlgmr.msra.gmra.mrb[0].mxu1 %v2156_v20  ;;  %v2253_v19 = vld [vmem:[%s2414_s28 + $0x100] ss:$8 sps:$4 sm:$0xff]  }
  0x47   : > { %1121 = vmatprep.mubr.bf16.mxu0 %v2159_v21  ;;  %1377 = vmatprep.mubr.bf16.mxu1 %v2161_v22  ;;  %v2254_v20 = vld [vmem:[%s2414_s28 + $0x300] ss:$8 sps:$4 sm:$0xff]   ;;  %v2255_v21 = vld [vmem:[%s2414_s28 + $0x114] ss:$8 sps:$4 sm:$0xff]  }
  0x48   : > { %v2257_v22 = vld [vmem:[%s2414_s28 + $0x314] ss:$8 sps:$4 sm:$0xff]  }
  0x4e   : > { %1122 = vmatmul.mubr.bf16.gmra.mrb[4].mxu0 %v2163_v23  ;;  %1378 = vmatmul.mubr.bf16.gmra.mrb[4].mxu1 %v2164_v24  ;;  %v2259_v23 = vld [vmem:[%s2414_s28 + $0x110] ss:$8 sps:$4 sm:$0xff]  }
  0x4f   : > { %1129 = vmatprep.mubr.bf16.mxu0 %v2165_v25  ;;  %1385 = vmatprep.mubr.bf16.mxu1 %v2167_v26  ;;  %v2260_v24 = vld [vmem:[%s2414_s28 + $0x310] ss:$8 sps:$4 sm:$0xff]   ;;  %v2261_v25 = vld [vmem:[%s2414_s28 + $0x124] ss:$8 sps:$4 sm:$0xff]  }
  0x50   : > { %v2263_v26 = vld [vmem:[%s2414_s28 + $0x324] ss:$8 sps:$4 sm:$0xff]  }
  0x56   : > { %1130 = vmatmul.mubr.bf16.gmra.mrb[8].mxu0 %v2169_v27  ;;  %1386 = vmatmul.mubr.bf16.gmra.mrb[8].mxu1 %v2170_v28  ;;  %v2265_v27 = vld [vmem:[%s2414_s28 + $0x120] ss:$8 sps:$4 sm:$0xff]  }
  0x57   : > { %1137 = vmatprep.mubr.bf16.mxu0 %v2171_v29  ;;  %1393 = vmatprep.mubr.bf16.mxu1 %v2173_v30  ;;  %v2266_v28 = vld [vmem:[%s2414_s28 + $0x320] ss:$8 sps:$4 sm:$0xff]   ;;  %v2267_v29 = vld [vmem:[%s2414_s28 + $0x134] ss:$8 sps:$4 sm:$0xff]  }
  0x58   : > { %v2269_v30 = vld [vmem:[%s2414_s28 + $0x334] ss:$8 sps:$4 sm:$0xff]  }
  0x5e   : > { %1138 = vmatmul.mubr.bf16.gmra.mrb[12].mxu0 %v2175_v31  ;;  %1394 = vmatmul.mubr.bf16.gmra.mrb[12].mxu1 %v2176_v32  ;;  %v2271_v31 = vld [vmem:[%s2414_s28 + $0x130] ss:$8 sps:$4 sm:$0xff]  }
  0x5f   : > { %1145 = vmatprep.mubr.bf16.mxu0 %v2177_v33  ;;  %1401 = vmatprep.mubr.bf16.mxu1 %v2179_v34  ;;  %v2272_v32 = vld [vmem:[%s2414_s28 + $0x330] ss:$8 sps:$4 sm:$0xff]   ;;  %v2273_v33 = vld [vmem:[%s2414_s28 + $0x144] ss:$8 sps:$4 sm:$0xff]  }
  0x60   : > { %v2275_v34 = vld [vmem:[%s2414_s28 + $0x344] ss:$8 sps:$4 sm:$0xff]  }
  0x66   : > { %1146 = vmatmul.mubr.bf16.gmra.mrb[16].mxu0 %v2181_v35  ;;  %1402 = vmatmul.mubr.bf16.gmra.mrb[16].mxu1 %v2182_v36  ;;  %v2277_v35 = vld [vmem:[%s2414_s28 + $0x140] ss:$8 sps:$4 sm:$0xff]  }
  0x67   : > { %1153 = vmatprep.mubr.bf16.mxu0 %v2183_v37  ;;  %1409 = vmatprep.mubr.bf16.mxu1 %v2185_v38  ;;  %v2278_v36 = vld [vmem:[%s2414_s28 + $0x340] ss:$8 sps:$4 sm:$0xff]   ;;  %v2279_v37 = vld [vmem:[%s2414_s28 + $0x154] ss:$8 sps:$4 sm:$0xff]  }
  0x68   : > { %v2281_v38 = vld [vmem:[%s2414_s28 + $0x354] ss:$8 sps:$4 sm:$0xff]  }
  0x6e   : > { %1154 = vmatmul.mubr.bf16.gmra.mrb[20].mxu0 %v2187_v39  ;;  %1410 = vmatmul.mubr.bf16.gmra.mrb[20].mxu1 %v2188_v40  ;;  %v2283_v39 = vld [vmem:[%s2414_s28 + $0x150] ss:$8 sps:$4 sm:$0xff]  }
  0x6f   : > { %1161 = vmatprep.mubr.bf16.mxu0 %v2189_v41  ;;  %1417 = vmatprep.mubr.bf16.mxu1 %v2191_v42  ;;  %v2284_v40 = vld [vmem:[%s2414_s28 + $0x350] ss:$8 sps:$4 sm:$0xff]   ;;  %v2285_v41 = vld [vmem:[%s2414_s28 + $0x164] ss:$8 sps:$4 sm:$0xff]  }
  0x70   : > { %v2287_v42 = vld [vmem:[%s2414_s28 + $0x364] ss:$8 sps:$4 sm:$0xff]  }
  0x76   : > { %1162 = vmatmul.mubr.bf16.gmra.mrb[24].mxu0 %v2193_v43  ;;  %1418 = vmatmul.mubr.bf16.gmra.mrb[24].mxu1 %v2194_v44  ;;  %v2289_v43 = vld [vmem:[%s2414_s28 + $0x160] ss:$8 sps:$4 sm:$0xff]  }
  0x77   : > { %1169 = vmatprep.mubr.bf16.mxu0 %v2195_v45  ;;  %1425 = vmatprep.mubr.bf16.mxu1 %v2197_v46  ;;  %v2290_v44 = vld [vmem:[%s2414_s28 + $0x360] ss:$8 sps:$4 sm:$0xff]   ;;  %v2291_v45 = vld [vmem:[%s2414_s28 + $0x174] ss:$8 sps:$4 sm:$0xff]  }
  0x78   : > { %v2293_v46 = vld [vmem:[%s2414_s28 + $0x374] ss:$8 sps:$4 sm:$0xff]  }
  0x7e   : > { %1170 = vmatmul.mubr.bf16.gmra.mrb[28].mxu0 %v2199_v47  ;;  %1426 = vmatmul.mubr.bf16.gmra.mrb[28].mxu1 %v2200_v48  ;;  %v2295_v47 = vld [vmem:[%s2414_s28 + $0x170] ss:$8 sps:$4 sm:$0xff]  }
  0x7f   : > { %1177 = vmatprep.mubr.bf16.mxu0 %v2201_v49  ;;  %1433 = vmatprep.mubr.bf16.mxu1 %v2203_v50  ;;  %v2296_v48 = vld [vmem:[%s2414_s28 + $0x370] ss:$8 sps:$4 sm:$0xff]   ;;  %v2297_v49 = vld [vmem:[%s2414_s28 + $0x184] ss:$8 sps:$4 sm:$0xff]  }
  0x80   : > { %v2299_v50 = vld [vmem:[%s2414_s28 + $0x384] ss:$8 sps:$4 sm:$0xff]  }
  0x86   : > { %1178 = vmatmul.mubr.bf16.gmra.mrb[32].mxu0 %v2205_v51  ;;  %1434 = vmatmul.mubr.bf16.gmra.mrb[32].mxu1 %v2206_v52  ;;  %v2301_v51 = vld [vmem:[%s2414_s28 + $0x180] ss:$8 sps:$4 sm:$0xff]  }
  0x87   : > { %1185 = vmatprep.mubr.bf16.mxu0 %v2207_v53  ;;  %1441 = vmatprep.mubr.bf16.mxu1 %v2209_v54  ;;  %v2302_v52 = vld [vmem:[%s2414_s28 + $0x380] ss:$8 sps:$4 sm:$0xff]   ;;  %v2303_v53 = vld [vmem:[%s2414_s28 + $0x194] ss:$8 sps:$4 sm:$0xff]  }
  0x88   : > { %v2305_v54 = vld [vmem:[%s2414_s28 + $0x394] ss:$8 sps:$4 sm:$0xff]  }
  0x8e   : > { %1186 = vmatmul.mubr.bf16.gmra.mrb[36].mxu0 %v2211_v55  ;;  %1442 = vmatmul.mubr.bf16.gmra.mrb[36].mxu1 %v2212_v56  ;;  %v2307_v55 = vld [vmem:[%s2414_s28 + $0x190] ss:$8 sps:$4 sm:$0xff]  }
  0x8f   : > { %1193 = vmatprep.mubr.bf16.mxu0 %v2213_v57  ;;  %1449 = vmatprep.mubr.bf16.mxu1 %v2215_v58  ;;  %v2308_v56 = vld [vmem:[%s2414_s28 + $0x390] ss:$8 sps:$4 sm:$0xff]   ;;  %v2309_v57 = vld [vmem:[%s2414_s28 + $0x1a4] ss:$8 sps:$4 sm:$0xff]  }
  0x90   : > { %v2311_v58 = vld [vmem:[%s2414_s28 + $0x3a4] ss:$8 sps:$4 sm:$0xff]  }
  0x96   : > { %1194 = vmatmul.mubr.bf16.gmra.mrb[40].mxu0 %v2217_v59  ;;  %1450 = vmatmul.mubr.bf16.gmra.mrb[40].mxu1 %v2218_v60  ;;  %v2313_v59 = vld [vmem:[%s2414_s28 + $0x1a0] ss:$8 sps:$4 sm:$0xff]  }
  0x97   : > { %1201 = vmatprep.mubr.bf16.mxu0 %v2219_v61  ;;  %1457 = vmatprep.mubr.bf16.mxu1 %v2221_v62  ;;  %v2314_v60 = vld [vmem:[%s2414_s28 + $0x3a0] ss:$8 sps:$4 sm:$0xff]   ;;  %v2315_v61 = vld [vmem:[%s2414_s28 + $0x1b4] ss:$8 sps:$4 sm:$0xff]  }
  0x98   : > { %v2317_v62 = vld [vmem:[%s2414_s28 + $0x3b4] ss:$8 sps:$4 sm:$0xff]  }
  0x9e   : > { %1202 = vmatmul.mubr.bf16.gmra.mrb[44].mxu0 %v2223_v63  ;;  %1458 = vmatmul.mubr.bf16.gmra.mrb[44].mxu1 %v2224_v0  ;;  %v2586_v63 = vld [vmem:[%s2879_s2] ss:$0 sm:$0xff] }
  0x9f   : > { %1209 = vmatprep.mubr.bf16.mxu0 %v2225_v1  ;;  %1465 = vmatprep.mubr.bf16.mxu1 %v2227_v2 }
  0xa6   : > { %1210 = vmatmul.mubr.bf16.gmra.mrb[48].mxu0 %v2229_v3  ;;  %1466 = vmatmul.mubr.bf16.gmra.mrb[48].mxu1 %v2230_v4 }
  0xa7   : > { %1217 = vmatprep.mubr.bf16.mxu0 %v2231_v5  ;;  %1473 = vmatprep.mubr.bf16.mxu1 %v2233_v6  ;;  %v2319_v6 = vld [vmem:[%s2414_s28 + $0x1b0] ss:$8 sps:$4 sm:$0xff]  }
  0xae   : > { %1218 = vmatmul.mubr.bf16.gmra.mrb[52].mxu0 %v2235_v7  ;;  %1474 = vmatmul.mubr.bf16.gmra.mrb[52].mxu1 %v2236_v8  ;;  %v2320_v7 = vld [vmem:[%s2414_s28 + $0x3b0] ss:$8 sps:$4 sm:$0xff]  }
  0xaf   : > { %1225 = vmatprep.mubr.bf16.mxu0 %v2237_v9  ;;  %1481 = vmatprep.mubr.bf16.mxu1 %v2239_v10  ;;  %v2321_v10 = vld [vmem:[%s2414_s28 + $0x1c4] ss:$8 sps:$4 sm:$0xff]  }
  0xb6   : > { %1226 = vmatmul.mubr.bf16.gmra.mrb[56].mxu0 %v2241_v11  ;;  %1482 = vmatmul.mubr.bf16.gmra.mrb[56].mxu1 %v2242_v12  ;;  %v2323_v11 = vld [vmem:[%s2414_s28 + $0x3c4] ss:$8 sps:$4 sm:$0xff]  }
  0xb7   : > { %1233 = vmatprep.mubr.bf16.mxu0 %v2243_v13  ;;  %1489 = vmatprep.mubr.bf16.mxu1 %v2245_v14 }
  0xbe   : > { %1234 = vmatmul.mubr.bf16.gmra.mrb[60].mxu0 %v2247_v15  ;;  %1490 = vmatmul.mubr.bf16.gmra.mrb[60].mxu1 %v2248_v16 }
  0xbf   : > { %1241 = vmatprep.mubr.bf16.mxu0 %v2249_v17  ;;  %1497 = vmatprep.mubr.bf16.mxu1 %v2251_v18 }
  0xc6   : > { %1242 = vmatmul.mubr.bf16.gmra.mrb[64].mxu0 %v2253_v19  ;;  %1498 = vmatmul.mubr.bf16.gmra.mrb[64].mxu1 %v2254_v20 }
  0xc7   : > { %1249 = vmatprep.mubr.bf16.mxu0 %v2255_v21  ;;  %1505 = vmatprep.mubr.bf16.mxu1 %v2257_v22 }
  0xce   : > { %1250 = vmatmul.mubr.bf16.gmra.mrb[68].mxu0 %v2259_v23  ;;  %1506 = vmatmul.mubr.bf16.gmra.mrb[68].mxu1 %v2260_v24 }
  0xcf   : > { %1257 = vmatprep.mubr.bf16.mxu0 %v2261_v25  ;;  %1513 = vmatprep.mubr.bf16.mxu1 %v2263_v26  ;;  %v2325_v26 = vld [vmem:[%s2414_s28 + $0x1c0] ss:$8 sps:$4 sm:$0xff]  }
  0xd6   : > { %1258 = vmatmul.mubr.bf16.gmra.mrb[72].mxu0 %v2265_v27  ;;  %1514 = vmatmul.mubr.bf16.gmra.mrb[72].mxu1 %v2266_v28  ;;  %v2326_v27 = vld [vmem:[%s2414_s28 + $0x3c0] ss:$8 sps:$4 sm:$0xff]  }
  0xd7   : > { %1265 = vmatprep.mubr.bf16.mxu0 %v2267_v29  ;;  %1521 = vmatprep.mubr.bf16.mxu1 %v2269_v30  ;;  %v2327_v30 = vld [vmem:[%s2414_s28 + $0x1d4] ss:$8 sps:$4 sm:$0xff]  }
  0xde   : > { %1266 = vmatmul.mubr.bf16.gmra.mrb[76].mxu0 %v2271_v31  ;;  %1522 = vmatmul.mubr.bf16.gmra.mrb[76].mxu1 %v2272_v32  ;;  %v2329_v31 = vld [vmem:[%s2414_s28 + $0x3d4] ss:$8 sps:$4 sm:$0xff]  }
  0xdf   : > { %1273 = vmatprep.mubr.bf16.mxu0 %v2273_v33  ;;  %1529 = vmatprep.mubr.bf16.mxu1 %v2275_v34 }
  0xe6   : > { %1274 = vmatmul.mubr.bf16.gmra.mrb[80].mxu0 %v2277_v35  ;;  %1530 = vmatmul.mubr.bf16.gmra.mrb[80].mxu1 %v2278_v36 }
  0xe7   : > { %1281 = vmatprep.mubr.bf16.mxu0 %v2279_v37  ;;  %1537 = vmatprep.mubr.bf16.mxu1 %v2281_v38 }
  0xee   : > { %1282 = vmatmul.mubr.bf16.gmra.mrb[84].mxu0 %v2283_v39  ;;  %1538 = vmatmul.mubr.bf16.gmra.mrb[84].mxu1 %v2284_v40 }
  0xef   : > { %1289 = vmatprep.mubr.bf16.mxu0 %v2285_v41  ;;  %1545 = vmatprep.mubr.bf16.mxu1 %v2287_v42 }
  0xf6   : > { %1290 = vmatmul.mubr.bf16.gmra.mrb[88].mxu0 %v2289_v43  ;;  %1546 = vmatmul.mubr.bf16.gmra.mrb[88].mxu1 %v2290_v44 }
  0xf7   : > { %1297 = vmatprep.mubr.bf16.mxu0 %v2291_v45  ;;  %1553 = vmatprep.mubr.bf16.mxu1 %v2293_v46  ;;  %v2331_v46 = vld [vmem:[%s2414_s28 + $0x1d0] ss:$8 sps:$4 sm:$0xff]  }
  0xfe   : > { %1298 = vmatmul.mubr.bf16.gmra.mrb[92].mxu0 %v2295_v47  ;;  %1554 = vmatmul.mubr.bf16.gmra.mrb[92].mxu1 %v2296_v48  ;;  %v2332_v47 = vld [vmem:[%s2414_s28 + $0x3d0] ss:$8 sps:$4 sm:$0xff]  }
  0xff   : > { %1305 = vmatprep.mubr.bf16.mxu0 %v2297_v49  ;;  %1561 = vmatprep.mubr.bf16.mxu1 %v2299_v50  ;;  %v2333_v50 = vld [vmem:[%s2414_s28 + $0x1e4] ss:$8 sps:$4 sm:$0xff]  }
 0x106   : > { %1306 = vmatmul.mubr.bf16.gmra.mrb[96].mxu0 %v2301_v51  ;;  %1562 = vmatmul.mubr.bf16.gmra.mrb[96].mxu1 %v2302_v52  ;;  %v2335_v51 = vld [vmem:[%s2414_s28 + $0x3e4] ss:$8 sps:$4 sm:$0xff]  }
 0x107   : > { %1313 = vmatprep.mubr.bf16.mxu0 %v2303_v53  ;;  %1569 = vmatprep.mubr.bf16.mxu1 %v2305_v54 }
 0x10e   : > { %1314 = vmatmul.mubr.bf16.gmra.mrb[100].mxu0 %v2307_v55  ;;  %1570 = vmatmul.mubr.bf16.gmra.mrb[100].mxu1 %v2308_v56 }
 0x10f   : > { %1321 = vmatprep.mubr.bf16.mxu0 %v2309_v57  ;;  %1577 = vmatprep.mubr.bf16.mxu1 %v2311_v58 }
 0x116   : > { %1322 = vmatmul.mubr.bf16.gmra.mrb[104].mxu0 %v2313_v59  ;;  %1578 = vmatmul.mubr.bf16.gmra.mrb[104].mxu1 %v2314_v60 }
 0x117   : > { %1329 = vmatprep.mubr.bf16.mxu0 %v2315_v61  ;;  %1585 = vmatprep.mubr.bf16.mxu1 %v2317_v62 }
 0x119   : > { %v1115_v0 = vpop.f32.mrb[0].mxu0  ;;  %v1371_v1 = vpop.f32.mrb[0].mxu1 }
 0x11a   : > { %v1116_v2 = vadd.f32 %v2586_v63, %v1115_v0  ;;  %v1372_v3 = vadd.f32 %v2586_v63, %v1371_v1  ;;  %v1117_v4 = vpop.f32.mrb[1].mxu0  ;;  %v1373_v5 = vpop.f32.mrb[1].mxu1 }
 0x11b   : > { %v1118_v8 = vpop.f32.mrb[2].mxu0  ;;  %v1374_v9 = vpop.f32.mrb[2].mxu1  ;;  %v2338_v4 = vld [vmem:[%s2414_s28 + $0x3e0] ss:$8 sps:$4 sm:$0xff]  }
 0x11c   : > { %v1626_v12 = vmax.f32 %v1116_v2, 0.0  ;;  %v1690_v13 = vmax.f32 %v1372_v3, 0.0  ;;  %v1119_v14 = vadd.f32 %v2586_v63, %v1118_v8  ;;  %v1375_v15 = vadd.f32 %v2586_v63, %v1374_v9  ;;  %v1120_v16 = vpop.f32.mrb[3].mxu0  ;;  %v1376_v17 = vpop.f32.mrb[3].mxu1  ;;  %v2337_v3 = vld [vmem:[%s2414_s28 + $0x1e0] ss:$8 sps:$4 sm:$0xff]  }
 0x11d   : > { %v2341_v8 = vld [vmem:[%s2414_s28 + $0x3f4] ss:$8 sps:$4 sm:$0xff]  }
 0x11e   : > { %1754 = vst [vmem:[%s2597_s5] sm:$0xff] %v1626_v12  ;;  %1818 = vst [vmem:[%s2597_s5 + $0x200] sm:$0xff] %v1690_v13  ;;  %v1627_v18 = vmax.f32 %v1119_v14, 0.0  ;;  %v1691_v19 = vmax.f32 %v1375_v15, 0.0  ;;  %1330 = vmatmul.mubr.bf16.gmra.mrb[108].mxu0 %v2319_v6  ;;  %1586 = vmatmul.mubr.bf16.gmra.mrb[108].mxu1 %v2320_v7  ;;  %v2339_v7 = vld [vmem:[%s2414_s28 + $0x1f4] ss:$8 sps:$4 sm:$0xff]  }
 0x11f   : > { %1337 = vmatprep.mubr.bf16.mxu0 %v2321_v10  ;;  %1593 = vmatprep.mubr.bf16.mxu1 %v2323_v11 }
 0x120   : > { %1755 = vst [vmem:[%s2597_s5 + $0x8] sm:$0xff] %v1627_v18  ;;  %1819 = vst [vmem:[%s2597_s5 + $0x208] sm:$0xff] %v1691_v19 }
 0x121   : > { %v1123_v20 = vpop.f32.mrb[4].mxu0  ;;  %v1379_v21 = vpop.f32.mrb[4].mxu1 }
 0x122   : > { %v1124_v22 = vadd.f32 %v2586_v63, %v1123_v20  ;;  %v1380_v23 = vadd.f32 %v2586_v63, %v1379_v21  ;;  %v1125_v24 = vpop.f32.mrb[5].mxu0  ;;  %v1381_v25 = vpop.f32.mrb[5].mxu1 }
 0x123   : > { %v1126_v28 = vpop.f32.mrb[6].mxu0  ;;  %v1382_v29 = vpop.f32.mrb[6].mxu1  ;;  %v2344_v24 = vld [vmem:[%s2414_s28 + $0x3f0] ss:$8 sps:$4 sm:$0xff]  }
 0x124   : > { %v1628_v32 = vmax.f32 %v1124_v22, 0.0  ;;  %v1692_v33 = vmax.f32 %v1380_v23, 0.0  ;;  %v1127_v34 = vadd.f32 %v2586_v63, %v1126_v28  ;;  %v1383_v35 = vadd.f32 %v2586_v63, %v1382_v29  ;;  %v1128_v36 = vpop.f32.mrb[7].mxu0  ;;  %v1384_v37 = vpop.f32.mrb[7].mxu1  ;;  %v2343_v23 = vld [vmem:[%s2414_s28 + $0x1f0] ss:$8 sps:$4 sm:$0xff]  }
 0x126   : > { %1756 = vst [vmem:[%s2597_s5 + $0x10] sm:$0xff] %v1628_v32  ;;  %1820 = vst [vmem:[%s2597_s5 + $0x210] sm:$0xff] %v1692_v33  ;;  %v1629_v38 = vmax.f32 %v1127_v34, 0.0  ;;  %v1693_v39 = vmax.f32 %v1383_v35, 0.0  ;;  %1338 = vmatmul.mubr.bf16.gmra.mrb[112].mxu0 %v2325_v26  ;;  %1594 = vmatmul.mubr.bf16.gmra.mrb[112].mxu1 %v2326_v27 }
 0x127   : > { %1345 = vmatprep.mubr.bf16.mxu0 %v2327_v30  ;;  %1601 = vmatprep.mubr.bf16.mxu1 %v2329_v31 }
 0x128   : > { %1757 = vst [vmem:[%s2597_s5 + $0x18] sm:$0xff] %v1629_v38  ;;  %1821 = vst [vmem:[%s2597_s5 + $0x218] sm:$0xff] %v1693_v39 }
 0x129   : > { %v1131_v40 = vpop.f32.mrb[8].mxu0  ;;  %v1387_v41 = vpop.f32.mrb[8].mxu1 }
 0x12a   : > { %v1132_v42 = vadd.f32 %v2586_v63, %v1131_v40  ;;  %v1388_v43 = vadd.f32 %v2586_v63, %v1387_v41  ;;  %v1133_v44 = vpop.f32.mrb[9].mxu0  ;;  %v1389_v45 = vpop.f32.mrb[9].mxu1 }
 0x12b   : > { %v1134_v48 = vpop.f32.mrb[10].mxu0  ;;  %v1390_v49 = vpop.f32.mrb[10].mxu1 }
 0x12c   : > { %v1630_v52 = vmax.f32 %v1132_v42, 0.0  ;;  %v1694_v53 = vmax.f32 %v1388_v43, 0.0  ;;  %v1135_v54 = vadd.f32 %v2586_v63, %v1134_v48  ;;  %v1391_v55 = vadd.f32 %v2586_v63, %v1390_v49  ;;  %v1136_v56 = vpop.f32.mrb[11].mxu0  ;;  %v1392_v57 = vpop.f32.mrb[11].mxu1 }
 0x12e   : > { %1758 = vst [vmem:[%s2597_s5 + $0x20] sm:$0xff] %v1630_v52  ;;  %1822 = vst [vmem:[%s2597_s5 + $0x220] sm:$0xff] %v1694_v53  ;;  %v1631_v58 = vmax.f32 %v1135_v54, 0.0  ;;  %v1695_v59 = vmax.f32 %v1391_v55, 0.0  ;;  %1346 = vmatmul.mubr.bf16.gmra.mrb[116].mxu0 %v2331_v46  ;;  %1602 = vmatmul.mubr.bf16.gmra.mrb[116].mxu1 %v2332_v47 }
 0x12f   : > { %1353 = vmatprep.mubr.bf16.mxu0 %v2333_v50  ;;  %1609 = vmatprep.mubr.bf16.mxu1 %v2335_v51 }
 0x130   : > { %1759 = vst [vmem:[%s2597_s5 + $0x28] sm:$0xff] %v1631_v58  ;;  %1823 = vst [vmem:[%s2597_s5 + $0x228] sm:$0xff] %v1695_v59 }
 0x131   : > { %v1139_v60 = vpop.f32.mrb[12].mxu0  ;;  %v1395_v61 = vpop.f32.mrb[12].mxu1 }
 0x132   : > { %v1140_v62 = vadd.f32 %v2586_v63, %v1139_v60  ;;  %v1396_v0 = vadd.f32 %v2586_v63, %v1395_v61  ;;  %v1141_v1 = vpop.f32.mrb[13].mxu0  ;;  %v1397_v2 = vpop.f32.mrb[13].mxu1 }
 0x133   : > { %v1142_v5 = vpop.f32.mrb[14].mxu0  ;;  %v1398_v6 = vpop.f32.mrb[14].mxu1 }
 0x134   : > { %v1632_v9 = vmax.f32 %v1140_v62, 0.0  ;;  %v1696_v10 = vmax.f32 %v1396_v0, 0.0  ;;  %v1143_v11 = vadd.f32 %v2586_v63, %v1142_v5  ;;  %v1399_v12 = vadd.f32 %v2586_v63, %v1398_v6  ;;  %v1144_v13 = vpop.f32.mrb[15].mxu0  ;;  %v1400_v14 = vpop.f32.mrb[15].mxu1 }
 0x136   : > { %1760 = vst [vmem:[%s2597_s5 + $0x30] sm:$0xff] %v1632_v9  ;;  %1824 = vst [vmem:[%s2597_s5 + $0x230] sm:$0xff] %v1696_v10  ;;  %v1633_v15 = vmax.f32 %v1143_v11, 0.0  ;;  %v1697_v16 = vmax.f32 %v1399_v12, 0.0  ;;  %1354 = vmatmul.mubr.bf16.gmra.mrb[120].mxu0 %v2337_v3  ;;  %1610 = vmatmul.mubr.bf16.gmra.mrb[120].mxu1 %v2338_v4 }
 0x137   : > { %1361 = vmatprep.mubr.bf16.mxu0 %v2339_v7  ;;  %1617 = vmatprep.mubr.bf16.mxu1 %v2341_v8 }
 0x138   : > { %1761 = vst [vmem:[%s2597_s5 + $0x38] sm:$0xff] %v1633_v15  ;;  %1825 = vst [vmem:[%s2597_s5 + $0x238] sm:$0xff] %v1697_v16 }
 0x139   : > { %v1147_v17 = vpop.f32.mrb[16].mxu0  ;;  %v1403_v18 = vpop.f32.mrb[16].mxu1 }
 0x13a   : > { %v1148_v19 = vadd.f32 %v2586_v63, %v1147_v17  ;;  %v1404_v20 = vadd.f32 %v2586_v63, %v1403_v18  ;;  %v1149_v21 = vpop.f32.mrb[17].mxu0  ;;  %v1405_v22 = vpop.f32.mrb[17].mxu1 }
 0x13b   : > { %v1150_v25 = vpop.f32.mrb[18].mxu0  ;;  %v1406_v26 = vpop.f32.mrb[18].mxu1 }
 0x13c   : > { %v1634_v27 = vmax.f32 %v1148_v19, 0.0  ;;  %v1698_v28 = vmax.f32 %v1404_v20, 0.0  ;;  %v1151_v29 = vadd.f32 %v2586_v63, %v1150_v25  ;;  %v1407_v30 = vadd.f32 %v2586_v63, %v1406_v26  ;;  %v1152_v31 = vpop.f32.mrb[19].mxu0  ;;  %v1408_v32 = vpop.f32.mrb[19].mxu1 }
 0x13e   : > { %1762 = vst [vmem:[%s2597_s5 + $0x40] sm:$0xff] %v1634_v27  ;;  %1826 = vst [vmem:[%s2597_s5 + $0x240] sm:$0xff] %v1698_v28  ;;  %v1635_v33 = vmax.f32 %v1151_v29, 0.0  ;;  %v1699_v34 = vmax.f32 %v1407_v30, 0.0  ;;  %1362 = vmatmul.mubr.bf16.gmra.mrb[124].mxu0 %v2343_v23  ;;  %1618 = vmatmul.mubr.bf16.gmra.mrb[124].mxu1 %v2344_v24 }
 0x140   : > { %1763 = vst [vmem:[%s2597_s5 + $0x48] sm:$0xff] %v1635_v33  ;;  %1827 = vst [vmem:[%s2597_s5 + $0x248] sm:$0xff] %v1699_v34 }
 0x141   : > { %v1155_v35 = vpop.f32.mrb[20].mxu0  ;;  %v1411_v36 = vpop.f32.mrb[20].mxu1 }
 0x142   : > { %v1156_v37 = vadd.f32 %v2586_v63, %v1155_v35  ;;  %v1412_v38 = vadd.f32 %v2586_v63, %v1411_v36  ;;  %v1157_v39 = vpop.f32.mrb[21].mxu0  ;;  %v1413_v40 = vpop.f32.mrb[21].mxu1 }
 0x143   : > { %v1158_v41 = vpop.f32.mrb[22].mxu0  ;;  %v1414_v42 = vpop.f32.mrb[22].mxu1 }
 0x144   : > { %v1636_v43 = vmax.f32 %v1156_v37, 0.0  ;;  %v1700_v44 = vmax.f32 %v1412_v38, 0.0  ;;  %v1159_v45 = vadd.f32 %v2586_v63, %v1158_v41  ;;  %v1415_v46 = vadd.f32 %v2586_v63, %v1414_v42  ;;  %v1160_v47 = vpop.f32.mrb[23].mxu0  ;;  %v1416_v48 = vpop.f32.mrb[23].mxu1 }
 0x146   : > { %1764 = vst [vmem:[%s2597_s5 + $0x50] sm:$0xff] %v1636_v43  ;;  %1828 = vst [vmem:[%s2597_s5 + $0x250] sm:$0xff] %v1700_v44  ;;  %v1637_v49 = vmax.f32 %v1159_v45, 0.0  ;;  %v1701_v50 = vmax.f32 %v1415_v46, 0.0 }
 0x148   : > { %1765 = vst [vmem:[%s2597_s5 + $0x58] sm:$0xff] %v1637_v49  ;;  %1829 = vst [vmem:[%s2597_s5 + $0x258] sm:$0xff] %v1701_v50 }
 0x149   : > { %v1163_v51 = vpop.f32.mrb[24].mxu0  ;;  %v1419_v52 = vpop.f32.mrb[24].mxu1 }
 0x14a   : > { %v1164_v53 = vadd.f32 %v2586_v63, %v1163_v51  ;;  %v1420_v54 = vadd.f32 %v2586_v63, %v1419_v52  ;;  %v1165_v55 = vpop.f32.mrb[25].mxu0  ;;  %v1421_v56 = vpop.f32.mrb[25].mxu1 }
 0x14b   : > { %v1166_v57 = vpop.f32.mrb[26].mxu0  ;;  %v1422_v58 = vpop.f32.mrb[26].mxu1 }
 0x14c   : > { %v1638_v59 = vmax.f32 %v1164_v53, 0.0  ;;  %v1702_v60 = vmax.f32 %v1420_v54, 0.0  ;;  %v1167_v61 = vadd.f32 %v2586_v63, %v1166_v57  ;;  %v1423_v62 = vadd.f32 %v2586_v63, %v1422_v58  ;;  %v1168_v0 = vpop.f32.mrb[27].mxu0  ;;  %v1424_v1 = vpop.f32.mrb[27].mxu1 }
 0x14e   : > { %1766 = vst [vmem:[%s2597_s5 + $0x60] sm:$0xff] %v1638_v59  ;;  %1830 = vst [vmem:[%s2597_s5 + $0x260] sm:$0xff] %v1702_v60  ;;  %v1639_v2 = vmax.f32 %v1167_v61, 0.0  ;;  %v1703_v3 = vmax.f32 %v1423_v62, 0.0 }
 0x150   : > { %1767 = vst [vmem:[%s2597_s5 + $0x68] sm:$0xff] %v1639_v2  ;;  %1831 = vst [vmem:[%s2597_s5 + $0x268] sm:$0xff] %v1703_v3 }
 0x151   : > { %v1171_v4 = vpop.f32.mrb[28].mxu0  ;;  %v1427_v5 = vpop.f32.mrb[28].mxu1 }
 0x152   : > { %v1172_v6 = vadd.f32 %v2586_v63, %v1171_v4  ;;  %v1428_v7 = vadd.f32 %v2586_v63, %v1427_v5  ;;  %v1173_v8 = vpop.f32.mrb[29].mxu0  ;;  %v1429_v9 = vpop.f32.mrb[29].mxu1 }
 0x153   : > { %v1174_v10 = vpop.f32.mrb[30].mxu0  ;;  %v1430_v11 = vpop.f32.mrb[30].mxu1 }
 0x154   : > { %v1640_v12 = vmax.f32 %v1172_v6, 0.0  ;;  %v1704_v13 = vmax.f32 %v1428_v7, 0.0  ;;  %v1175_v14 = vadd.f32 %v2586_v63, %v1174_v10  ;;  %v1431_v15 = vadd.f32 %v2586_v63, %v1430_v11  ;;  %v1176_v16 = vpop.f32.mrb[31].mxu0  ;;  %v1432_v17 = vpop.f32.mrb[31].mxu1 }
 0x156   : > { %1768 = vst [vmem:[%s2597_s5 + $0x70] sm:$0xff] %v1640_v12  ;;  %1832 = vst [vmem:[%s2597_s5 + $0x270] sm:$0xff] %v1704_v13  ;;  %v1641_v18 = vmax.f32 %v1175_v14, 0.0  ;;  %v1705_v19 = vmax.f32 %v1431_v15, 0.0 }
 0x158   : > { %1769 = vst [vmem:[%s2597_s5 + $0x78] sm:$0xff] %v1641_v18  ;;  %1833 = vst [vmem:[%s2597_s5 + $0x278] sm:$0xff] %v1705_v19 }
 0x159   : > { %v1179_v20 = vpop.f32.mrb[32].mxu0  ;;  %v1435_v21 = vpop.f32.mrb[32].mxu1 }
 0x15a   : > { %v1180_v22 = vadd.f32 %v2586_v63, %v1179_v20  ;;  %v1436_v23 = vadd.f32 %v2586_v63, %v1435_v21  ;;  %v1181_v24 = vpop.f32.mrb[33].mxu0  ;;  %v1437_v25 = vpop.f32.mrb[33].mxu1 }
 0x15b   : > { %v1182_v26 = vpop.f32.mrb[34].mxu0  ;;  %v1438_v27 = vpop.f32.mrb[34].mxu1 }
 0x15c   : > { %v1642_v28 = vmax.f32 %v1180_v22, 0.0  ;;  %v1706_v29 = vmax.f32 %v1436_v23, 0.0  ;;  %v1183_v30 = vadd.f32 %v2586_v63, %v1182_v26  ;;  %v1439_v31 = vadd.f32 %v2586_v63, %v1438_v27  ;;  %v1184_v32 = vpop.f32.mrb[35].mxu0  ;;  %v1440_v33 = vpop.f32.mrb[35].mxu1 }
 0x15e   : > { %1770 = vst [vmem:[%s2597_s5 + $0x80] sm:$0xff] %v1642_v28  ;;  %1834 = vst [vmem:[%s2597_s5 + $0x280] sm:$0xff] %v1706_v29  ;;  %v1643_v34 = vmax.f32 %v1183_v30, 0.0  ;;  %v1707_v35 = vmax.f32 %v1439_v31, 0.0 }
 0x160   : > { %1771 = vst [vmem:[%s2597_s5 + $0x88] sm:$0xff] %v1643_v34  ;;  %1835 = vst [vmem:[%s2597_s5 + $0x288] sm:$0xff] %v1707_v35 }
 0x161   : > { %v1187_v36 = vpop.f32.mrb[36].mxu0  ;;  %v1443_v37 = vpop.f32.mrb[36].mxu1 }
 0x162   : > { %v1188_v38 = vadd.f32 %v2586_v63, %v1187_v36  ;;  %v1444_v39 = vadd.f32 %v2586_v63, %v1443_v37  ;;  %v1189_v40 = vpop.f32.mrb[37].mxu0  ;;  %v1445_v41 = vpop.f32.mrb[37].mxu1 }
 0x163   : > { %v1190_v42 = vpop.f32.mrb[38].mxu0  ;;  %v1446_v43 = vpop.f32.mrb[38].mxu1 }
 0x164   : > { %v1644_v44 = vmax.f32 %v1188_v38, 0.0  ;;  %v1708_v45 = vmax.f32 %v1444_v39, 0.0  ;;  %v1191_v46 = vadd.f32 %v2586_v63, %v1190_v42  ;;  %v1447_v47 = vadd.f32 %v2586_v63, %v1446_v43  ;;  %v1192_v48 = vpop.f32.mrb[39].mxu0  ;;  %v1448_v49 = vpop.f32.mrb[39].mxu1 }
 0x166   : > { %1772 = vst [vmem:[%s2597_s5 + $0x90] sm:$0xff] %v1644_v44  ;;  %1836 = vst [vmem:[%s2597_s5 + $0x290] sm:$0xff] %v1708_v45  ;;  %v1645_v50 = vmax.f32 %v1191_v46, 0.0  ;;  %v1709_v51 = vmax.f32 %v1447_v47, 0.0 }
 0x168   : > { %1773 = vst [vmem:[%s2597_s5 + $0x98] sm:$0xff] %v1645_v50  ;;  %1837 = vst [vmem:[%s2597_s5 + $0x298] sm:$0xff] %v1709_v51 }
 0x169   : > { %v1195_v52 = vpop.f32.mrb[40].mxu0  ;;  %v1451_v53 = vpop.f32.mrb[40].mxu1 }
 0x16a   : > { %v1196_v54 = vadd.f32 %v2586_v63, %v1195_v52  ;;  %v1452_v55 = vadd.f32 %v2586_v63, %v1451_v53  ;;  %v1197_v56 = vpop.f32.mrb[41].mxu0  ;;  %v1453_v57 = vpop.f32.mrb[41].mxu1 }
 0x16b   : > { %v1198_v58 = vpop.f32.mrb[42].mxu0  ;;  %v1454_v59 = vpop.f32.mrb[42].mxu1 }
 0x16c   : > { %v1646_v60 = vmax.f32 %v1196_v54, 0.0  ;;  %v1710_v61 = vmax.f32 %v1452_v55, 0.0  ;;  %v1199_v62 = vadd.f32 %v2586_v63, %v1198_v58  ;;  %v1455_v0 = vadd.f32 %v2586_v63, %v1454_v59  ;;  %v1200_v1 = vpop.f32.mrb[43].mxu0  ;;  %v1456_v2 = vpop.f32.mrb[43].mxu1 }
 0x16e   : > { %1774 = vst [vmem:[%s2597_s5 + $0xa0] sm:$0xff] %v1646_v60  ;;  %1838 = vst [vmem:[%s2597_s5 + $0x2a0] sm:$0xff] %v1710_v61  ;;  %v1647_v3 = vmax.f32 %v1199_v62, 0.0  ;;  %v1711_v4 = vmax.f32 %v1455_v0, 0.0 }
 0x170   : > { %1775 = vst [vmem:[%s2597_s5 + $0xa8] sm:$0xff] %v1647_v3  ;;  %1839 = vst [vmem:[%s2597_s5 + $0x2a8] sm:$0xff] %v1711_v4 }
 0x171   : > { %v1203_v5 = vpop.f32.mrb[44].mxu0  ;;  %v1459_v6 = vpop.f32.mrb[44].mxu1 }
 0x172   : > { %v1204_v7 = vadd.f32 %v2586_v63, %v1203_v5  ;;  %v1460_v8 = vadd.f32 %v2586_v63, %v1459_v6  ;;  %v1205_v9 = vpop.f32.mrb[45].mxu0  ;;  %v1461_v10 = vpop.f32.mrb[45].mxu1 }
 0x173   : > { %v1206_v11 = vpop.f32.mrb[46].mxu0  ;;  %v1462_v12 = vpop.f32.mrb[46].mxu1 }
 0x174   : > { %v1648_v13 = vmax.f32 %v1204_v7, 0.0  ;;  %v1712_v14 = vmax.f32 %v1460_v8, 0.0  ;;  %v1207_v15 = vadd.f32 %v2586_v63, %v1206_v11  ;;  %v1463_v16 = vadd.f32 %v2586_v63, %v1462_v12  ;;  %v1208_v17 = vpop.f32.mrb[47].mxu0  ;;  %v1464_v18 = vpop.f32.mrb[47].mxu1 }
 0x176   : > { %1776 = vst [vmem:[%s2597_s5 + $0xb0] sm:$0xff] %v1648_v13  ;;  %1840 = vst [vmem:[%s2597_s5 + $0x2b0] sm:$0xff] %v1712_v14  ;;  %v1649_v19 = vmax.f32 %v1207_v15, 0.0  ;;  %v1713_v20 = vmax.f32 %v1463_v16, 0.0 }
 0x178   : > { %1777 = vst [vmem:[%s2597_s5 + $0xb8] sm:$0xff] %v1649_v19  ;;  %1841 = vst [vmem:[%s2597_s5 + $0x2b8] sm:$0xff] %v1713_v20 }
 0x179   : > { %v1211_v21 = vpop.f32.mrb[48].mxu0  ;;  %v1467_v22 = vpop.f32.mrb[48].mxu1 }
 0x17a   : > { %v1212_v23 = vadd.f32 %v2586_v63, %v1211_v21  ;;  %v1468_v24 = vadd.f32 %v2586_v63, %v1467_v22  ;;  %v1213_v25 = vpop.f32.mrb[49].mxu0  ;;  %v1469_v26 = vpop.f32.mrb[49].mxu1 }
 0x17b   : > { %v1214_v27 = vpop.f32.mrb[50].mxu0  ;;  %v1470_v28 = vpop.f32.mrb[50].mxu1 }
 0x17c   : > { %v1650_v29 = vmax.f32 %v1212_v23, 0.0  ;;  %v1714_v30 = vmax.f32 %v1468_v24, 0.0  ;;  %v1215_v31 = vadd.f32 %v2586_v63, %v1214_v27  ;;  %v1471_v32 = vadd.f32 %v2586_v63, %v1470_v28  ;;  %v1216_v33 = vpop.f32.mrb[51].mxu0  ;;  %v1472_v34 = vpop.f32.mrb[51].mxu1 }
 0x17e   : > { %1778 = vst [vmem:[%s2597_s5 + $0xc0] sm:$0xff] %v1650_v29  ;;  %1842 = vst [vmem:[%s2597_s5 + $0x2c0] sm:$0xff] %v1714_v30  ;;  %v1651_v35 = vmax.f32 %v1215_v31, 0.0  ;;  %v1715_v36 = vmax.f32 %v1471_v32, 0.0 }
 0x180   : > { %1779 = vst [vmem:[%s2597_s5 + $0xc8] sm:$0xff] %v1651_v35  ;;  %1843 = vst [vmem:[%s2597_s5 + $0x2c8] sm:$0xff] %v1715_v36 }
 0x181   : > { %v1219_v37 = vpop.f32.mrb[52].mxu0  ;;  %v1475_v38 = vpop.f32.mrb[52].mxu1 }
 0x182   : > { %v1220_v39 = vadd.f32 %v2586_v63, %v1219_v37  ;;  %v1476_v40 = vadd.f32 %v2586_v63, %v1475_v38  ;;  %v1221_v41 = vpop.f32.mrb[53].mxu0  ;;  %v1477_v42 = vpop.f32.mrb[53].mxu1 }
 0x183   : > { %v1222_v43 = vpop.f32.mrb[54].mxu0  ;;  %v1478_v44 = vpop.f32.mrb[54].mxu1 }
 0x184   : > { %v1652_v45 = vmax.f32 %v1220_v39, 0.0  ;;  %v1716_v46 = vmax.f32 %v1476_v40, 0.0  ;;  %v1223_v47 = vadd.f32 %v2586_v63, %v1222_v43  ;;  %v1479_v48 = vadd.f32 %v2586_v63, %v1478_v44  ;;  %v1224_v49 = vpop.f32.mrb[55].mxu0  ;;  %v1480_v50 = vpop.f32.mrb[55].mxu1 }
 0x186   : > { %1780 = vst [vmem:[%s2597_s5 + $0xd0] sm:$0xff] %v1652_v45  ;;  %1844 = vst [vmem:[%s2597_s5 + $0x2d0] sm:$0xff] %v1716_v46  ;;  %v1653_v51 = vmax.f32 %v1223_v47, 0.0  ;;  %v1717_v52 = vmax.f32 %v1479_v48, 0.0 }
 0x188   : > { %1781 = vst [vmem:[%s2597_s5 + $0xd8] sm:$0xff] %v1653_v51  ;;  %1845 = vst [vmem:[%s2597_s5 + $0x2d8] sm:$0xff] %v1717_v52 }
 0x189   : > { %v1227_v53 = vpop.f32.mrb[56].mxu0  ;;  %v1483_v54 = vpop.f32.mrb[56].mxu1 }
 0x18a   : > { %v1228_v55 = vadd.f32 %v2586_v63, %v1227_v53  ;;  %v1484_v56 = vadd.f32 %v2586_v63, %v1483_v54  ;;  %v1229_v57 = vpop.f32.mrb[57].mxu0  ;;  %v1485_v58 = vpop.f32.mrb[57].mxu1 }
 0x18b   : > { %v1230_v59 = vpop.f32.mrb[58].mxu0  ;;  %v1486_v60 = vpop.f32.mrb[58].mxu1 }
 0x18c   : > { %v1654_v61 = vmax.f32 %v1228_v55, 0.0  ;;  %v1718_v62 = vmax.f32 %v1484_v56, 0.0  ;;  %v1231_v0 = vadd.f32 %v2586_v63, %v1230_v59  ;;  %v1487_v1 = vadd.f32 %v2586_v63, %v1486_v60  ;;  %v1232_v2 = vpop.f32.mrb[59].mxu0  ;;  %v1488_v3 = vpop.f32.mrb[59].mxu1 }
 0x18e   : > { %1782 = vst [vmem:[%s2597_s5 + $0xe0] sm:$0xff] %v1654_v61  ;;  %1846 = vst [vmem:[%s2597_s5 + $0x2e0] sm:$0xff] %v1718_v62  ;;  %v1655_v4 = vmax.f32 %v1231_v0, 0.0  ;;  %v1719_v5 = vmax.f32 %v1487_v1, 0.0 }
 0x190   : > { %1783 = vst [vmem:[%s2597_s5 + $0xe8] sm:$0xff] %v1655_v4  ;;  %1847 = vst [vmem:[%s2597_s5 + $0x2e8] sm:$0xff] %v1719_v5 }
 0x191   : > { %v1235_v6 = vpop.f32.mrb[60].mxu0  ;;  %v1491_v7 = vpop.f32.mrb[60].mxu1 }
 0x192   : > { %v1236_v8 = vadd.f32 %v2586_v63, %v1235_v6  ;;  %v1492_v9 = vadd.f32 %v2586_v63, %v1491_v7  ;;  %v1237_v10 = vpop.f32.mrb[61].mxu0  ;;  %v1493_v11 = vpop.f32.mrb[61].mxu1 }
 0x193   : > { %v1238_v12 = vpop.f32.mrb[62].mxu0  ;;  %v1494_v13 = vpop.f32.mrb[62].mxu1 }
 0x194   : > { %v1656_v14 = vmax.f32 %v1236_v8, 0.0  ;;  %v1720_v15 = vmax.f32 %v1492_v9, 0.0  ;;  %v1239_v16 = vadd.f32 %v2586_v63, %v1238_v12  ;;  %v1495_v17 = vadd.f32 %v2586_v63, %v1494_v13  ;;  %v1240_v18 = vpop.f32.mrb[63].mxu0  ;;  %v1496_v19 = vpop.f32.mrb[63].mxu1 }
 0x196   : > { %1784 = vst [vmem:[%s2597_s5 + $0xf0] sm:$0xff] %v1656_v14  ;;  %1848 = vst [vmem:[%s2597_s5 + $0x2f0] sm:$0xff] %v1720_v15  ;;  %v1657_v20 = vmax.f32 %v1239_v16, 0.0  ;;  %v1721_v21 = vmax.f32 %v1495_v17, 0.0 }
 0x198   : > { %1785 = vst [vmem:[%s2597_s5 + $0xf8] sm:$0xff] %v1657_v20  ;;  %1849 = vst [vmem:[%s2597_s5 + $0x2f8] sm:$0xff] %v1721_v21 }
 0x199   : > { %v1243_v22 = vpop.f32.mrb[64].mxu0  ;;  %v1499_v23 = vpop.f32.mrb[64].mxu1 }
 0x19a   : > { %v1244_v24 = vadd.f32 %v2586_v63, %v1243_v22  ;;  %v1500_v25 = vadd.f32 %v2586_v63, %v1499_v23  ;;  %v1245_v26 = vpop.f32.mrb[65].mxu0  ;;  %v1501_v27 = vpop.f32.mrb[65].mxu1 }
 0x19b   : > { %v1246_v28 = vpop.f32.mrb[66].mxu0  ;;  %v1502_v29 = vpop.f32.mrb[66].mxu1 }
 0x19c   : > { %v1658_v30 = vmax.f32 %v1244_v24, 0.0  ;;  %v1722_v31 = vmax.f32 %v1500_v25, 0.0  ;;  %v1247_v32 = vadd.f32 %v2586_v63, %v1246_v28  ;;  %v1503_v33 = vadd.f32 %v2586_v63, %v1502_v29  ;;  %v1248_v34 = vpop.f32.mrb[67].mxu0  ;;  %v1504_v35 = vpop.f32.mrb[67].mxu1 }
 0x19e   : > { %1786 = vst [vmem:[%s2597_s5 + $0x100] sm:$0xff] %v1658_v30  ;;  %1850 = vst [vmem:[%s2597_s5 + $0x300] sm:$0xff] %v1722_v31  ;;  %v1659_v36 = vmax.f32 %v1247_v32, 0.0  ;;  %v1723_v37 = vmax.f32 %v1503_v33, 0.0 }
 0x1a0   : > { %1787 = vst [vmem:[%s2597_s5 + $0x108] sm:$0xff] %v1659_v36  ;;  %1851 = vst [vmem:[%s2597_s5 + $0x308] sm:$0xff] %v1723_v37 }
 0x1a1   : > { %v1251_v38 = vpop.f32.mrb[68].mxu0  ;;  %v1507_v39 = vpop.f32.mrb[68].mxu1 }
 0x1a2   : > { %v1252_v40 = vadd.f32 %v2586_v63, %v1251_v38  ;;  %v1508_v41 = vadd.f32 %v2586_v63, %v1507_v39  ;;  %v1253_v42 = vpop.f32.mrb[69].mxu0  ;;  %v1509_v43 = vpop.f32.mrb[69].mxu1 }
 0x1a3   : > { %v1254_v44 = vpop.f32.mrb[70].mxu0  ;;  %v1510_v45 = vpop.f32.mrb[70].mxu1 }
 0x1a4   : > { %v1660_v46 = vmax.f32 %v1252_v40, 0.0  ;;  %v1724_v47 = vmax.f32 %v1508_v41, 0.0  ;;  %v1255_v48 = vadd.f32 %v2586_v63, %v1254_v44  ;;  %v1511_v49 = vadd.f32 %v2586_v63, %v1510_v45  ;;  %v1256_v50 = vpop.f32.mrb[71].mxu0  ;;  %v1512_v51 = vpop.f32.mrb[71].mxu1 }
 0x1a6   : > { %1788 = vst [vmem:[%s2597_s5 + $0x110] sm:$0xff] %v1660_v46  ;;  %1852 = vst [vmem:[%s2597_s5 + $0x310] sm:$0xff] %v1724_v47  ;;  %v1661_v52 = vmax.f32 %v1255_v48, 0.0  ;;  %v1725_v53 = vmax.f32 %v1511_v49, 0.0 }
 0x1a8   : > { %1789 = vst [vmem:[%s2597_s5 + $0x118] sm:$0xff] %v1661_v52  ;;  %1853 = vst [vmem:[%s2597_s5 + $0x318] sm:$0xff] %v1725_v53 }
 0x1a9   : > { %v1259_v54 = vpop.f32.mrb[72].mxu0  ;;  %v1515_v55 = vpop.f32.mrb[72].mxu1 }
 0x1aa   : > { %v1260_v56 = vadd.f32 %v2586_v63, %v1259_v54  ;;  %v1516_v57 = vadd.f32 %v2586_v63, %v1515_v55  ;;  %v1261_v58 = vpop.f32.mrb[73].mxu0  ;;  %v1517_v59 = vpop.f32.mrb[73].mxu1 }
 0x1ab   : > { %v1262_v60 = vpop.f32.mrb[74].mxu0  ;;  %v1518_v61 = vpop.f32.mrb[74].mxu1 }
 0x1ac   : > { %v1662_v62 = vmax.f32 %v1260_v56, 0.0  ;;  %v1726_v0 = vmax.f32 %v1516_v57, 0.0  ;;  %v1263_v1 = vadd.f32 %v2586_v63, %v1262_v60  ;;  %v1519_v2 = vadd.f32 %v2586_v63, %v1518_v61  ;;  %v1264_v3 = vpop.f32.mrb[75].mxu0  ;;  %v1520_v4 = vpop.f32.mrb[75].mxu1 }
 0x1ae   : > { %1790 = vst [vmem:[%s2597_s5 + $0x120] sm:$0xff] %v1662_v62  ;;  %1854 = vst [vmem:[%s2597_s5 + $0x320] sm:$0xff] %v1726_v0  ;;  %v1663_v5 = vmax.f32 %v1263_v1, 0.0  ;;  %v1727_v6 = vmax.f32 %v1519_v2, 0.0 }
 0x1b0   : > { %1791 = vst [vmem:[%s2597_s5 + $0x128] sm:$0xff] %v1663_v5  ;;  %1855 = vst [vmem:[%s2597_s5 + $0x328] sm:$0xff] %v1727_v6 }
 0x1b1   : > { %v1267_v7 = vpop.f32.mrb[76].mxu0  ;;  %v1523_v8 = vpop.f32.mrb[76].mxu1 }
 0x1b2   : > { %v1268_v9 = vadd.f32 %v2586_v63, %v1267_v7  ;;  %v1524_v10 = vadd.f32 %v2586_v63, %v1523_v8  ;;  %v1269_v11 = vpop.f32.mrb[77].mxu0  ;;  %v1525_v12 = vpop.f32.mrb[77].mxu1 }
 0x1b3   : > { %v1270_v13 = vpop.f32.mrb[78].mxu0  ;;  %v1526_v14 = vpop.f32.mrb[78].mxu1 }
 0x1b4   : > { %v1664_v15 = vmax.f32 %v1268_v9, 0.0  ;;  %v1728_v16 = vmax.f32 %v1524_v10, 0.0  ;;  %v1271_v17 = vadd.f32 %v2586_v63, %v1270_v13  ;;  %v1527_v18 = vadd.f32 %v2586_v63, %v1526_v14  ;;  %v1272_v19 = vpop.f32.mrb[79].mxu0  ;;  %v1528_v20 = vpop.f32.mrb[79].mxu1 }
 0x1b6   : > { %1792 = vst [vmem:[%s2597_s5 + $0x130] sm:$0xff] %v1664_v15  ;;  %1856 = vst [vmem:[%s2597_s5 + $0x330] sm:$0xff] %v1728_v16  ;;  %v1665_v21 = vmax.f32 %v1271_v17, 0.0  ;;  %v1729_v22 = vmax.f32 %v1527_v18, 0.0 }
 0x1b8   : > { %1793 = vst [vmem:[%s2597_s5 + $0x138] sm:$0xff] %v1665_v21  ;;  %1857 = vst [vmem:[%s2597_s5 + $0x338] sm:$0xff] %v1729_v22 }
 0x1b9   : > { %v1275_v23 = vpop.f32.mrb[80].mxu0  ;;  %v1531_v24 = vpop.f32.mrb[80].mxu1 }
 0x1ba   : > { %v1276_v25 = vadd.f32 %v2586_v63, %v1275_v23  ;;  %v1532_v26 = vadd.f32 %v2586_v63, %v1531_v24  ;;  %v1277_v27 = vpop.f32.mrb[81].mxu0  ;;  %v1533_v28 = vpop.f32.mrb[81].mxu1 }
 0x1bb   : > { %v1278_v29 = vpop.f32.mrb[82].mxu0  ;;  %v1534_v30 = vpop.f32.mrb[82].mxu1 }
 0x1bc   : > { %v1666_v31 = vmax.f32 %v1276_v25, 0.0  ;;  %v1730_v32 = vmax.f32 %v1532_v26, 0.0  ;;  %v1279_v33 = vadd.f32 %v2586_v63, %v1278_v29  ;;  %v1535_v34 = vadd.f32 %v2586_v63, %v1534_v30  ;;  %v1280_v35 = vpop.f32.mrb[83].mxu0  ;;  %v1536_v36 = vpop.f32.mrb[83].mxu1  ;;  %v2808_v26 = vld [vmem:[%s2879_s2] ss:$0 sm:$0xff] }
 0x1be   : > { %1794 = vst [vmem:[%s2597_s5 + $0x140] sm:$0xff] %v1666_v31  ;;  %1858 = vst [vmem:[%s2597_s5 + $0x340] sm:$0xff] %v1730_v32  ;;  %v1667_v37 = vmax.f32 %v1279_v33, 0.0  ;;  %v1731_v38 = vmax.f32 %v1535_v34, 0.0 }
 0x1c0   : > { %1795 = vst [vmem:[%s2597_s5 + $0x148] sm:$0xff] %v1667_v37  ;;  %1859 = vst [vmem:[%s2597_s5 + $0x348] sm:$0xff] %v1731_v38 }
 0x1c1   : > { %v1283_v39 = vpop.f32.mrb[84].mxu0  ;;  %v1539_v40 = vpop.f32.mrb[84].mxu1 }
 0x1c2   : > { %v1284_v41 = vadd.f32 %v2586_v63, %v1283_v39  ;;  %v1540_v42 = vadd.f32 %v2586_v63, %v1539_v40  ;;  %v1285_v43 = vpop.f32.mrb[85].mxu0  ;;  %v1541_v44 = vpop.f32.mrb[85].mxu1 }
 0x1c3   : > { %v1286_v45 = vpop.f32.mrb[86].mxu0  ;;  %v1542_v46 = vpop.f32.mrb[86].mxu1 }
 0x1c4   : > { %v1668_v47 = vmax.f32 %v1284_v41, 0.0  ;;  %v1732_v48 = vmax.f32 %v1540_v42, 0.0  ;;  %v1287_v49 = vadd.f32 %v2586_v63, %v1286_v45  ;;  %v1543_v50 = vadd.f32 %v2586_v63, %v1542_v46  ;;  %v1288_v51 = vpop.f32.mrb[87].mxu0  ;;  %v1544_v52 = vpop.f32.mrb[87].mxu1 }
 0x1c6   : > { %1796 = vst [vmem:[%s2597_s5 + $0x150] sm:$0xff] %v1668_v47  ;;  %1860 = vst [vmem:[%s2597_s5 + $0x350] sm:$0xff] %v1732_v48  ;;  %v1669_v53 = vmax.f32 %v1287_v49, 0.0  ;;  %v1733_v54 = vmax.f32 %v1543_v50, 0.0 }
 0x1c8   : > { %1797 = vst [vmem:[%s2597_s5 + $0x158] sm:$0xff] %v1669_v53  ;;  %1861 = vst [vmem:[%s2597_s5 + $0x358] sm:$0xff] %v1733_v54 }
 0x1c9   : > { %v1291_v55 = vpop.f32.mrb[88].mxu0  ;;  %v1547_v56 = vpop.f32.mrb[88].mxu1 }
 0x1ca   : > { %v1292_v57 = vadd.f32 %v2586_v63, %v1291_v55  ;;  %v1548_v58 = vadd.f32 %v2586_v63, %v1547_v56  ;;  %v1293_v59 = vpop.f32.mrb[89].mxu0  ;;  %v1549_v60 = vpop.f32.mrb[89].mxu1 }
 0x1cb   : > { %v1294_v61 = vpop.f32.mrb[90].mxu0  ;;  %v1550_v62 = vpop.f32.mrb[90].mxu1 }
 0x1cc   : > { %v1670_v0 = vmax.f32 %v1292_v57, 0.0  ;;  %v1734_v1 = vmax.f32 %v1548_v58, 0.0  ;;  %v1295_v2 = vadd.f32 %v2586_v63, %v1294_v61  ;;  %v1551_v3 = vadd.f32 %v2586_v63, %v1550_v62  ;;  %v1296_v4 = vpop.f32.mrb[91].mxu0  ;;  %v1552_v5 = vpop.f32.mrb[91].mxu1 }
 0x1ce   : > { %1798 = vst [vmem:[%s2597_s5 + $0x160] sm:$0xff] %v1670_v0  ;;  %1862 = vst [vmem:[%s2597_s5 + $0x360] sm:$0xff] %v1734_v1  ;;  %v1671_v6 = vmax.f32 %v1295_v2, 0.0  ;;  %v1735_v7 = vmax.f32 %v1551_v3, 0.0 }
 0x1d0   : > { %1799 = vst [vmem:[%s2597_s5 + $0x168] sm:$0xff] %v1671_v6  ;;  %1863 = vst [vmem:[%s2597_s5 + $0x368] sm:$0xff] %v1735_v7 }
 0x1d1   : > { %v1299_v8 = vpop.f32.mrb[92].mxu0  ;;  %v1555_v9 = vpop.f32.mrb[92].mxu1 }
 0x1d2   : > { %v1300_v10 = vadd.f32 %v2586_v63, %v1299_v8  ;;  %v1556_v11 = vadd.f32 %v2586_v63, %v1555_v9  ;;  %v1301_v12 = vpop.f32.mrb[93].mxu0  ;;  %v1557_v13 = vpop.f32.mrb[93].mxu1 }
 0x1d3   : > { %v1302_v14 = vpop.f32.mrb[94].mxu0  ;;  %v1558_v15 = vpop.f32.mrb[94].mxu1 }
 0x1d4   : > { %v1672_v16 = vmax.f32 %v1300_v10, 0.0  ;;  %v1736_v17 = vmax.f32 %v1556_v11, 0.0  ;;  %v1303_v18 = vadd.f32 %v2586_v63, %v1302_v14  ;;  %v1559_v19 = vadd.f32 %v2586_v63, %v1558_v15  ;;  %v1304_v20 = vpop.f32.mrb[95].mxu0  ;;  %v1560_v21 = vpop.f32.mrb[95].mxu1 }
 0x1d6   : > { %1800 = vst [vmem:[%s2597_s5 + $0x170] sm:$0xff] %v1672_v16  ;;  %1864 = vst [vmem:[%s2597_s5 + $0x370] sm:$0xff] %v1736_v17  ;;  %v1673_v22 = vmax.f32 %v1303_v18, 0.0  ;;  %v1737_v23 = vmax.f32 %v1559_v19, 0.0 }
 0x1d8   : > { %1801 = vst [vmem:[%s2597_s5 + $0x178] sm:$0xff] %v1673_v22  ;;  %1865 = vst [vmem:[%s2597_s5 + $0x378] sm:$0xff] %v1737_v23 }
 0x1d9   : > { %v1307_v24 = vpop.f32.mrb[96].mxu0  ;;  %v1563_v25 = vpop.f32.mrb[96].mxu1 }
 0x1da   : > { %v1308_v27 = vadd.f32 %v2808_v26, %v1307_v24  ;;  %v1564_v63 = vadd.f32 %v2808_v26, %v1563_v25  ;;  %v1309_v28 = vpop.f32.mrb[97].mxu0  ;;  %v1565_v29 = vpop.f32.mrb[97].mxu1 }
 0x1db   : > { %v1310_v30 = vpop.f32.mrb[98].mxu0  ;;  %v1566_v31 = vpop.f32.mrb[98].mxu1 }
 0x1dc   : > { %v1674_v32 = vmax.f32 %v1308_v27, 0.0  ;;  %v1738_v33 = vmax.f32 %v1564_v63, 0.0  ;;  %v1311_v34 = vadd.f32 %v2808_v26, %v1310_v30  ;;  %v1567_v35 = vadd.f32 %v2808_v26, %v1566_v31  ;;  %v1312_v36 = vpop.f32.mrb[99].mxu0  ;;  %v1568_v37 = vpop.f32.mrb[99].mxu1 }
 0x1de   : > { %1802 = vst [vmem:[%s2597_s5 + $0x180] sm:$0xff] %v1674_v32  ;;  %1866 = vst [vmem:[%s2597_s5 + $0x380] sm:$0xff] %v1738_v33  ;;  %v1675_v38 = vmax.f32 %v1311_v34, 0.0  ;;  %v1739_v39 = vmax.f32 %v1567_v35, 0.0 }
 0x1e0   : > { %1803 = vst [vmem:[%s2597_s5 + $0x188] sm:$0xff] %v1675_v38  ;;  %1867 = vst [vmem:[%s2597_s5 + $0x388] sm:$0xff] %v1739_v39 }
 0x1e1   : > { %v1315_v40 = vpop.f32.mrb[100].mxu0  ;;  %v1571_v41 = vpop.f32.mrb[100].mxu1 }
 0x1e2   : > { %v1316_v42 = vadd.f32 %v2808_v26, %v1315_v40  ;;  %v1572_v43 = vadd.f32 %v2808_v26, %v1571_v41  ;;  %v1317_v44 = vpop.f32.mrb[101].mxu0  ;;  %v1573_v45 = vpop.f32.mrb[101].mxu1 }
 0x1e3   : > { %v1318_v46 = vpop.f32.mrb[102].mxu0  ;;  %v1574_v47 = vpop.f32.mrb[102].mxu1 }
 0x1e4   : > { %v1676_v48 = vmax.f32 %v1316_v42, 0.0  ;;  %v1740_v49 = vmax.f32 %v1572_v43, 0.0  ;;  %v1319_v50 = vadd.f32 %v2808_v26, %v1318_v46  ;;  %v1575_v51 = vadd.f32 %v2808_v26, %v1574_v47  ;;  %v1320_v52 = vpop.f32.mrb[103].mxu0  ;;  %v1576_v53 = vpop.f32.mrb[103].mxu1 }
 0x1e6   : > { %1804 = vst [vmem:[%s2597_s5 + $0x190] sm:$0xff] %v1676_v48  ;;  %1868 = vst [vmem:[%s2597_s5 + $0x390] sm:$0xff] %v1740_v49  ;;  %v1677_v54 = vmax.f32 %v1319_v50, 0.0  ;;  %v1741_v55 = vmax.f32 %v1575_v51, 0.0 }
 0x1e8   : > { %1805 = vst [vmem:[%s2597_s5 + $0x198] sm:$0xff] %v1677_v54  ;;  %1869 = vst [vmem:[%s2597_s5 + $0x398] sm:$0xff] %v1741_v55 }
 0x1e9   : > { %v1323_v56 = vpop.f32.mrb[104].mxu0  ;;  %v1579_v57 = vpop.f32.mrb[104].mxu1 }
 0x1ea   : > { %v1324_v58 = vadd.f32 %v2808_v26, %v1323_v56  ;;  %v1580_v59 = vadd.f32 %v2808_v26, %v1579_v57  ;;  %v1325_v60 = vpop.f32.mrb[105].mxu0  ;;  %v1581_v61 = vpop.f32.mrb[105].mxu1 }
 0x1eb   : > { %v1326_v62 = vpop.f32.mrb[106].mxu0  ;;  %v1582_v0 = vpop.f32.mrb[106].mxu1 }
 0x1ec   : > { %v1678_v1 = vmax.f32 %v1324_v58, 0.0  ;;  %v1742_v2 = vmax.f32 %v1580_v59, 0.0  ;;  %v1327_v3 = vadd.f32 %v2808_v26, %v1326_v62  ;;  %v1583_v4 = vadd.f32 %v2808_v26, %v1582_v0  ;;  %v1328_v5 = vpop.f32.mrb[107].mxu0  ;;  %v1584_v6 = vpop.f32.mrb[107].mxu1 }
 0x1ee   : > { %1806 = vst [vmem:[%s2597_s5 + $0x1a0] sm:$0xff] %v1678_v1  ;;  %1870 = vst [vmem:[%s2597_s5 + $0x3a0] sm:$0xff] %v1742_v2  ;;  %v1679_v7 = vmax.f32 %v1327_v3, 0.0  ;;  %v1743_v8 = vmax.f32 %v1583_v4, 0.0 }
 0x1f0   : > { %1807 = vst [vmem:[%s2597_s5 + $0x1a8] sm:$0xff] %v1679_v7  ;;  %1871 = vst [vmem:[%s2597_s5 + $0x3a8] sm:$0xff] %v1743_v8 }
 0x1f1   : > { %v1331_v9 = vpop.f32.mrb[108].mxu0  ;;  %v1587_v10 = vpop.f32.mrb[108].mxu1 }
 0x1f2   : > { %v1332_v11 = vadd.f32 %v2808_v26, %v1331_v9  ;;  %v1588_v12 = vadd.f32 %v2808_v26, %v1587_v10  ;;  %v1333_v13 = vpop.f32.mrb[109].mxu0  ;;  %v1589_v14 = vpop.f32.mrb[109].mxu1 }
 0x1f3   : > { %v1334_v15 = vpop.f32.mrb[110].mxu0  ;;  %v1590_v16 = vpop.f32.mrb[110].mxu1 }
 0x1f4   : > { %v1680_v17 = vmax.f32 %v1332_v11, 0.0  ;;  %v1744_v18 = vmax.f32 %v1588_v12, 0.0  ;;  %v1335_v19 = vadd.f32 %v2808_v26, %v1334_v15  ;;  %v1591_v20 = vadd.f32 %v2808_v26, %v1590_v16  ;;  %v1336_v21 = vpop.f32.mrb[111].mxu0  ;;  %v1592_v22 = vpop.f32.mrb[111].mxu1 }
 0x1f6   : > { %1808 = vst [vmem:[%s2597_s5 + $0x1b0] sm:$0xff] %v1680_v17  ;;  %1872 = vst [vmem:[%s2597_s5 + $0x3b0] sm:$0xff] %v1744_v18  ;;  %v1681_v23 = vmax.f32 %v1335_v19, 0.0  ;;  %v1745_v24 = vmax.f32 %v1591_v20, 0.0 }
 0x1f8   : > { %1809 = vst [vmem:[%s2597_s5 + $0x1b8] sm:$0xff] %v1681_v23  ;;  %1873 = vst [vmem:[%s2597_s5 + $0x3b8] sm:$0xff] %v1745_v24 }
 0x1f9   : > { %v1339_v25 = vpop.f32.mrb[112].mxu0  ;;  %v1595_v27 = vpop.f32.mrb[112].mxu1 }
 0x1fa   : > { %v1340_v63 = vadd.f32 %v2808_v26, %v1339_v25  ;;  %v1596_v28 = vadd.f32 %v2808_v26, %v1595_v27  ;;  %v1341_v29 = vpop.f32.mrb[113].mxu0  ;;  %v1597_v30 = vpop.f32.mrb[113].mxu1 }
 0x1fb   : > { %v1342_v31 = vpop.f32.mrb[114].mxu0  ;;  %v1598_v32 = vpop.f32.mrb[114].mxu1 }
 0x1fc   : > { %v1682_v33 = vmax.f32 %v1340_v63, 0.0  ;;  %v1746_v34 = vmax.f32 %v1596_v28, 0.0  ;;  %v1343_v35 = vadd.f32 %v2808_v26, %v1342_v31  ;;  %v1599_v36 = vadd.f32 %v2808_v26, %v1598_v32  ;;  %v1344_v37 = vpop.f32.mrb[115].mxu0  ;;  %v1600_v38 = vpop.f32.mrb[115].mxu1 }
 0x1fe   : > { %1810 = vst [vmem:[%s2597_s5 + $0x1c0] sm:$0xff] %v1682_v33  ;;  %1874 = vst [vmem:[%s2597_s5 + $0x3c0] sm:$0xff] %v1746_v34  ;;  %v1683_v39 = vmax.f32 %v1343_v35, 0.0  ;;  %v1747_v40 = vmax.f32 %v1599_v36, 0.0 }
 0x200   : > { %1811 = vst [vmem:[%s2597_s5 + $0x1c8] sm:$0xff] %v1683_v39  ;;  %1875 = vst [vmem:[%s2597_s5 + $0x3c8] sm:$0xff] %v1747_v40 }
 0x201   : > { %v1347_v41 = vpop.f32.mrb[116].mxu0  ;;  %v1603_v42 = vpop.f32.mrb[116].mxu1 }
 0x202   : > { %v1348_v43 = vadd.f32 %v2808_v26, %v1347_v41  ;;  %v1604_v44 = vadd.f32 %v2808_v26, %v1603_v42  ;;  %v1349_v45 = vpop.f32.mrb[117].mxu0  ;;  %v1605_v46 = vpop.f32.mrb[117].mxu1 }
 0x203   : > { %v1350_v47 = vpop.f32.mrb[118].mxu0  ;;  %v1606_v48 = vpop.f32.mrb[118].mxu1 }
 0x204   : > { %v1684_v49 = vmax.f32 %v1348_v43, 0.0  ;;  %v1748_v50 = vmax.f32 %v1604_v44, 0.0  ;;  %v1351_v51 = vadd.f32 %v2808_v26, %v1350_v47  ;;  %v1607_v52 = vadd.f32 %v2808_v26, %v1606_v48  ;;  %v1352_v53 = vpop.f32.mrb[119].mxu0  ;;  %v1608_v54 = vpop.f32.mrb[119].mxu1 }
 0x206   : > { %1812 = vst [vmem:[%s2597_s5 + $0x1d0] sm:$0xff] %v1684_v49  ;;  %1876 = vst [vmem:[%s2597_s5 + $0x3d0] sm:$0xff] %v1748_v50  ;;  %v1685_v55 = vmax.f32 %v1351_v51, 0.0  ;;  %v1749_v56 = vmax.f32 %v1607_v52, 0.0 }
 0x208   : > { %1813 = vst [vmem:[%s2597_s5 + $0x1d8] sm:$0xff] %v1685_v55  ;;  %1877 = vst [vmem:[%s2597_s5 + $0x3d8] sm:$0xff] %v1749_v56 }
 0x209   : > { %v1355_v57 = vpop.f32.mrb[120].mxu0  ;;  %v1611_v58 = vpop.f32.mrb[120].mxu1 }
 0x20a   : > { %v1356_v59 = vadd.f32 %v2808_v26, %v1355_v57  ;;  %v1612_v60 = vadd.f32 %v2808_v26, %v1611_v58  ;;  %v1357_v61 = vpop.f32.mrb[121].mxu0  ;;  %v1613_v62 = vpop.f32.mrb[121].mxu1 }
 0x20b   : > { %v1358_v0 = vpop.f32.mrb[122].mxu0  ;;  %v1614_v1 = vpop.f32.mrb[122].mxu1 }
 0x20c   : > { %v1686_v2 = vmax.f32 %v1356_v59, 0.0  ;;  %v1750_v3 = vmax.f32 %v1612_v60, 0.0  ;;  %v1359_v4 = vadd.f32 %v2808_v26, %v1358_v0  ;;  %v1615_v5 = vadd.f32 %v2808_v26, %v1614_v1  ;;  %v1360_v6 = vpop.f32.mrb[123].mxu0  ;;  %v1616_v7 = vpop.f32.mrb[123].mxu1 }
 0x20e   : > { %1814 = vst [vmem:[%s2597_s5 + $0x1e0] sm:$0xff] %v1686_v2  ;;  %1878 = vst [vmem:[%s2597_s5 + $0x3e0] sm:$0xff] %v1750_v3  ;;  %v1687_v8 = vmax.f32 %v1359_v4, 0.0  ;;  %v1751_v9 = vmax.f32 %v1615_v5, 0.0 }
 0x210   : > { %1815 = vst [vmem:[%s2597_s5 + $0x1e8] sm:$0xff] %v1687_v8  ;;  %1879 = vst [vmem:[%s2597_s5 + $0x3e8] sm:$0xff] %v1751_v9 }
 0x211   : > { %v1363_v10 = vpop.f32.mrb[124].mxu0  ;;  %v1619_v11 = vpop.f32.mrb[124].mxu1 }
 0x212   : > { %v1364_v12 = vadd.f32 %v2808_v26, %v1363_v10  ;;  %v1620_v13 = vadd.f32 %v2808_v26, %v1619_v11  ;;  %v1365_v14 = vpop.f32.mrb[125].mxu0  ;;  %v1621_v15 = vpop.f32.mrb[125].mxu1 }
 0x213   : > { %v1366_v16 = vpop.f32.mrb[126].mxu0  ;;  %v1622_v17 = vpop.f32.mrb[126].mxu1 }
 0x214   : > { %v1688_v18 = vmax.f32 %v1364_v12, 0.0  ;;  %v1752_v19 = vmax.f32 %v1620_v13, 0.0  ;;  %v1367_v20 = vadd.f32 %v2808_v26, %v1366_v16  ;;  %v1623_v21 = vadd.f32 %v2808_v26, %v1622_v17  ;;  %v1368_v22 = vpop.f32.mrb[127].mxu0  ;;  %v1624_v23 = vpop.f32.mrb[127].mxu1 }
 0x216   : > { %1816 = vst [vmem:[%s2597_s5 + $0x1f0] sm:$0xff] %v1688_v18  ;;  %1880 = vst [vmem:[%s2597_s5 + $0x3f0] sm:$0xff] %v1752_v19  ;;  %v1689_v24 = vmax.f32 %v1367_v20, 0.0  ;;  %v1753_v25 = vmax.f32 %v1623_v21, 0.0 }
 0x218   : > { %1817 = vst [vmem:[%s2597_s5 + $0x1f8] sm:$0xff] %v1689_v24  ;;  %1881 = vst [vmem:[%s2597_s5 + $0x3f8] sm:$0xff] %v1753_v25 }
 0x219 PF: > { %s13_s12 = sadd.s32 1, %s2352_s12  }
 0x21a   : > { %p10_p4 = scmp.ge.s32.totalorder %s13_s12, 4  }
 0x21c   :  { %12 = sbr.rel (!%p10_p4) target bundleno = 1 (0x1), region = 62 }

// kernel: conv_autoencoder_forward.5
= control target key start
LH: loop header
LB: loop body
LE: loop exit
PB: predicated region body
PF: predicated region fallthrough
CT: control target
= control target key end

     0   :  { %s1076_s12 = smov 0   ;;  %s1253_s0 = inlined_call_operand.vmem [shape: bf16[512,256], index: 0, kind: input, shape index: {}]   ;;  %s1254_s1 = inlined_call_operand.vmem [shape: bf16[256,128], index: 1, kind: input, shape index: {}]   ;;  %s1255_s2 = inlined_call_operand.vmem [shape: f32[1,128], index: 2, kind: input, shape index: {}]   ;;  %s1256_s3 = inlined_call_operand.vmem [shape: f32[512,128], index: 3, kind: output, shape index: {}]  }
   0x1 LB: > { %s786_s13 = sadd.s32 4294967295, %s1054_s12   ;;  %p790_p0 = scmp.ge.s32.totalorder %s1054_s12, 1  ;;  %s1054_s12 = sphi %s1076_s12, %s13_s12  }
   0x2   : > { %p139_p1 = scmp.lt.s32.totalorder %s1054_s12, 3 }
   0x4   : > { %p140_p2 = pnand %p790_p0, %p139_p1 }
   0x5   : > { %v984_v0 = vld [vmem:[%s1254_s1 + $0x40] sm:$0xff] (!%p140_p2)   ;;  %s791_s16 = sshll.u32 (!%p140_p2), %s786_s13, 5  ;;  %v986_v2 = vld [vmem:[%s1254_s1 + $0x48] sm:$0xff] (!%p140_p2)   ;;  %v988_v4 = vld [vmem:[%s1254_s1 + $0x50] sm:$0xff] (!%p140_p2)  }
   0x6   : > { %143 = sbr.rel (%p140_p2) target bundleno = 316 (0x13c), region = 32  ;;  %v985_v1 = vld [vmem:[%s1254_s1] sm:$0xff] (!%p140_p2)   ;;  %848 = vmatprep.subr.bf16.mxu0 (!%p140_p2), %v984_v0  ;;  %960 = vmatprep.subr.bf16.mxu1 (!%p140_p2), %v984_v0  ;;  %v987_v3 = vld [vmem:[%s1254_s1 + $0x8] sm:$0xff] (!%p140_p2)   ;;  %p165_p3 = scmp.lt.s32.totalorder (!%p140_p2), %s791_s16, 63  ;;  %v989_v5 = vld [vmem:[%s1254_s1 + $0x10] sm:$0xff] (!%p140_p2)  }
   0x7   : > { %849 = vmatpush3.bf16.msra.mxu0 (!%p140_p2), %v985_v1  ;;  %968 = vmatpush3.bf16.msra.mxu1 (!%p140_p2), %v985_v1  ;;  %v990_v6 = vld [vmem:[%s1254_s1 + $0x58] sm:$0xff] (!%p140_p2)   ;;  %v992_v8 = vld [vmem:[%s1254_s1 + $0x60] sm:$0xff] (!%p140_p2)   ;;  %v994_v10 = vld [vmem:[%s1254_s1 + $0x68] sm:$0xff] (!%p140_p2)  }
   0x8   : > { %850 = vmatprep.subr.bf16.mxu0 (!%p140_p2), %v986_v2  ;;  %961 = vmatprep.subr.bf16.mxu1 (!%p140_p2), %v986_v2  ;;  %v991_v7 = vld [vmem:[%s1254_s1 + $0x18] sm:$0xff] (!%p140_p2)   ;;  %v993_v9 = vld [vmem:[%s1254_s1 + $0x20] sm:$0xff] (!%p140_p2)   ;;  %v995_v13 = vld [vmem:[%s1254_s1 + $0x28] sm:$0xff] (!%p140_p2)  }
   0x9   : > { %v996_v14 = vld [vmem:[%s1254_s1 + $0x70] sm:$0xff] (!%p140_p2)   ;;  %v998_v16 = vld [vmem:[%s1254_s1 + $0x78] sm:$0xff] (!%p140_p2)   ;;  %v1177_v50 = vld [vmem:[%s1255_s2] ss:$0 sm:$0xff] (!%p140_p2) }
   0xa   : > { %v997_v15 = vld [vmem:[%s1254_s1 + $0x30] sm:$0xff] (!%p140_p2)   ;;  %v999_v17 = vld [vmem:[%s1254_s1 + $0x38] sm:$0xff] (!%p140_p2)  }
   0xb   : > { %851 = vmatpush3.bf16.msra.mxu0 (!%p140_p2), %v987_v3  ;;  %969 = vmatpush3.bf16.msra.mxu1 (!%p140_p2), %v987_v3 }
   0xc   : > { %852 = vmatprep.subr.bf16.mxu0 (!%p140_p2), %v988_v4  ;;  %962 = vmatprep.subr.bf16.mxu1 (!%p140_p2), %v988_v4 }
   0xd   : > { %s1258_s16 = smov (!%p165_p3, %s791_s16), 63 }
   0xe   : > { %s847_s4 = sshll.u32 %s1258_s16, 3 }
   0xf   : > { %853 = vmatpush3.bf16.msra.mxu0 %v989_v5  ;;  %970 = vmatpush3.bf16.msra.mxu1 %v989_v5  ;;  %s1119_s9 = scalar_lea.vmem %s1253_s0, %s847_s4  ;;  %s1186_s30 = scalar_lea.vmem %s1256_s3, %s847_s4 }
  0x10   : > { %854 = vmatprep.subr.bf16.mxu0 %v990_v6  ;;  %963 = vmatprep.subr.bf16.mxu1 %v990_v6  ;;  %v1002_v11 = vld [vmem:[%s1119_s9 + $0x4] ss:$8 sps:$4 sm:$0xff]   ;;  %v1000_v18 = vld [vmem:[%s1119_s9] ss:$8 sps:$4 sm:$0xff]   ;;  %v1006_v20 = vld [vmem:[%s1119_s9 + $0x14] ss:$8 sps:$4 sm:$0xff]  }
  0x11   : > { %v1005_v12 = vld [vmem:[%s1119_s9 + $0x84] ss:$8 sps:$4 sm:$0xff]   ;;  %537 = vmatprep.mubr.bf16.mxu0 %v1002_v11  ;;  %v1003_v19 = vld [vmem:[%s1119_s9 + $0x80] ss:$8 sps:$4 sm:$0xff]   ;;  %v1008_v21 = vld [vmem:[%s1119_s9 + $0x94] ss:$8 sps:$4 sm:$0xff]  }
  0x12   : > { %601 = vmatprep.mubr.bf16.mxu1 %v1005_v12  ;;  %v1010_v22 = vld [vmem:[%s1119_s9 + $0x10] ss:$8 sps:$4 sm:$0xff]   ;;  %v1012_v24 = vld [vmem:[%s1119_s9 + $0x24] ss:$8 sps:$4 sm:$0xff]   ;;  %v1016_v26 = vld [vmem:[%s1119_s9 + $0x20] ss:$8 sps:$4 sm:$0xff]  }
  0x13   : > { %855 = vmatpush3.bf16.msra.mxu0 %v991_v7  ;;  %971 = vmatpush3.bf16.msra.mxu1 %v991_v7  ;;  %v1011_v23 = vld [vmem:[%s1119_s9 + $0x90] ss:$8 sps:$4 sm:$0xff]   ;;  %v1014_v25 = vld [vmem:[%s1119_s9 + $0xa4] ss:$8 sps:$4 sm:$0xff]   ;;  %v1017_v27 = vld [vmem:[%s1119_s9 + $0xa0] ss:$8 sps:$4 sm:$0xff]  }
  0x14   : > { %856 = vmatprep.subr.bf16.mxu0 %v992_v8  ;;  %964 = vmatprep.subr.bf16.mxu1 %v992_v8  ;;  %v1018_v28 = vld [vmem:[%s1119_s9 + $0x34] ss:$8 sps:$4 sm:$0xff]   ;;  %v1022_v30 = vld [vmem:[%s1119_s9 + $0x30] ss:$8 sps:$4 sm:$0xff]   ;;  %v1024_v32 = vld [vmem:[%s1119_s9 + $0x44] ss:$8 sps:$4 sm:$0xff]  }
  0x15   : > { %v1020_v29 = vld [vmem:[%s1119_s9 + $0xb4] ss:$8 sps:$4 sm:$0xff]   ;;  %v1023_v31 = vld [vmem:[%s1119_s9 + $0xb0] ss:$8 sps:$4 sm:$0xff]   ;;  %v1026_v33 = vld [vmem:[%s1119_s9 + $0xc4] ss:$8 sps:$4 sm:$0xff]  }
  0x16   : > { %v1028_v34 = vld [vmem:[%s1119_s9 + $0x40] ss:$8 sps:$4 sm:$0xff]   ;;  %v1030_v36 = vld [vmem:[%s1119_s9 + $0x54] ss:$8 sps:$4 sm:$0xff]   ;;  %v1034_v38 = vld [vmem:[%s1119_s9 + $0x50] ss:$8 sps:$4 sm:$0xff]  }
  0x17   : > { %857 = vmatpush3.bf16.msra.mxu0 %v993_v9  ;;  %972 = vmatpush3.bf16.msra.mxu1 %v993_v9  ;;  %v1029_v35 = vld [vmem:[%s1119_s9 + $0xc0] ss:$8 sps:$4 sm:$0xff]   ;;  %v1032_v37 = vld [vmem:[%s1119_s9 + $0xd4] ss:$8 sps:$4 sm:$0xff]   ;;  %v1035_v39 = vld [vmem:[%s1119_s9 + $0xd0] ss:$8 sps:$4 sm:$0xff]  }
  0x18   : > { %858 = vmatprep.subr.bf16.mxu0 %v994_v10  ;;  %965 = vmatprep.subr.bf16.mxu1 %v994_v10  ;;  %v1036_v40 = vld [vmem:[%s1119_s9 + $0x64] ss:$8 sps:$4 sm:$0xff]   ;;  %v1040_v42 = vld [vmem:[%s1119_s9 + $0x60] ss:$8 sps:$4 sm:$0xff]   ;;  %v1042_v44 = vld [vmem:[%s1119_s9 + $0x74] ss:$8 sps:$4 sm:$0xff]  }
  0x19   : > { %v1038_v41 = vld [vmem:[%s1119_s9 + $0xe4] ss:$8 sps:$4 sm:$0xff]   ;;  %v1041_v43 = vld [vmem:[%s1119_s9 + $0xe0] ss:$8 sps:$4 sm:$0xff]   ;;  %v1044_v45 = vld [vmem:[%s1119_s9 + $0xf4] ss:$8 sps:$4 sm:$0xff]  }
  0x1a   : > { %v1046_v46 = vld [vmem:[%s1119_s9 + $0x70] ss:$8 sps:$4 sm:$0xff]  }
  0x1b   : > { %859 = vmatpush3.bf16.msra.mxu0 %v995_v13  ;;  %973 = vmatpush3.bf16.msra.mxu1 %v995_v13  ;;  %v1047_v47 = vld [vmem:[%s1119_s9 + $0xf0] ss:$8 sps:$4 sm:$0xff]  }
  0x1c   : > { %860 = vmatprep.subr.bf16.mxu0 %v996_v14  ;;  %966 = vmatprep.subr.bf16.mxu1 %v996_v14 }
  0x1f   : > { %861 = vmatpush3.bf16.msra.mxu0 %v997_v15  ;;  %974 = vmatpush3.bf16.msra.mxu1 %v997_v15 }
  0x20   : > { %862 = vmatprep.subr.bf16.mxu0 %v998_v16  ;;  %967 = vmatprep.subr.bf16.mxu1 %v998_v16 }
  0x23   : > { %863 = vmatpush3.bf16.msra.mxu0 %v999_v17  ;;  %975 = vmatpush3.bf16.msra.mxu1 %v999_v17 }
  0x26   : > { %538 = vmatmul.mubr.bf16.vlgmr.msra.gmra.mrb[0].mxu0 %v1000_v18  ;;  %602 = vmatmul.mubr.bf16.vlgmr.msra.gmra.mrb[0].mxu1 %v1003_v19 }
  0x27   : > { %545 = vmatprep.mubr.bf16.mxu0 %v1006_v20  ;;  %609 = vmatprep.mubr.bf16.mxu1 %v1008_v21 }
  0x2e   : > { %546 = vmatmul.mubr.bf16.gmra.mrb[4].mxu0 %v1010_v22  ;;  %610 = vmatmul.mubr.bf16.gmra.mrb[4].mxu1 %v1011_v23 }
  0x2f   : > { %553 = vmatprep.mubr.bf16.mxu0 %v1012_v24  ;;  %617 = vmatprep.mubr.bf16.mxu1 %v1014_v25 }
  0x36   : > { %554 = vmatmul.mubr.bf16.gmra.mrb[8].mxu0 %v1016_v26  ;;  %618 = vmatmul.mubr.bf16.gmra.mrb[8].mxu1 %v1017_v27 }
  0x37   : > { %561 = vmatprep.mubr.bf16.mxu0 %v1018_v28  ;;  %625 = vmatprep.mubr.bf16.mxu1 %v1020_v29 }
  0x3e   : > { %562 = vmatmul.mubr.bf16.gmra.mrb[12].mxu0 %v1022_v30  ;;  %626 = vmatmul.mubr.bf16.gmra.mrb[12].mxu1 %v1023_v31 }
  0x3f   : > { %569 = vmatprep.mubr.bf16.mxu0 %v1024_v32  ;;  %633 = vmatprep.mubr.bf16.mxu1 %v1026_v33 }
  0x46   : > { %570 = vmatmul.mubr.bf16.gmra.mrb[16].mxu0 %v1028_v34  ;;  %634 = vmatmul.mubr.bf16.gmra.mrb[16].mxu1 %v1029_v35 }
  0x47   : > { %577 = vmatprep.mubr.bf16.mxu0 %v1030_v36  ;;  %641 = vmatprep.mubr.bf16.mxu1 %v1032_v37 }
  0x4e   : > { %578 = vmatmul.mubr.bf16.gmra.mrb[20].mxu0 %v1034_v38  ;;  %642 = vmatmul.mubr.bf16.gmra.mrb[20].mxu1 %v1035_v39 }
  0x4f   : > { %585 = vmatprep.mubr.bf16.mxu0 %v1036_v40  ;;  %649 = vmatprep.mubr.bf16.mxu1 %v1038_v41 }
  0x56   : > { %586 = vmatmul.mubr.bf16.gmra.mrb[24].mxu0 %v1040_v42  ;;  %650 = vmatmul.mubr.bf16.gmra.mrb[24].mxu1 %v1041_v43 }
  0x57   : > { %593 = vmatprep.mubr.bf16.mxu0 %v1042_v44  ;;  %657 = vmatprep.mubr.bf16.mxu1 %v1044_v45 }
  0x5e   : > { %594 = vmatmul.mubr.bf16.gmra.mrb[28].mxu0 %v1046_v46  ;;  %658 = vmatmul.mubr.bf16.gmra.mrb[28].mxu1 %v1047_v47 }
  0xf9   : > { %v864_v48 = vpop.f32.mrb[0].mxu0  ;;  %v912_v49 = vpop.f32.mrb[0].mxu1 }
  0xfa   : > { %v865_v51 = vpop.f32.mrb[1].mxu0  ;;  %v913_v52 = vpop.f32.mrb[1].mxu1 }
  0xfb   : > { %v866_v53 = vadd.f32 %v865_v51, %v864_v48  ;;  %v914_v54 = vadd.f32 %v913_v52, %v912_v49  ;;  %v867_v55 = vpop.f32.mrb[2].mxu0  ;;  %v915_v56 = vpop.f32.mrb[2].mxu1 }
  0xfc   : > { %v868_v57 = vpop.f32.mrb[3].mxu0  ;;  %v916_v58 = vpop.f32.mrb[3].mxu1 }
  0xfd   : > { %v540_v59 = vadd.f32 %v866_v53, %v1177_v50  ;;  %v604_v60 = vadd.f32 %v914_v54, %v1177_v50  ;;  %v869_v61 = vadd.f32 %v868_v57, %v867_v55  ;;  %v917_v62 = vadd.f32 %v916_v58, %v915_v56 }
  0xff   : > { %v666_v63 = vmax.f32 %v540_v59, 0.0  ;;  %v682_v0 = vmax.f32 %v604_v60, 0.0  ;;  %v543_v1 = vadd.f32 %v869_v61, %v1177_v50  ;;  %v607_v2 = vadd.f32 %v917_v62, %v1177_v50 }
 0x101   : > { %698 = vst [vmem:[%s1186_s30] sm:$0xff] %v666_v63  ;;  %714 = vst [vmem:[%s1186_s30 + $0x80] sm:$0xff] %v682_v0  ;;  %v667_v3 = vmax.f32 %v543_v1, 0.0  ;;  %v683_v4 = vmax.f32 %v607_v2, 0.0  ;;  %v870_v5 = vpop.f32.mrb[4].mxu0  ;;  %v918_v6 = vpop.f32.mrb[4].mxu1 }
 0x102   : > { %v871_v7 = vpop.f32.mrb[5].mxu0  ;;  %v919_v8 = vpop.f32.mrb[5].mxu1 }
 0x103   : > { %699 = vst [vmem:[%s1186_s30 + $0x8] sm:$0xff] %v667_v3  ;;  %715 = vst [vmem:[%s1186_s30 + $0x88] sm:$0xff] %v683_v4  ;;  %v872_v9 = vadd.f32 %v871_v7, %v870_v5  ;;  %v920_v10 = vadd.f32 %v919_v8, %v918_v6  ;;  %v873_v11 = vpop.f32.mrb[6].mxu0  ;;  %v921_v12 = vpop.f32.mrb[6].mxu1 }
 0x104   : > { %v874_v13 = vpop.f32.mrb[7].mxu0  ;;  %v922_v14 = vpop.f32.mrb[7].mxu1 }
 0x105   : > { %v548_v15 = vadd.f32 %v872_v9, %v1177_v50  ;;  %v612_v16 = vadd.f32 %v920_v10, %v1177_v50  ;;  %v875_v17 = vadd.f32 %v874_v13, %v873_v11  ;;  %v923_v18 = vadd.f32 %v922_v14, %v921_v12 }
 0x107   : > { %v668_v19 = vmax.f32 %v548_v15, 0.0  ;;  %v684_v20 = vmax.f32 %v612_v16, 0.0  ;;  %v551_v21 = vadd.f32 %v875_v17, %v1177_v50  ;;  %v615_v22 = vadd.f32 %v923_v18, %v1177_v50 }
 0x109   : > { %700 = vst [vmem:[%s1186_s30 + $0x10] sm:$0xff] %v668_v19  ;;  %716 = vst [vmem:[%s1186_s30 + $0x90] sm:$0xff] %v684_v20  ;;  %v669_v23 = vmax.f32 %v551_v21, 0.0  ;;  %v685_v24 = vmax.f32 %v615_v22, 0.0  ;;  %v876_v25 = vpop.f32.mrb[8].mxu0  ;;  %v924_v26 = vpop.f32.mrb[8].mxu1 }
 0x10a   : > { %v877_v27 = vpop.f32.mrb[9].mxu0  ;;  %v925_v28 = vpop.f32.mrb[9].mxu1 }
 0x10b   : > { %701 = vst [vmem:[%s1186_s30 + $0x18] sm:$0xff] %v669_v23  ;;  %717 = vst [vmem:[%s1186_s30 + $0x98] sm:$0xff] %v685_v24  ;;  %v878_v29 = vadd.f32 %v877_v27, %v876_v25  ;;  %v926_v30 = vadd.f32 %v925_v28, %v924_v26  ;;  %v879_v31 = vpop.f32.mrb[10].mxu0  ;;  %v927_v32 = vpop.f32.mrb[10].mxu1 }
 0x10c   : > { %v880_v33 = vpop.f32.mrb[11].mxu0  ;;  %v928_v34 = vpop.f32.mrb[11].mxu1 }
 0x10d   : > { %v556_v35 = vadd.f32 %v878_v29, %v1177_v50  ;;  %v620_v36 = vadd.f32 %v926_v30, %v1177_v50  ;;  %v881_v37 = vadd.f32 %v880_v33, %v879_v31  ;;  %v929_v38 = vadd.f32 %v928_v34, %v927_v32 }
 0x10f   : > { %v670_v39 = vmax.f32 %v556_v35, 0.0  ;;  %v686_v40 = vmax.f32 %v620_v36, 0.0  ;;  %v559_v41 = vadd.f32 %v881_v37, %v1177_v50  ;;  %v623_v42 = vadd.f32 %v929_v38, %v1177_v50 }
 0x111   : > { %702 = vst [vmem:[%s1186_s30 + $0x20] sm:$0xff] %v670_v39  ;;  %718 = vst [vmem:[%s1186_s30 + $0xa0] sm:$0xff] %v686_v40  ;;  %v671_v43 = vmax.f32 %v559_v41, 0.0  ;;  %v687_v44 = vmax.f32 %v623_v42, 0.0  ;;  %v882_v45 = vpop.f32.mrb[12].mxu0  ;;  %v930_v46 = vpop.f32.mrb[12].mxu1 }
 0x112   : > { %v883_v47 = vpop.f32.mrb[13].mxu0  ;;  %v931_v48 = vpop.f32.mrb[13].mxu1 }
 0x113   : > { %703 = vst [vmem:[%s1186_s30 + $0x28] sm:$0xff] %v671_v43  ;;  %719 = vst [vmem:[%s1186_s30 + $0xa8] sm:$0xff] %v687_v44  ;;  %v884_v49 = vadd.f32 %v883_v47, %v882_v45  ;;  %v932_v51 = vadd.f32 %v931_v48, %v930_v46  ;;  %v885_v52 = vpop.f32.mrb[14].mxu0  ;;  %v933_v53 = vpop.f32.mrb[14].mxu1 }
 0x114   : > { %v886_v54 = vpop.f32.mrb[15].mxu0  ;;  %v934_v55 = vpop.f32.mrb[15].mxu1 }
 0x115   : > { %v564_v56 = vadd.f32 %v884_v49, %v1177_v50  ;;  %v628_v57 = vadd.f32 %v932_v51, %v1177_v50  ;;  %v887_v58 = vadd.f32 %v886_v54, %v885_v52  ;;  %v935_v59 = vadd.f32 %v934_v55, %v933_v53 }
 0x117   : > { %v672_v60 = vmax.f32 %v564_v56, 0.0  ;;  %v688_v61 = vmax.f32 %v628_v57, 0.0  ;;  %v567_v62 = vadd.f32 %v887_v58, %v1177_v50  ;;  %v631_v63 = vadd.f32 %v935_v59, %v1177_v50 }
 0x119   : > { %704 = vst [vmem:[%s1186_s30 + $0x30] sm:$0xff] %v672_v60  ;;  %720 = vst [vmem:[%s1186_s30 + $0xb0] sm:$0xff] %v688_v61  ;;  %v673_v0 = vmax.f32 %v567_v62, 0.0  ;;  %v689_v1 = vmax.f32 %v631_v63, 0.0  ;;  %v888_v2 = vpop.f32.mrb[16].mxu0  ;;  %v936_v3 = vpop.f32.mrb[16].mxu1 }
 0x11a   : > { %v889_v4 = vpop.f32.mrb[17].mxu0  ;;  %v937_v5 = vpop.f32.mrb[17].mxu1 }
 0x11b   : > { %705 = vst [vmem:[%s1186_s30 + $0x38] sm:$0xff] %v673_v0  ;;  %721 = vst [vmem:[%s1186_s30 + $0xb8] sm:$0xff] %v689_v1  ;;  %v890_v6 = vadd.f32 %v889_v4, %v888_v2  ;;  %v938_v7 = vadd.f32 %v937_v5, %v936_v3  ;;  %v891_v8 = vpop.f32.mrb[18].mxu0  ;;  %v939_v9 = vpop.f32.mrb[18].mxu1 }
 0x11c   : > { %v892_v10 = vpop.f32.mrb[19].mxu0  ;;  %v940_v11 = vpop.f32.mrb[19].mxu1 }
 0x11d   : > { %v572_v12 = vadd.f32 %v890_v6, %v1177_v50  ;;  %v636_v13 = vadd.f32 %v938_v7, %v1177_v50  ;;  %v893_v14 = vadd.f32 %v892_v10, %v891_v8  ;;  %v941_v15 = vadd.f32 %v940_v11, %v939_v9 }
 0x11f   : > { %v674_v16 = vmax.f32 %v572_v12, 0.0  ;;  %v690_v17 = vmax.f32 %v636_v13, 0.0  ;;  %v575_v18 = vadd.f32 %v893_v14, %v1177_v50  ;;  %v639_v19 = vadd.f32 %v941_v15, %v1177_v50 }
 0x121   : > { %706 = vst [vmem:[%s1186_s30 + $0x40] sm:$0xff] %v674_v16  ;;  %722 = vst [vmem:[%s1186_s30 + $0xc0] sm:$0xff] %v690_v17  ;;  %v675_v20 = vmax.f32 %v575_v18, 0.0  ;;  %v691_v21 = vmax.f32 %v639_v19, 0.0  ;;  %v894_v22 = vpop.f32.mrb[20].mxu0  ;;  %v942_v23 = vpop.f32.mrb[20].mxu1 }
 0x122   : > { %v895_v24 = vpop.f32.mrb[21].mxu0  ;;  %v943_v25 = vpop.f32.mrb[21].mxu1 }
 0x123   : > { %707 = vst [vmem:[%s1186_s30 + $0x48] sm:$0xff] %v675_v20  ;;  %723 = vst [vmem:[%s1186_s30 + $0xc8] sm:$0xff] %v691_v21  ;;  %v896_v26 = vadd.f32 %v895_v24, %v894_v22  ;;  %v944_v27 = vadd.f32 %v943_v25, %v942_v23  ;;  %v897_v28 = vpop.f32.mrb[22].mxu0  ;;  %v945_v29 = vpop.f32.mrb[22].mxu1 }
 0x124   : > { %v898_v30 = vpop.f32.mrb[23].mxu0  ;;  %v946_v31 = vpop.f32.mrb[23].mxu1 }
 0x125   : > { %v580_v32 = vadd.f32 %v896_v26, %v1177_v50  ;;  %v644_v33 = vadd.f32 %v944_v27, %v1177_v50  ;;  %v899_v34 = vadd.f32 %v898_v30, %v897_v28  ;;  %v947_v35 = vadd.f32 %v946_v31, %v945_v29 }
 0x127   : > { %v676_v36 = vmax.f32 %v580_v32, 0.0  ;;  %v692_v37 = vmax.f32 %v644_v33, 0.0  ;;  %v583_v38 = vadd.f32 %v899_v34, %v1177_v50  ;;  %v647_v39 = vadd.f32 %v947_v35, %v1177_v50 }
 0x129   : > { %708 = vst [vmem:[%s1186_s30 + $0x50] sm:$0xff] %v676_v36  ;;  %724 = vst [vmem:[%s1186_s30 + $0xd0] sm:$0xff] %v692_v37  ;;  %v677_v40 = vmax.f32 %v583_v38, 0.0  ;;  %v693_v41 = vmax.f32 %v647_v39, 0.0  ;;  %v900_v42 = vpop.f32.mrb[24].mxu0  ;;  %v948_v43 = vpop.f32.mrb[24].mxu1 }
 0x12a   : > { %v901_v44 = vpop.f32.mrb[25].mxu0  ;;  %v949_v45 = vpop.f32.mrb[25].mxu1 }
 0x12b   : > { %709 = vst [vmem:[%s1186_s30 + $0x58] sm:$0xff] %v677_v40  ;;  %725 = vst [vmem:[%s1186_s30 + $0xd8] sm:$0xff] %v693_v41  ;;  %v902_v46 = vadd.f32 %v901_v44, %v900_v42  ;;  %v950_v47 = vadd.f32 %v949_v45, %v948_v43  ;;  %v903_v48 = vpop.f32.mrb[26].mxu0  ;;  %v951_v49 = vpop.f32.mrb[26].mxu1 }
 0x12c   : > { %v904_v51 = vpop.f32.mrb[27].mxu0  ;;  %v952_v52 = vpop.f32.mrb[27].mxu1 }
 0x12d   : > { %v588_v53 = vadd.f32 %v902_v46, %v1177_v50  ;;  %v652_v54 = vadd.f32 %v950_v47, %v1177_v50  ;;  %v905_v55 = vadd.f32 %v904_v51, %v903_v48  ;;  %v953_v56 = vadd.f32 %v952_v52, %v951_v49 }
 0x12f   : > { %v678_v57 = vmax.f32 %v588_v53, 0.0  ;;  %v694_v58 = vmax.f32 %v652_v54, 0.0  ;;  %v591_v59 = vadd.f32 %v905_v55, %v1177_v50  ;;  %v655_v60 = vadd.f32 %v953_v56, %v1177_v50 }
 0x131   : > { %710 = vst [vmem:[%s1186_s30 + $0x60] sm:$0xff] %v678_v57  ;;  %726 = vst [vmem:[%s1186_s30 + $0xe0] sm:$0xff] %v694_v58  ;;  %v679_v61 = vmax.f32 %v591_v59, 0.0  ;;  %v695_v62 = vmax.f32 %v655_v60, 0.0  ;;  %v906_v63 = vpop.f32.mrb[28].mxu0  ;;  %v954_v0 = vpop.f32.mrb[28].mxu1 }
 0x132   : > { %v907_v1 = vpop.f32.mrb[29].mxu0  ;;  %v955_v2 = vpop.f32.mrb[29].mxu1 }
 0x133   : > { %711 = vst [vmem:[%s1186_s30 + $0x68] sm:$0xff] %v679_v61  ;;  %727 = vst [vmem:[%s1186_s30 + $0xe8] sm:$0xff] %v695_v62  ;;  %v908_v3 = vadd.f32 %v907_v1, %v906_v63  ;;  %v956_v4 = vadd.f32 %v955_v2, %v954_v0  ;;  %v909_v5 = vpop.f32.mrb[30].mxu0  ;;  %v957_v6 = vpop.f32.mrb[30].mxu1 }
 0x134   : > { %v910_v7 = vpop.f32.mrb[31].mxu0  ;;  %v958_v8 = vpop.f32.mrb[31].mxu1 }
 0x135   : > { %v596_v9 = vadd.f32 %v908_v3, %v1177_v50  ;;  %v660_v10 = vadd.f32 %v956_v4, %v1177_v50  ;;  %v911_v11 = vadd.f32 %v910_v7, %v909_v5  ;;  %v959_v12 = vadd.f32 %v958_v8, %v957_v6 }
 0x137   : > { %v680_v13 = vmax.f32 %v596_v9, 0.0  ;;  %v696_v14 = vmax.f32 %v660_v10, 0.0  ;;  %v599_v15 = vadd.f32 %v911_v11, %v1177_v50  ;;  %v663_v16 = vadd.f32 %v959_v12, %v1177_v50 }
 0x139   : > { %712 = vst [vmem:[%s1186_s30 + $0x70] sm:$0xff] %v680_v13  ;;  %728 = vst [vmem:[%s1186_s30 + $0xf0] sm:$0xff] %v696_v14  ;;  %v681_v17 = vmax.f32 %v599_v15, 0.0  ;;  %v697_v18 = vmax.f32 %v663_v16, 0.0 }
 0x13b   : > { %713 = vst [vmem:[%s1186_s30 + $0x78] sm:$0xff] %v681_v17  ;;  %729 = vst [vmem:[%s1186_s30 + $0xf8] sm:$0xff] %v697_v18 }
 0x13c PF: > { %s13_s12 = sadd.s32 1, %s1054_s12  }
 0x13d   : > { %p10_p4 = scmp.ge.s32.totalorder %s13_s12, 4  }
 0x13f   :  { %12 = sbr.rel (!%p10_p4) target bundleno = 1 (0x1), region = 62 }

// kernel: tile.8
= control target key start
LH: loop header
LB: loop body
LE: loop exit
PB: predicated region body
PF: predicated region fallthrough
CT: control target
= control target key end

     0   :  { %s22_s0 = inlined_call_operand.vmem [shape: f32[16], index: 0, kind: input, shape index: {}]   ;;  %s23_s1 = inlined_call_operand.vmem [shape: f32[4,16], index: 1, kind: output, shape index: {}]  }
   0x1   :  { %v4_v0 = vld [vmem:[%s22_s0] ss:$0 sm:$0xff] }
   0x2   :  { %5 = vst [vmem:[%s23_s1] sm:$0xf] %v4_v0 }

// kernel: tile.9
= control target key start
LH: loop header
LB: loop body
LE: loop exit
PB: predicated region body
PF: predicated region fallthrough
CT: control target
= control target key end

     0   :  { %vm7_vm0 = vcmask 130048   ;;  %s37_s8 = smov 16   ;;  %s38_s9 = smov 32   ;;  %vm13_vm1 = vcmask 523648   ;;  %vm19_vm2 = vcmask 392448   ;;  %vm25_vm3 = vcmask 261248   ;;  %s55_s0 = inlined_call_operand.vmem [shape: f32[4,16], index: 0, kind: input, shape index: {}]   ;;  %s56_s1 = inlined_call_operand.vmem [shape: f32[64], index: 1, kind: output, shape index: {}]  }
   0x1   :  { %v4_v0 = vld [vmem:[%s55_s0] sm:$0xf]  ;;  %s36_s0 = smov 48  }
   0x2   :  { %5 = vst [vmem:[#allocation1] sm:$0xf] %v4_v0 }
   0x9   :  { %v10_v1 = vld [vmem:[#allocation1 + $0x3] sm:$0x1]   ;;  %v22_v2 = vld [vmem:[#allocation1 + $0x1] sm:$0x1]   ;;  %v6_v3 = vld [vmem:[#allocation1] sm:$0x1]  }
   0xa   :  { %11 = vrot.lane.b32.xlu0 %v10_v1, %s36_s0  ;;  %23 = vrot.lane.b32.xlu1 %v22_v2, %s37_s8  ;;  %v16_v4 = vld [vmem:[#allocation1 + $0x2] sm:$0x1]   ;;  %8 = vst.msk [vmem:[#allocation0] sm:$0x1] %vm7_vm0, %v6_v3  }
   0xe   :  { %17 = vrot.lane.b32.xlu0 %v16_v4, %s38_s9 }
  0x7c   :  { %v12_v5 = vpop.permute.xlu0 %11   ;;  %v24_v6 = vpop.permute.xlu1 %23  }
  0x7d   :  { %14 = vst.msk [vmem:[#allocation0] sm:$0x1] %vm13_vm1, %v12_v5  }
  0x80   :  { %v18_v7 = vpop.permute.xlu0 %17  }
  0x81   :  { %20 = vst.msk [vmem:[#allocation0] sm:$0x1] %vm19_vm2, %v18_v7  }
  0x82   :  { %26 = vst.msk [vmem:[#allocation0] sm:$0x1] %vm25_vm3, %v24_v6  }
  0x89   :  { %v30_v8 = vld [vmem:[#allocation0] sm:$0x1] }
  0x8a   :  { %32 = vst [vmem:[%s56_s1] sm:$0x1] %v30_v8 }

// kernel: conv_autoencoder_forward.6
= control target key start
LH: loop header
LB: loop body
LE: loop exit
PB: predicated region body
PF: predicated region fallthrough
CT: control target
= control target key end

     0   :  { %s1409_s12 = smov 0   ;;  %s1411_s13 = smov 0   ;;  %s1762_s0 = inlined_call_operand.vmem [shape: bf16[578,16], index: 0, kind: input, shape index: {}]   ;;  %s1763_s1 = inlined_call_operand.vmem [shape: bf16[16,128], index: 1, kind: input, shape index: {}]   ;;  %s1764_s2 = inlined_call_operand.vmem [shape: f32[1,128], index: 2, kind: input, shape index: {}]   ;;  %s1765_s3 = inlined_call_operand.vmem [shape: f32[578,128], index: 3, kind: output, shape index: {}]  }
   0x1   :  { %s1413_s14 = smov 0  }
   0x2 LB: > { %s1422_s15 = sadd.s32 4294967295, %s1353_s14   ;;  %s1424_s16 = sadd.s32 1, %s1353_s14   ;;  %s1353_s14 = sphi %s1413_s14, %s1774_s14   ;;  %s1349_s13 = sphi %s1411_s13, %s1773_s13   ;;  %s1345_s12 = sphi %s1409_s12, %s1772_s12  }
   0x3   : > { %s85_s17 = ssub.s32 %s1353_s14, %s1424_s16  ;;  %s88_s18 = sadd.s32 1, %s1349_s13 }
   0x4   : > { %p86_p0 = scmp.eq.s32.totalorder %s85_s17, 0  ;;  %p98_p1 = scmp.ne.s32.totalorder %s1349_s13, %s1345_s12 }
   0x5   : > { %p99_p2 = scmp.eq.s32.totalorder %s1422_s15, 1  ;;  %p1028_p3 = scmp.ge.s32.totalorder %s1353_s14, 1 }
   0x6   : > { %s1432_s19 = scalar_select %p86_p0, %s1349_s13, %s88_s18  }
   0x7   : > { %p1434_p4 = por %p99_p2, %p98_p1  ;;  %p146_p5 = scmp.lt.s32.totalorder %s1353_s14, 3 }
   0x9   : > { %p147_p6 = pnand %p1028_p3, %p146_p5 }
   0xa   : > { %v1275_v0 = vld [vmem:[%s1763_s1] sm:$0xff] (!%p147_p6)   ;;  %v1387_v1 = vmov (!%p147_p6), 0.0   ;;  %s1443_s23 = smul.u32 (!%p147_p6), 38, %s1422_s15  ;;  %vm1388_vm0 = vmmov (!%p147_p6), 0   ;;  %vm341_vm1 = vcmask (!%p147_p6), 130048   ;;  %s170_s29 = sand.u32 (!%p147_p6), 1, %s1345_s12  }
   0xb   : > { %150 = sbr.rel (%p147_p6) target bundleno = 385 (0x181), region = 32  ;;  %1103 = vmatprep.subr.bf16.mxu0 (!%p147_p6), %v1387_v1  ;;  %1181 = vmatprep.subr.bf16.mxu1 (!%p147_p6), %v1387_v1  ;;  %v1533_v21 = vld [vmem:[%s1764_s2] ss:$0 sm:$0xff] (!%p147_p6) }
   0xc   : > { %1104 = vmatpush3.bf16.msra.mxu0 (!%p147_p6), %v1275_v0  ;;  %1105 = vmatprep.mubr.msk.bf16.mxu0 (!%p147_p6), %vm1388_vm0, %v1387_v1  ;;  %p178_p7 = scmp.lt.s32.totalorder (!%p147_p6), %s1443_s23, 72  ;;  %s1183_s30 = smul.u32 (!%p147_p6), 304, %s170_s29 }
   0xd   : > { %1182 = vmatpush3.bf16.msra.mxu1 (!%p147_p6), %v1275_v0  ;;  %1145 = vmatprep.mubr.msk.bf16.mxu1 (!%p147_p6), %vm1388_vm0, %v1387_v1 }
   0xe   : > { %s1539_s6 = scalar_lea.vmem (!%p147_p6), [#allocation2], %s1183_s30  }
  0x12   : > { %s179_s24 = scalar_select %p178_p7, %s1443_s23, 72 }
  0x13   : > { %s668_s7 = ssub.s32 (%p1434_p4), 73, %s1443_s23  ;;  %s1082_s8 = smul.u32 (%p1434_p4), 304, %s1422_s15 }
  0x14   : > { %s1029_s25 = sshll.u32 %s179_s24, 2  ;;  %p669_p8 = scmp.lt.s32.totalorder (%p1434_p4), %s668_s7, 38 }
  0x15   : > { %s1455_s28 = scalar_lea.vmem %s1762_s0, %s1029_s25  ;;  %s1620_s11 = scalar_lea.vmem (%p1434_p4), %s1765_s3, %s1082_s8  }
  0x16   : > { %v1276_v2 = vld [vmem:[%s1455_s28] sm:$0xff]   ;;  %v1277_v3 = vld [vmem:[%s1455_s28 + $0x50] sm:$0xff]   ;;  %v1278_v4 = vld [vmem:[%s1455_s28 + $0x8] sm:$0xff]  }
  0x17   : > { %1106 = vmatmul.mubr.msk.bf16.vlgmr.msra.gmra.mrb[0].mxu0 %vm341_vm1, %v1276_v2  ;;  %1146 = vmatmul.mubr.msk.bf16.vlgmr.msra.gmra.mrb[0].mxu1 %vm341_vm1, %v1277_v3  ;;  %v1279_v5 = vld [vmem:[%s1455_s28 + $0x58] sm:$0xff]   ;;  %v1280_v6 = vld [vmem:[%s1455_s28 + $0x10] sm:$0xff]   ;;  %v1281_v7 = vld [vmem:[%s1455_s28 + $0x60] sm:$0xff]  }
  0x18   : > { %1109 = vmatprep.mubr.msk.bf16.mxu0 %vm1388_vm0, %v1387_v1  ;;  %1149 = vmatprep.mubr.msk.bf16.mxu1 %vm1388_vm0, %v1387_v1  ;;  %v1282_v8 = vld [vmem:[%s1455_s28 + $0x18] sm:$0xff]   ;;  %v1283_v9 = vld [vmem:[%s1455_s28 + $0x68] sm:$0xff]   ;;  %v1284_v10 = vld [vmem:[%s1455_s28 + $0x20] sm:$0xff]  }
  0x19   : > { %v1285_v11 = vld [vmem:[%s1455_s28 + $0x70] sm:$0xff]   ;;  %v1286_v12 = vld [vmem:[%s1455_s28 + $0x28] sm:$0xff]   ;;  %v1287_v13 = vld [vmem:[%s1455_s28 + $0x78] sm:$0xff]  }
  0x1a   : > { %v1288_v14 = vld [vmem:[%s1455_s28 + $0x30] sm:$0xff]   ;;  %v1289_v15 = vld [vmem:[%s1455_s28 + $0x80] sm:$0xff]   ;;  %v1290_v16 = vld [vmem:[%s1455_s28 + $0x38] sm:$0xff]  }
  0x1b   : > { %v1291_v17 = vld [vmem:[%s1455_s28 + $0x88] sm:$0xff]   ;;  %v1292_v18 = vld [vmem:[%s1455_s28 + $0x40] sm:$0xff]   ;;  %v1293_v19 = vld [vmem:[%s1455_s28 + $0x90] sm:$0xff]  }
  0x1c   : > { %v1294_v20 = vld [vmem:[%s1455_s28 + $0x48] sm:$0xff]  }
  0x1f   : > { %1110 = vmatmul.mubr.msk.bf16.gmra.mrb[4].mxu0 %vm341_vm1, %v1278_v4  ;;  %1150 = vmatmul.mubr.msk.bf16.gmra.mrb[4].mxu1 %vm341_vm1, %v1279_v5 }
  0x20   : > { %1113 = vmatprep.mubr.msk.bf16.mxu0 %vm1388_vm0, %v1387_v1  ;;  %1153 = vmatprep.mubr.msk.bf16.mxu1 %vm1388_vm0, %v1387_v1 }
  0x27   : > { %1114 = vmatmul.mubr.msk.bf16.gmra.mrb[8].mxu0 %vm341_vm1, %v1280_v6  ;;  %1154 = vmatmul.mubr.msk.bf16.gmra.mrb[8].mxu1 %vm341_vm1, %v1281_v7 }
  0x28   : > { %1117 = vmatprep.mubr.msk.bf16.mxu0 %vm1388_vm0, %v1387_v1  ;;  %1157 = vmatprep.mubr.msk.bf16.mxu1 %vm1388_vm0, %v1387_v1 }
  0x2f   : > { %1118 = vmatmul.mubr.msk.bf16.gmra.mrb[12].mxu0 %vm341_vm1, %v1282_v8  ;;  %1158 = vmatmul.mubr.msk.bf16.gmra.mrb[12].mxu1 %vm341_vm1, %v1283_v9 }
  0x30   : > { %1121 = vmatprep.mubr.msk.bf16.mxu0 %vm1388_vm0, %v1387_v1  ;;  %1161 = vmatprep.mubr.msk.bf16.mxu1 %vm1388_vm0, %v1387_v1 }
  0x37   : > { %1122 = vmatmul.mubr.msk.bf16.gmra.mrb[16].mxu0 %vm341_vm1, %v1284_v10  ;;  %1162 = vmatmul.mubr.msk.bf16.gmra.mrb[16].mxu1 %vm341_vm1, %v1285_v11 }
  0x38   : > { %1125 = vmatprep.mubr.msk.bf16.mxu0 %vm1388_vm0, %v1387_v1  ;;  %1165 = vmatprep.mubr.msk.bf16.mxu1 %vm1388_vm0, %v1387_v1 }
  0x3f   : > { %1126 = vmatmul.mubr.msk.bf16.gmra.mrb[20].mxu0 %vm341_vm1, %v1286_v12  ;;  %1166 = vmatmul.mubr.msk.bf16.gmra.mrb[20].mxu1 %vm341_vm1, %v1287_v13 }
  0x40   : > { %1129 = vmatprep.mubr.msk.bf16.mxu0 %vm1388_vm0, %v1387_v1  ;;  %1169 = vmatprep.mubr.msk.bf16.mxu1 %vm1388_vm0, %v1387_v1 }
  0x47   : > { %1130 = vmatmul.mubr.msk.bf16.gmra.mrb[24].mxu0 %vm341_vm1, %v1288_v14  ;;  %1170 = vmatmul.mubr.msk.bf16.gmra.mrb[24].mxu1 %vm341_vm1, %v1289_v15 }
  0x48   : > { %1133 = vmatprep.mubr.msk.bf16.mxu0 %vm1388_vm0, %v1387_v1  ;;  %1173 = vmatprep.mubr.msk.bf16.mxu1 %vm1388_vm0, %v1387_v1 }
  0x4f   : > { %1134 = vmatmul.mubr.msk.bf16.gmra.mrb[28].mxu0 %vm341_vm1, %v1290_v16  ;;  %1174 = vmatmul.mubr.msk.bf16.gmra.mrb[28].mxu1 %vm341_vm1, %v1291_v17 }
  0x50   : > { %1137 = vmatprep.mubr.msk.bf16.mxu0 %vm1388_vm0, %v1387_v1  ;;  %1177 = vmatprep.mubr.msk.bf16.mxu1 %vm1388_vm0, %v1387_v1 }
  0x57   : > { %1138 = vmatmul.mubr.msk.bf16.gmra.mrb[32].mxu0 %vm341_vm1, %v1292_v18  ;;  %1178 = vmatmul.mubr.msk.bf16.gmra.mrb[32].mxu1 %vm341_vm1, %v1293_v19 }
  0x58   : > { %1141 = vmatprep.mubr.msk.bf16.mxu0 %vm1388_vm0, %v1387_v1 }
  0x5f   : > { %1142 = vmatmul.mubr.msk.bf16.gmra.mrb[36].mxu0 %vm341_vm1, %v1294_v20 }
  0xea   : > { %v433_v22 = vpop.f32.mrb[0].mxu0  ;;  %v513_v25 = vpop.f32.mrb[0].mxu1 }
  0xeb   : > { %v434_v23 = vadd.f32 %v1533_v21, %v433_v22  ;;  %v1107_v24 = vpop.f32.mrb[1].mxu0  ;;  %v514_v27 = vadd.f32 %v1533_v21, %v513_v25  ;;  %v1147_v28 = vpop.f32.mrb[1].mxu1 }
  0xec   : > { %v436_v26 = vpop.f32.mrb[2].mxu0  ;;  %v516_v32 = vpop.f32.mrb[2].mxu1 }
  0xed   : > { %v584_v29 = vmax.f32 %v434_v23, 0.0  ;;  %v437_v30 = vadd.f32 %v1533_v21, %v436_v26  ;;  %v1108_v31 = vpop.f32.mrb[3].mxu0  ;;  %v604_v33 = vmax.f32 %v514_v27, 0.0  ;;  %v517_v34 = vadd.f32 %v1533_v21, %v516_v32  ;;  %v1148_v35 = vpop.f32.mrb[3].mxu1 }
  0xef   : > { %622 = vst [vmem:[%s1539_s6] sm:$0xff] %v584_v29  ;;  %v585_v36 = vmax.f32 %v437_v30, 0.0  ;;  %642 = vst [vmem:[%s1539_s6 + $0xa0] sm:$0xff] %v604_v33  ;;  %v605_v37 = vmax.f32 %v517_v34, 0.0 }
  0xf1   : > { %623 = vst [vmem:[%s1539_s6 + $0x8] sm:$0xff] %v585_v36  ;;  %643 = vst [vmem:[%s1539_s6 + $0xa8] sm:$0xff] %v605_v37 }
  0xf2   : > { %v441_v38 = vpop.f32.mrb[4].mxu0  ;;  %v521_v41 = vpop.f32.mrb[4].mxu1 }
  0xf3   : > { %v442_v39 = vadd.f32 %v1533_v21, %v441_v38  ;;  %v1111_v40 = vpop.f32.mrb[5].mxu0  ;;  %v522_v43 = vadd.f32 %v1533_v21, %v521_v41  ;;  %v1151_v44 = vpop.f32.mrb[5].mxu1 }
  0xf4   : > { %v444_v42 = vpop.f32.mrb[6].mxu0  ;;  %v524_v48 = vpop.f32.mrb[6].mxu1 }
  0xf5   : > { %v586_v45 = vmax.f32 %v442_v39, 0.0  ;;  %v445_v46 = vadd.f32 %v1533_v21, %v444_v42  ;;  %v1112_v47 = vpop.f32.mrb[7].mxu0  ;;  %v606_v49 = vmax.f32 %v522_v43, 0.0  ;;  %v525_v50 = vadd.f32 %v1533_v21, %v524_v48  ;;  %v1152_v51 = vpop.f32.mrb[7].mxu1 }
  0xf7   : > { %624 = vst [vmem:[%s1539_s6 + $0x10] sm:$0xff] %v586_v45  ;;  %v587_v52 = vmax.f32 %v445_v46, 0.0  ;;  %644 = vst [vmem:[%s1539_s6 + $0xb0] sm:$0xff] %v606_v49  ;;  %v607_v53 = vmax.f32 %v525_v50, 0.0 }
  0xf9   : > { %625 = vst [vmem:[%s1539_s6 + $0x18] sm:$0xff] %v587_v52  ;;  %645 = vst [vmem:[%s1539_s6 + $0xb8] sm:$0xff] %v607_v53 }
  0xfa   : > { %v449_v54 = vpop.f32.mrb[8].mxu0  ;;  %v529_v57 = vpop.f32.mrb[8].mxu1 }
  0xfb   : > { %v450_v55 = vadd.f32 %v1533_v21, %v449_v54  ;;  %v1115_v56 = vpop.f32.mrb[9].mxu0  ;;  %v530_v59 = vadd.f32 %v1533_v21, %v529_v57  ;;  %v1155_v60 = vpop.f32.mrb[9].mxu1 }
  0xfc   : > { %v452_v58 = vpop.f32.mrb[10].mxu0  ;;  %v532_v0 = vpop.f32.mrb[10].mxu1 }
  0xfd   : > { %v588_v61 = vmax.f32 %v450_v55, 0.0  ;;  %v453_v62 = vadd.f32 %v1533_v21, %v452_v58  ;;  %v1116_v63 = vpop.f32.mrb[11].mxu0  ;;  %v608_v1 = vmax.f32 %v530_v59, 0.0  ;;  %v533_v2 = vadd.f32 %v1533_v21, %v532_v0  ;;  %v1156_v3 = vpop.f32.mrb[11].mxu1 }
  0xff   : > { %626 = vst [vmem:[%s1539_s6 + $0x20] sm:$0xff] %v588_v61  ;;  %v589_v4 = vmax.f32 %v453_v62, 0.0  ;;  %646 = vst [vmem:[%s1539_s6 + $0xc0] sm:$0xff] %v608_v1  ;;  %v609_v5 = vmax.f32 %v533_v2, 0.0 }
 0x101   : > { %627 = vst [vmem:[%s1539_s6 + $0x28] sm:$0xff] %v589_v4  ;;  %647 = vst [vmem:[%s1539_s6 + $0xc8] sm:$0xff] %v609_v5 }
 0x102   : > { %v457_v6 = vpop.f32.mrb[12].mxu0  ;;  %v537_v9 = vpop.f32.mrb[12].mxu1 }
 0x103   : > { %v458_v7 = vadd.f32 %v1533_v21, %v457_v6  ;;  %v1119_v8 = vpop.f32.mrb[13].mxu0  ;;  %v538_v11 = vadd.f32 %v1533_v21, %v537_v9  ;;  %v1159_v12 = vpop.f32.mrb[13].mxu1 }
 0x104   : > { %v460_v10 = vpop.f32.mrb[14].mxu0  ;;  %v540_v16 = vpop.f32.mrb[14].mxu1 }
 0x105   : > { %v590_v13 = vmax.f32 %v458_v7, 0.0  ;;  %v461_v14 = vadd.f32 %v1533_v21, %v460_v10  ;;  %v1120_v15 = vpop.f32.mrb[15].mxu0  ;;  %v610_v17 = vmax.f32 %v538_v11, 0.0  ;;  %v541_v18 = vadd.f32 %v1533_v21, %v540_v16  ;;  %v1160_v19 = vpop.f32.mrb[15].mxu1 }
 0x107   : > { %628 = vst [vmem:[%s1539_s6 + $0x30] sm:$0xff] %v590_v13  ;;  %v591_v20 = vmax.f32 %v461_v14, 0.0  ;;  %648 = vst [vmem:[%s1539_s6 + $0xd0] sm:$0xff] %v610_v17  ;;  %v611_v22 = vmax.f32 %v541_v18, 0.0 }
 0x109   : > { %629 = vst [vmem:[%s1539_s6 + $0x38] sm:$0xff] %v591_v20  ;;  %649 = vst [vmem:[%s1539_s6 + $0xd8] sm:$0xff] %v611_v22 }
 0x10a   : > { %v465_v23 = vpop.f32.mrb[16].mxu0  ;;  %v545_v26 = vpop.f32.mrb[16].mxu1 }
 0x10b   : > { %v466_v24 = vadd.f32 %v1533_v21, %v465_v23  ;;  %v1123_v25 = vpop.f32.mrb[17].mxu0  ;;  %v546_v28 = vadd.f32 %v1533_v21, %v545_v26  ;;  %v1163_v29 = vpop.f32.mrb[17].mxu1 }
 0x10c   : > { %v468_v27 = vpop.f32.mrb[18].mxu0  ;;  %v548_v33 = vpop.f32.mrb[18].mxu1 }
 0x10d   : > { %v592_v30 = vmax.f32 %v466_v24, 0.0  ;;  %v469_v31 = vadd.f32 %v1533_v21, %v468_v27  ;;  %v1124_v32 = vpop.f32.mrb[19].mxu0  ;;  %v612_v34 = vmax.f32 %v546_v28, 0.0  ;;  %v549_v35 = vadd.f32 %v1533_v21, %v548_v33  ;;  %v1164_v36 = vpop.f32.mrb[19].mxu1 }
 0x10f   : > { %630 = vst [vmem:[%s1539_s6 + $0x40] sm:$0xff] %v592_v30  ;;  %v593_v37 = vmax.f32 %v469_v31, 0.0  ;;  %650 = vst [vmem:[%s1539_s6 + $0xe0] sm:$0xff] %v612_v34  ;;  %v613_v38 = vmax.f32 %v549_v35, 0.0 }
 0x111   : > { %631 = vst [vmem:[%s1539_s6 + $0x48] sm:$0xff] %v593_v37  ;;  %651 = vst [vmem:[%s1539_s6 + $0xe8] sm:$0xff] %v613_v38 }
 0x112   : > { %v473_v39 = vpop.f32.mrb[20].mxu0  ;;  %v553_v42 = vpop.f32.mrb[20].mxu1 }
 0x113   : > { %v474_v40 = vadd.f32 %v1533_v21, %v473_v39  ;;  %v1127_v41 = vpop.f32.mrb[21].mxu0  ;;  %v554_v44 = vadd.f32 %v1533_v21, %v553_v42  ;;  %v1167_v45 = vpop.f32.mrb[21].mxu1 }
 0x114   : > { %v476_v43 = vpop.f32.mrb[22].mxu0  ;;  %v556_v49 = vpop.f32.mrb[22].mxu1 }
 0x115   : > { %v594_v46 = vmax.f32 %v474_v40, 0.0  ;;  %v477_v47 = vadd.f32 %v1533_v21, %v476_v43  ;;  %v1128_v48 = vpop.f32.mrb[23].mxu0  ;;  %v614_v50 = vmax.f32 %v554_v44, 0.0  ;;  %v557_v51 = vadd.f32 %v1533_v21, %v556_v49  ;;  %v1168_v52 = vpop.f32.mrb[23].mxu1 }
 0x117   : > { %632 = vst [vmem:[%s1539_s6 + $0x50] sm:$0xff] %v594_v46  ;;  %v595_v53 = vmax.f32 %v477_v47, 0.0  ;;  %652 = vst [vmem:[%s1539_s6 + $0xf0] sm:$0xff] %v614_v50  ;;  %v615_v54 = vmax.f32 %v557_v51, 0.0 }
 0x119   : > { %633 = vst [vmem:[%s1539_s6 + $0x58] sm:$0xff] %v595_v53  ;;  %653 = vst [vmem:[%s1539_s6 + $0xf8] sm:$0xff] %v615_v54 }
 0x11a   : > { %v481_v55 = vpop.f32.mrb[24].mxu0  ;;  %v561_v58 = vpop.f32.mrb[24].mxu1 }
 0x11b   : > { %v482_v56 = vadd.f32 %v1533_v21, %v481_v55  ;;  %v1131_v57 = vpop.f32.mrb[25].mxu0  ;;  %v562_v60 = vadd.f32 %v1533_v21, %v561_v58  ;;  %v1171_v61 = vpop.f32.mrb[25].mxu1 }
 0x11c   : > { %v484_v59 = vpop.f32.mrb[26].mxu0  ;;  %v564_v1 = vpop.f32.mrb[26].mxu1 }
 0x11d   : > { %v596_v62 = vmax.f32 %v482_v56, 0.0  ;;  %v485_v63 = vadd.f32 %v1533_v21, %v484_v59  ;;  %v1132_v0 = vpop.f32.mrb[27].mxu0  ;;  %v616_v2 = vmax.f32 %v562_v60, 0.0  ;;  %v565_v3 = vadd.f32 %v1533_v21, %v564_v1  ;;  %v1172_v4 = vpop.f32.mrb[27].mxu1 }
 0x11f   : > { %634 = vst [vmem:[%s1539_s6 + $0x60] sm:$0xff] %v596_v62  ;;  %v597_v5 = vmax.f32 %v485_v63, 0.0  ;;  %654 = vst [vmem:[%s1539_s6 + $0x100] sm:$0xff] %v616_v2  ;;  %v617_v6 = vmax.f32 %v565_v3, 0.0 }
 0x121   : > { %635 = vst [vmem:[%s1539_s6 + $0x68] sm:$0xff] %v597_v5  ;;  %655 = vst [vmem:[%s1539_s6 + $0x108] sm:$0xff] %v617_v6 }
 0x122   : > { %v489_v7 = vpop.f32.mrb[28].mxu0  ;;  %v569_v10 = vpop.f32.mrb[28].mxu1 }
 0x123   : > { %v490_v8 = vadd.f32 %v1533_v21, %v489_v7  ;;  %v1135_v9 = vpop.f32.mrb[29].mxu0  ;;  %v570_v12 = vadd.f32 %v1533_v21, %v569_v10  ;;  %v1175_v13 = vpop.f32.mrb[29].mxu1 }
 0x124   : > { %v492_v11 = vpop.f32.mrb[30].mxu0  ;;  %v572_v17 = vpop.f32.mrb[30].mxu1 }
 0x125   : > { %v598_v14 = vmax.f32 %v490_v8, 0.0  ;;  %v493_v15 = vadd.f32 %v1533_v21, %v492_v11  ;;  %v1136_v16 = vpop.f32.mrb[31].mxu0  ;;  %v618_v18 = vmax.f32 %v570_v12, 0.0  ;;  %v573_v19 = vadd.f32 %v1533_v21, %v572_v17  ;;  %v1176_v20 = vpop.f32.mrb[31].mxu1 }
 0x127   : > { %636 = vst [vmem:[%s1539_s6 + $0x70] sm:$0xff] %v598_v14  ;;  %v599_v22 = vmax.f32 %v493_v15, 0.0  ;;  %656 = vst [vmem:[%s1539_s6 + $0x110] sm:$0xff] %v618_v18  ;;  %v619_v23 = vmax.f32 %v573_v19, 0.0 }
 0x129   : > { %637 = vst [vmem:[%s1539_s6 + $0x78] sm:$0xff] %v599_v22  ;;  %657 = vst [vmem:[%s1539_s6 + $0x118] sm:$0xff] %v619_v23 }
 0x12a   : > { %v497_v24 = vpop.f32.mrb[32].mxu0  ;;  %v577_v27 = vpop.f32.mrb[32].mxu1 }
 0x12b   : > { %v498_v25 = vadd.f32 %v1533_v21, %v497_v24  ;;  %v1139_v26 = vpop.f32.mrb[33].mxu0  ;;  %v578_v29 = vadd.f32 %v1533_v21, %v577_v27  ;;  %v1179_v30 = vpop.f32.mrb[33].mxu1 }
 0x12c   : > { %v500_v28 = vpop.f32.mrb[34].mxu0  ;;  %v580_v34 = vpop.f32.mrb[34].mxu1 }
 0x12d   : > { %v600_v31 = vmax.f32 %v498_v25, 0.0  ;;  %v501_v32 = vadd.f32 %v1533_v21, %v500_v28  ;;  %v1140_v33 = vpop.f32.mrb[35].mxu0  ;;  %v620_v35 = vmax.f32 %v578_v29, 0.0  ;;  %v581_v36 = vadd.f32 %v1533_v21, %v580_v34  ;;  %v1180_v37 = vpop.f32.mrb[35].mxu1 }
 0x12f   : > { %638 = vst [vmem:[%s1539_s6 + $0x80] sm:$0xff] %v600_v31  ;;  %v601_v38 = vmax.f32 %v501_v32, 0.0  ;;  %658 = vst [vmem:[%s1539_s6 + $0x120] sm:$0xff] %v620_v35  ;;  %v621_v39 = vmax.f32 %v581_v36, 0.0 }
 0x131   : > { %639 = vst [vmem:[%s1539_s6 + $0x88] sm:$0xff] %v601_v38  ;;  %659 = vst [vmem:[%s1539_s6 + $0x128] sm:$0xff] %v621_v39 }
 0x132   : > { %v505_v40 = vpop.f32.mrb[36].mxu0 }
 0x133   : > { %v506_v41 = vadd.f32 %v1533_v21, %v505_v40  ;;  %v1143_v42 = vpop.f32.mrb[37].mxu0  ;;  %666 = sbr.rel (!%p1434_p4) target bundleno = 385 (0x181), region = 36 }
 0x134   : > { %v508_v43 = vpop.f32.mrb[38].mxu0 }
 0x135   : > { %v602_v44 = vmax.f32 %v506_v41, 0.0  ;;  %v509_v45 = vadd.f32 %v1533_v21, %v508_v43  ;;  %v1144_v46 = vpop.f32.mrb[39].mxu0 }
 0x137   : > { %640 = vst [vmem:[%s1539_s6 + $0x90] sm:$0xff] %v602_v44  ;;  %v603_v47 = vmax.f32 %v509_v45, 0.0 }
 0x139   : > { %641 = vst [vmem:[%s1539_s6 + $0x98] sm:$0xff] %v603_v47 }
 0x13a   : > { %s1776_s7 = smov (!%p669_p8, %s668_s7), 38 }
 0x13b   : > { %s1070_s12 = sshll.u32 %s1776_s7, 7 }
 0x13c   : > { %p1073_p9 = scmp.eq.s32.totalorder %s1070_s12, 0 }
 0x13d   : > { %1295 = sdivrem.u32 (!%p1073_p9), %s1776_s7, 38 }
 0x13e   : > { %677 = sbr.rel (%p1073_p9) target bundleno = 385 (0x181), region = 40 }
 0x146   : > { %s1626_s14 = spop.drf %1295 }
 0x147   : > { %p1074_p10 = scmp.le.s32.totalorder %s1626_s14, 0 }
 0x148   : > { %s1767_s15 = smov (!%p1074_p10), %s1620_s11  ;;  %s1768_s17 = smov (!%p1074_p10), %s1539_s6 }
 0x149   : > { %981 = sbr.rel (%p1074_p10) target bundleno = 356 (0x164), region = 116  ;;  %s1635_s18 = smov (!%p1074_p10), 0  }
 0x14a   : > { %s1637_s20 = smov (!%p1074_p10), 0  }
 0x150 LB: >> { %v815_v21 = vld [vmem:[%s1361_s17] sm:$0xff]  ;;  %v817_v48 = vld [vmem:[%s1361_s17 + $0x8] sm:$0xff]  ;;  %v819_v49 = vld [vmem:[%s1361_s17 + $0x10] sm:$0xff]  ;;  %s891_s21 = sadd.s32 1, %s1365_s18  ;;  %s809_s20 = sadd.s32 1, %s1369_s20   ;;  %s1369_s20 = sphi %s1637_s20, %s809_s20   ;;  %s1365_s18 = sphi %s1635_s18, %s1771_s18   ;;  %s1361_s17 = sphi %s1768_s17, %s1770_s17   ;;  %s1357_s15 = sphi %s1767_s15, %s1769_s15  }
 0x151   : >> { %816 = vst [vmem:[%s1357_s15] sm:$0xff] %v815_v21  ;;  %818 = vst [vmem:[%s1357_s15 + $0x8] sm:$0xff] %v817_v48  ;;  %v821_v50 = vld [vmem:[%s1361_s17 + $0x18] sm:$0xff]  ;;  %v823_v51 = vld [vmem:[%s1361_s17 + $0x20] sm:$0xff]  ;;  %p892_p11 = scmp.ge.s32.totalorder %s891_s21, %s1626_s14  ;;  %p808_p12 = scmp.ge.s32.totalorder %s809_s20, %s1626_s14 }
 0x152   : >> { %820 = vst [vmem:[%s1357_s15 + $0x10] sm:$0xff] %v819_v49  ;;  %v825_v52 = vld [vmem:[%s1361_s17 + $0x28] sm:$0xff]  ;;  %822 = vst [vmem:[%s1357_s15 + $0x18] sm:$0xff] %v821_v50  ;;  %v827_v53 = vld [vmem:[%s1361_s17 + $0x30] sm:$0xff] }
 0x153   : >> { %824 = vst [vmem:[%s1357_s15 + $0x20] sm:$0xff] %v823_v51  ;;  %826 = vst [vmem:[%s1357_s15 + $0x28] sm:$0xff] %v825_v52  ;;  %v829_v54 = vld [vmem:[%s1361_s17 + $0x38] sm:$0xff]  ;;  %v831_v55 = vld [vmem:[%s1361_s17 + $0x40] sm:$0xff]  ;;  %s1778_s21 = smov (%p892_p11, %s891_s21), 0 }
 0x154   : >> { %828 = vst [vmem:[%s1357_s15 + $0x30] sm:$0xff] %v827_v53  ;;  %830 = vst [vmem:[%s1357_s15 + $0x38] sm:$0xff] %v829_v54  ;;  %v833_v56 = vld [vmem:[%s1361_s17 + $0x48] sm:$0xff]  ;;  %v835_v57 = vld [vmem:[%s1361_s17 + $0x50] sm:$0xff]  ;;  %s894_s22 = smul.u32 304, %s1778_s21  ;;  %s1771_s18 = smov %s1778_s21 }
 0x155   : >> { %832 = vst [vmem:[%s1357_s15 + $0x40] sm:$0xff] %v831_v55  ;;  %v837_v58 = vld [vmem:[%s1361_s17 + $0x58] sm:$0xff]  ;;  %834 = vst [vmem:[%s1357_s15 + $0x48] sm:$0xff] %v833_v56  ;;  %v839_v59 = vld [vmem:[%s1361_s17 + $0x60] sm:$0xff] }
 0x156   : >> { %836 = vst [vmem:[%s1357_s15 + $0x50] sm:$0xff] %v835_v57  ;;  %838 = vst [vmem:[%s1357_s15 + $0x58] sm:$0xff] %v837_v58  ;;  %v841_v60 = vld [vmem:[%s1361_s17 + $0x68] sm:$0xff]  ;;  %v843_v61 = vld [vmem:[%s1361_s17 + $0x70] sm:$0xff]  ;;  %s1699_s23 = scalar_lea.vmem %s1539_s6, %s894_s22 [#allocation2]   ;;  %s1702_s24 = scalar_lea.vmem %s1620_s11, %s894_s22  }
 0x157   : >> { %840 = vst [vmem:[%s1357_s15 + $0x60] sm:$0xff] %v839_v59  ;;  %842 = vst [vmem:[%s1357_s15 + $0x68] sm:$0xff] %v841_v60  ;;  %v845_v62 = vld [vmem:[%s1361_s17 + $0x78] sm:$0xff]  ;;  %v847_v63 = vld [vmem:[%s1361_s17 + $0x80] sm:$0xff] }
 0x158   : >> { %844 = vst [vmem:[%s1357_s15 + $0x70] sm:$0xff] %v843_v61  ;;  %v849_v0 = vld [vmem:[%s1361_s17 + $0x88] sm:$0xff]  ;;  %846 = vst [vmem:[%s1357_s15 + $0x78] sm:$0xff] %v845_v62  ;;  %v851_v1 = vld [vmem:[%s1361_s17 + $0x90] sm:$0xff] }
 0x159   : >> { %848 = vst [vmem:[%s1357_s15 + $0x80] sm:$0xff] %v847_v63  ;;  %850 = vst [vmem:[%s1357_s15 + $0x88] sm:$0xff] %v849_v0  ;;  %v853_v2 = vld [vmem:[%s1361_s17 + $0x98] sm:$0xff]  ;;  %v855_v3 = vld [vmem:[%s1361_s17 + $0xa0] sm:$0xff] }
 0x15a   : >> { %852 = vst [vmem:[%s1357_s15 + $0x90] sm:$0xff] %v851_v1  ;;  %854 = vst [vmem:[%s1357_s15 + $0x98] sm:$0xff] %v853_v2  ;;  %v857_v4 = vld [vmem:[%s1361_s17 + $0xa8] sm:$0xff]  ;;  %v859_v5 = vld [vmem:[%s1361_s17 + $0xb0] sm:$0xff] }
 0x15b   : >> { %856 = vst [vmem:[%s1357_s15 + $0xa0] sm:$0xff] %v855_v3  ;;  %v861_v6 = vld [vmem:[%s1361_s17 + $0xb8] sm:$0xff]  ;;  %858 = vst [vmem:[%s1357_s15 + $0xa8] sm:$0xff] %v857_v4  ;;  %v863_v7 = vld [vmem:[%s1361_s17 + $0xc0] sm:$0xff] }
 0x15c   : >> { %860 = vst [vmem:[%s1357_s15 + $0xb0] sm:$0xff] %v859_v5  ;;  %862 = vst [vmem:[%s1357_s15 + $0xb8] sm:$0xff] %v861_v6  ;;  %v865_v8 = vld [vmem:[%s1361_s17 + $0xc8] sm:$0xff]  ;;  %v867_v9 = vld [vmem:[%s1361_s17 + $0xd0] sm:$0xff] }
 0x15d   : >> { %864 = vst [vmem:[%s1357_s15 + $0xc0] sm:$0xff] %v863_v7  ;;  %866 = vst [vmem:[%s1357_s15 + $0xc8] sm:$0xff] %v865_v8  ;;  %v869_v10 = vld [vmem:[%s1361_s17 + $0xd8] sm:$0xff]  ;;  %v871_v11 = vld [vmem:[%s1361_s17 + $0xe0] sm:$0xff]  ;;  %811 = sbr.rel (!%p808_p12) target bundleno = 336 (0x150), region = 122 }
 0x15e   : >> { %868 = vst [vmem:[%s1357_s15 + $0xd0] sm:$0xff] %v867_v9  ;;  %v873_v12 = vld [vmem:[%s1361_s17 + $0xe8] sm:$0xff]  ;;  %870 = vst [vmem:[%s1357_s15 + $0xd8] sm:$0xff] %v869_v10  ;;  %v875_v13 = vld [vmem:[%s1361_s17 + $0xf0] sm:$0xff] }
 0x15f   : >> { %872 = vst [vmem:[%s1357_s15 + $0xe0] sm:$0xff] %v871_v11  ;;  %874 = vst [vmem:[%s1357_s15 + $0xe8] sm:$0xff] %v873_v12  ;;  %v877_v14 = vld [vmem:[%s1361_s17 + $0xf8] sm:$0xff]  ;;  %v879_v15 = vld [vmem:[%s1361_s17 + $0x100] sm:$0xff] }
 0x160   : >> { %876 = vst [vmem:[%s1357_s15 + $0xf0] sm:$0xff] %v875_v13  ;;  %878 = vst [vmem:[%s1357_s15 + $0xf8] sm:$0xff] %v877_v14  ;;  %v881_v16 = vld [vmem:[%s1361_s17 + $0x108] sm:$0xff]  ;;  %v883_v17 = vld [vmem:[%s1361_s17 + $0x110] sm:$0xff] }
 0x161   : >> { %880 = vst [vmem:[%s1357_s15 + $0x100] sm:$0xff] %v879_v15  ;;  %v885_v18 = vld [vmem:[%s1361_s17 + $0x118] sm:$0xff]  ;;  %882 = vst [vmem:[%s1357_s15 + $0x108] sm:$0xff] %v881_v16  ;;  %v887_v19 = vld [vmem:[%s1361_s17 + $0x120] sm:$0xff] }
 0x162   : >> { %884 = vst [vmem:[%s1357_s15 + $0x110] sm:$0xff] %v883_v17  ;;  %886 = vst [vmem:[%s1357_s15 + $0x118] sm:$0xff] %v885_v18  ;;  %v889_v20 = vld [vmem:[%s1361_s17 + $0x128] sm:$0xff]  ;;  %s1770_s17 = smov %s1699_s23 }
 0x163   : >> { %888 = vst [vmem:[%s1357_s15 + $0x120] sm:$0xff] %v887_v19  ;;  %890 = vst [vmem:[%s1357_s15 + $0x128] sm:$0xff] %v889_v20  ;;  %s1769_s15 = smov %s1702_s24 }
 0x164 PF: > { %1297 = sdivrem.u32 %s1776_s7, 38 }
 0x165   : > { %s1075_s25 = smul.u32 304, %s1626_s14 }
 0x167   : > { %s902_s26 = scalar_lea.vmem %s1539_s6, %s1075_s25 [#allocation2]   ;;  %s904_s27 = scalar_lea.vmem %s1620_s11, %s1075_s25  }
 0x16d   : > { %s1298_s28 = spop.drf %1297 }
 0x16e   : > { %p1077_p13 = scmp.le.s32.totalorder %s1298_s28, 0 }
 0x16f   : > { %s1371_s29 = smov (!%p1077_p13), %s904_s27   ;;  %s1375_s30 = smov (!%p1077_p13), %s902_s26  }
 0x170   : > { %995 = sbr.rel (%p1077_p13) target bundleno = 385 (0x181), region = 127  ;;  %s1379_s4 = smov (!%p1077_p13), 0  }
 0x171   : > { %s1383_s5 = smov (!%p1077_p13), 0  }
 0x177 LB: >> { %v914_v22 = vld [vmem:[%s1377_s30] sm:$0xff]  ;;  %s916_s8 = sadd.s32 1, %s1381_s4  ;;  %s908_s5 = sadd.s32 1, %s1385_s5   ;;  %s1385_s5 = sphi %s1383_s5, %s908_s5   ;;  %s1381_s4 = sphi %s1379_s4, %s1380_s4   ;;  %s1377_s30 = sphi %s1375_s30, %s921_s30   ;;  %s1373_s29 = sphi %s1371_s29, %s922_s29  }
 0x178   : >> { %915 = vst [vmem:[%s1373_s29] sm:$0xff] %v914_v22  ;;  %p917_p0 = scmp.ge.s32.totalorder %s916_s8, %s1298_s28  ;;  %p907_p1 = scmp.ge.s32.totalorder %s908_s5, %s1298_s28 }
 0x17a   : >> { %s1780_s8 = smov (%p917_p0, %s916_s8), 0  ;;  %910 = sbr.rel (!%p907_p1) target bundleno = 375 (0x177), region = 133 }
 0x17b   : >> { %s1078_s6 = sshll.u32 %s1780_s8, 3  ;;  %s1380_s4 = smov %s1780_s8  }
 0x17c   : >> { %s921_s30 = scalar_lea.vmem %s902_s26, %s1078_s6 [#allocation2]   ;;  %s922_s29 = scalar_lea.vmem %s904_s27, %s1078_s6  }
 0x181 PF: > { %p10_p2 = scmp.ge.s32.totalorder %s1424_s16, 4   ;;  %s1772_s12 = smov %s1349_s13 }
 0x182   : > { %s1773_s13 = smov %s1432_s19  ;;  %s1774_s14 = smov %s1424_s16 }
 0x183   :  { %12 = sbr.rel (!%p10_p2) target bundleno = 2 (0x2), region = 144 }

// kernel: conv_autoencoder_forward.7
= control target key start
LH: loop header
LB: loop body
LE: loop exit
PB: predicated region body
PF: predicated region fallthrough
CT: control target
= control target key end

     0   :  { %s2313_s12 = smov 0   ;;  %s2315_s13 = smov 0   ;;  %s2963_s0 = inlined_call_operand.vmem [shape: bf16[2312,16], index: 0, kind: input, shape index: {}]   ;;  %s2964_s1 = inlined_call_operand.vmem [shape: bf16[16,128], index: 1, kind: input, shape index: {}]   ;;  %s2965_s2 = inlined_call_operand.vmem [shape: f32[1,128], index: 2, kind: input, shape index: {}]   ;;  %s2966_s3 = inlined_call_operand.vmem [shape: f32[2312,128], index: 3, kind: output, shape index: {}]  }
   0x1   :  { %s2317_s14 = smov 0  }
   0x2 LB: > { %s2326_s15 = sadd.s32 4294967295, %s2257_s14   ;;  %s2328_s16 = sadd.s32 1, %s2257_s14   ;;  %s2257_s14 = sphi %s2317_s14, %s2975_s14   ;;  %s2253_s13 = sphi %s2315_s13, %s2974_s13   ;;  %s2249_s12 = sphi %s2313_s12, %s2973_s12  }
   0x3   : > { %s85_s17 = ssub.s32 %s2257_s14, %s2328_s16  ;;  %s88_s18 = sadd.s32 1, %s2253_s13 }
   0x4   : > { %p86_p0 = scmp.eq.s32.totalorder %s85_s17, 0  ;;  %p98_p1 = scmp.ne.s32.totalorder %s2253_s13, %s2249_s12 }
   0x5   : > { %p99_p2 = scmp.eq.s32.totalorder %s2326_s15, 2  ;;  %p1692_p3 = scmp.ge.s32.totalorder %s2257_s14, 1 }
   0x6   : > { %s2336_s19 = scalar_select %p86_p0, %s2253_s13, %s88_s18  }
   0x7   : > { %p2338_p4 = por %p99_p2, %p98_p1  ;;  %p146_p5 = scmp.lt.s32.totalorder %s2257_s14, 4 }
   0x9   : > { %p147_p6 = pnand %p1692_p3, %p146_p5 }
   0xa   : > { %v2153_v0 = vld [vmem:[%s2964_s1] sm:$0xff] (!%p147_p6)   ;;  %v2291_v1 = vmov (!%p147_p6), 0.0   ;;  %s2347_s23 = smul.u32 (!%p147_p6), 98, %s2326_s15  ;;  %vm2292_vm0 = vmmov (!%p147_p6), 0   ;;  %vm551_vm1 = vcmask (!%p147_p6), 130048   ;;  %s170_s29 = sand.u32 (!%p147_p6), 1, %s2249_s12  }
   0xb   : > { %150 = sbr.rel (%p147_p6) target bundleno = 504 (0x1f8), region = 32  ;;  %1862 = vmatprep.subr.bf16.mxu0 (!%p147_p6), %v2291_v1  ;;  %2060 = vmatprep.subr.bf16.mxu1 (!%p147_p6), %v2291_v1  ;;  %v2557_v51 = vld [vmem:[%s2965_s2] ss:$0 sm:$0xff] (!%p147_p6) }
   0xc   : > { %1863 = vmatpush3.bf16.msra.mxu0 (!%p147_p6), %v2153_v0  ;;  %1864 = vmatprep.mubr.msk.bf16.mxu0 (!%p147_p6), %vm2292_vm0, %v2291_v1  ;;  %p178_p7 = scmp.lt.s32.totalorder (!%p147_p6), %s2347_s23, 288  ;;  %s2062_s30 = smul.u32 (!%p147_p6), 784, %s170_s29 }
   0xd   : > { %2061 = vmatpush3.bf16.msra.mxu1 (!%p147_p6), %v2153_v0  ;;  %1964 = vmatprep.mubr.msk.bf16.mxu1 (!%p147_p6), %vm2292_vm0, %v2291_v1 }
   0xe   : > { %s2561_s6 = scalar_lea.vmem (!%p147_p6), [#allocation2], %s2062_s30  }
  0x12   : > { %s179_s24 = scalar_select %p178_p7, %s2347_s23, 288 }
  0x13   : > { %s1230_s7 = ssub.s32 (%p2338_p4), 289, %s2347_s23  ;;  %s1809_s8 = smul.u32 (%p2338_p4), 784, %s2326_s15 }
  0x14   : > { %s1693_s25 = sshll.u32 %s179_s24, 2  ;;  %p1231_p8 = scmp.lt.s32.totalorder (%p2338_p4), %s1230_s7, 98 }
  0x15   : > { %s2359_s28 = scalar_lea.vmem %s2963_s0, %s1693_s25  ;;  %s2764_s11 = scalar_lea.vmem (%p2338_p4), %s2966_s3, %s1809_s8  }
  0x16   : > { %v2154_v2 = vld [vmem:[%s2359_s28] sm:$0xff]   ;;  %v2155_v3 = vld [vmem:[%s2359_s28 + $0xc8] sm:$0xff]   ;;  %v2157_v5 = vld [vmem:[%s2359_s28 + $0xd0] sm:$0xff]  }
  0x17   : > { %1865 = vmatmul.mubr.msk.bf16.vlgmr.msra.gmra.mrb[0].mxu0 %vm551_vm1, %v2154_v2  ;;  %1965 = vmatmul.mubr.msk.bf16.vlgmr.msra.gmra.mrb[0].mxu1 %vm551_vm1, %v2155_v3  ;;  %v2156_v4 = vld [vmem:[%s2359_s28 + $0x8] sm:$0xff]   ;;  %v2158_v6 = vld [vmem:[%s2359_s28 + $0x10] sm:$0xff]   ;;  %v2159_v7 = vld [vmem:[%s2359_s28 + $0xd8] sm:$0xff]  }
  0x18   : > { %1868 = vmatprep.mubr.msk.bf16.mxu0 %vm2292_vm0, %v2291_v1  ;;  %1968 = vmatprep.mubr.msk.bf16.mxu1 %vm2292_vm0, %v2291_v1  ;;  %v2160_v8 = vld [vmem:[%s2359_s28 + $0x18] sm:$0xff]   ;;  %v2161_v9 = vld [vmem:[%s2359_s28 + $0xe0] sm:$0xff]   ;;  %v2163_v11 = vld [vmem:[%s2359_s28 + $0xe8] sm:$0xff]  }
  0x19   : > { %v2162_v10 = vld [vmem:[%s2359_s28 + $0x20] sm:$0xff]   ;;  %v2164_v12 = vld [vmem:[%s2359_s28 + $0x28] sm:$0xff]   ;;  %v2165_v13 = vld [vmem:[%s2359_s28 + $0xf0] sm:$0xff]  }
  0x1a   : > { %v2166_v14 = vld [vmem:[%s2359_s28 + $0x30] sm:$0xff]   ;;  %v2167_v15 = vld [vmem:[%s2359_s28 + $0xf8] sm:$0xff]   ;;  %v2169_v17 = vld [vmem:[%s2359_s28 + $0x100] sm:$0xff]  }
  0x1b   : > { %v2168_v16 = vld [vmem:[%s2359_s28 + $0x38] sm:$0xff]   ;;  %v2170_v18 = vld [vmem:[%s2359_s28 + $0x40] sm:$0xff]   ;;  %v2171_v19 = vld [vmem:[%s2359_s28 + $0x108] sm:$0xff]  }
  0x1c   : > { %v2172_v20 = vld [vmem:[%s2359_s28 + $0x48] sm:$0xff]   ;;  %v2173_v21 = vld [vmem:[%s2359_s28 + $0x110] sm:$0xff]   ;;  %v2175_v23 = vld [vmem:[%s2359_s28 + $0x118] sm:$0xff]  }
  0x1d   : > { %v2174_v22 = vld [vmem:[%s2359_s28 + $0x50] sm:$0xff]   ;;  %v2176_v24 = vld [vmem:[%s2359_s28 + $0x58] sm:$0xff]   ;;  %v2177_v25 = vld [vmem:[%s2359_s28 + $0x120] sm:$0xff]  }
  0x1e   : > { %v2178_v26 = vld [vmem:[%s2359_s28 + $0x60] sm:$0xff]   ;;  %v2179_v27 = vld [vmem:[%s2359_s28 + $0x128] sm:$0xff]   ;;  %v2181_v29 = vld [vmem:[%s2359_s28 + $0x130] sm:$0xff]  }
  0x1f   : > { %1869 = vmatmul.mubr.msk.bf16.gmra.mrb[4].mxu0 %vm551_vm1, %v2156_v4  ;;  %1969 = vmatmul.mubr.msk.bf16.gmra.mrb[4].mxu1 %vm551_vm1, %v2157_v5  ;;  %v2180_v28 = vld [vmem:[%s2359_s28 + $0x68] sm:$0xff]   ;;  %v2182_v30 = vld [vmem:[%s2359_s28 + $0x70] sm:$0xff]   ;;  %v2183_v31 = vld [vmem:[%s2359_s28 + $0x138] sm:$0xff]  }
  0x20   : > { %1872 = vmatprep.mubr.msk.bf16.mxu0 %vm2292_vm0, %v2291_v1  ;;  %1972 = vmatprep.mubr.msk.bf16.mxu1 %vm2292_vm0, %v2291_v1  ;;  %v2184_v32 = vld [vmem:[%s2359_s28 + $0x78] sm:$0xff]   ;;  %v2185_v33 = vld [vmem:[%s2359_s28 + $0x140] sm:$0xff]   ;;  %v2187_v35 = vld [vmem:[%s2359_s28 + $0x148] sm:$0xff]  }
  0x21   : > { %v2186_v34 = vld [vmem:[%s2359_s28 + $0x80] sm:$0xff]   ;;  %v2188_v36 = vld [vmem:[%s2359_s28 + $0x88] sm:$0xff]   ;;  %v2189_v37 = vld [vmem:[%s2359_s28 + $0x150] sm:$0xff]  }
  0x22   : > { %v2190_v38 = vld [vmem:[%s2359_s28 + $0x90] sm:$0xff]   ;;  %v2191_v39 = vld [vmem:[%s2359_s28 + $0x158] sm:$0xff]   ;;  %v2193_v41 = vld [vmem:[%s2359_s28 + $0x160] sm:$0xff]  }
  0x23   : > { %v2192_v40 = vld [vmem:[%s2359_s28 + $0x98] sm:$0xff]   ;;  %v2194_v42 = vld [vmem:[%s2359_s28 + $0xa0] sm:$0xff]   ;;  %v2195_v43 = vld [vmem:[%s2359_s28 + $0x168] sm:$0xff]  }
  0x24   : > { %v2196_v44 = vld [vmem:[%s2359_s28 + $0xa8] sm:$0xff]   ;;  %v2197_v45 = vld [vmem:[%s2359_s28 + $0x170] sm:$0xff]   ;;  %v2199_v47 = vld [vmem:[%s2359_s28 + $0x178] sm:$0xff]  }
  0x25   : > { %v2198_v46 = vld [vmem:[%s2359_s28 + $0xb0] sm:$0xff]   ;;  %v2200_v48 = vld [vmem:[%s2359_s28 + $0xb8] sm:$0xff]   ;;  %v2201_v49 = vld [vmem:[%s2359_s28 + $0x180] sm:$0xff]  }
  0x26   : > { %v2202_v50 = vld [vmem:[%s2359_s28 + $0xc0] sm:$0xff]  }
  0x27   : > { %1873 = vmatmul.mubr.msk.bf16.gmra.mrb[8].mxu0 %vm551_vm1, %v2158_v6  ;;  %1973 = vmatmul.mubr.msk.bf16.gmra.mrb[8].mxu1 %vm551_vm1, %v2159_v7 }
  0x28   : > { %1876 = vmatprep.mubr.msk.bf16.mxu0 %vm2292_vm0, %v2291_v1  ;;  %1976 = vmatprep.mubr.msk.bf16.mxu1 %vm2292_vm0, %v2291_v1 }
  0x2f   : > { %1877 = vmatmul.mubr.msk.bf16.gmra.mrb[12].mxu0 %vm551_vm1, %v2160_v8  ;;  %1977 = vmatmul.mubr.msk.bf16.gmra.mrb[12].mxu1 %vm551_vm1, %v2161_v9 }
  0x30   : > { %1880 = vmatprep.mubr.msk.bf16.mxu0 %vm2292_vm0, %v2291_v1  ;;  %1980 = vmatprep.mubr.msk.bf16.mxu1 %vm2292_vm0, %v2291_v1 }
  0x37   : > { %1881 = vmatmul.mubr.msk.bf16.gmra.mrb[16].mxu0 %vm551_vm1, %v2162_v10  ;;  %1981 = vmatmul.mubr.msk.bf16.gmra.mrb[16].mxu1 %vm551_vm1, %v2163_v11 }
  0x38   : > { %1884 = vmatprep.mubr.msk.bf16.mxu0 %vm2292_vm0, %v2291_v1  ;;  %1984 = vmatprep.mubr.msk.bf16.mxu1 %vm2292_vm0, %v2291_v1 }
  0x3f   : > { %1885 = vmatmul.mubr.msk.bf16.gmra.mrb[20].mxu0 %vm551_vm1, %v2164_v12  ;;  %1985 = vmatmul.mubr.msk.bf16.gmra.mrb[20].mxu1 %vm551_vm1, %v2165_v13 }
  0x40   : > { %1888 = vmatprep.mubr.msk.bf16.mxu0 %vm2292_vm0, %v2291_v1  ;;  %1988 = vmatprep.mubr.msk.bf16.mxu1 %vm2292_vm0, %v2291_v1 }
  0x47   : > { %1889 = vmatmul.mubr.msk.bf16.gmra.mrb[24].mxu0 %vm551_vm1, %v2166_v14  ;;  %1989 = vmatmul.mubr.msk.bf16.gmra.mrb[24].mxu1 %vm551_vm1, %v2167_v15 }
  0x48   : > { %1892 = vmatprep.mubr.msk.bf16.mxu0 %vm2292_vm0, %v2291_v1  ;;  %1992 = vmatprep.mubr.msk.bf16.mxu1 %vm2292_vm0, %v2291_v1 }
  0x4f   : > { %1893 = vmatmul.mubr.msk.bf16.gmra.mrb[28].mxu0 %vm551_vm1, %v2168_v16  ;;  %1993 = vmatmul.mubr.msk.bf16.gmra.mrb[28].mxu1 %vm551_vm1, %v2169_v17 }
  0x50   : > { %1896 = vmatprep.mubr.msk.bf16.mxu0 %vm2292_vm0, %v2291_v1  ;;  %1996 = vmatprep.mubr.msk.bf16.mxu1 %vm2292_vm0, %v2291_v1 }
  0x57   : > { %1897 = vmatmul.mubr.msk.bf16.gmra.mrb[32].mxu0 %vm551_vm1, %v2170_v18  ;;  %1997 = vmatmul.mubr.msk.bf16.gmra.mrb[32].mxu1 %vm551_vm1, %v2171_v19 }
  0x58   : > { %1900 = vmatprep.mubr.msk.bf16.mxu0 %vm2292_vm0, %v2291_v1  ;;  %2000 = vmatprep.mubr.msk.bf16.mxu1 %vm2292_vm0, %v2291_v1 }
  0x5f   : > { %1901 = vmatmul.mubr.msk.bf16.gmra.mrb[36].mxu0 %vm551_vm1, %v2172_v20  ;;  %2001 = vmatmul.mubr.msk.bf16.gmra.mrb[36].mxu1 %vm551_vm1, %v2173_v21 }
  0x60   : > { %1904 = vmatprep.mubr.msk.bf16.mxu0 %vm2292_vm0, %v2291_v1  ;;  %2004 = vmatprep.mubr.msk.bf16.mxu1 %vm2292_vm0, %v2291_v1 }
  0x67   : > { %1905 = vmatmul.mubr.msk.bf16.gmra.mrb[40].mxu0 %vm551_vm1, %v2174_v22  ;;  %2005 = vmatmul.mubr.msk.bf16.gmra.mrb[40].mxu1 %vm551_vm1, %v2175_v23 }
  0x68   : > { %1908 = vmatprep.mubr.msk.bf16.mxu0 %vm2292_vm0, %v2291_v1  ;;  %2008 = vmatprep.mubr.msk.bf16.mxu1 %vm2292_vm0, %v2291_v1 }
  0x6f   : > { %1909 = vmatmul.mubr.msk.bf16.gmra.mrb[44].mxu0 %vm551_vm1, %v2176_v24  ;;  %2009 = vmatmul.mubr.msk.bf16.gmra.mrb[44].mxu1 %vm551_vm1, %v2177_v25 }
  0x70   : > { %1912 = vmatprep.mubr.msk.bf16.mxu0 %vm2292_vm0, %v2291_v1  ;;  %2012 = vmatprep.mubr.msk.bf16.mxu1 %vm2292_vm0, %v2291_v1 }
  0x77   : > { %1913 = vmatmul.mubr.msk.bf16.gmra.mrb[48].mxu0 %vm551_vm1, %v2178_v26  ;;  %2013 = vmatmul.mubr.msk.bf16.gmra.mrb[48].mxu1 %vm551_vm1, %v2179_v27 }
  0x78   : > { %1916 = vmatprep.mubr.msk.bf16.mxu0 %vm2292_vm0, %v2291_v1  ;;  %2016 = vmatprep.mubr.msk.bf16.mxu1 %vm2292_vm0, %v2291_v1 }
  0x7f   : > { %1917 = vmatmul.mubr.msk.bf16.gmra.mrb[52].mxu0 %vm551_vm1, %v2180_v28  ;;  %2017 = vmatmul.mubr.msk.bf16.gmra.mrb[52].mxu1 %vm551_vm1, %v2181_v29 }
  0x80   : > { %1920 = vmatprep.mubr.msk.bf16.mxu0 %vm2292_vm0, %v2291_v1  ;;  %2020 = vmatprep.mubr.msk.bf16.mxu1 %vm2292_vm0, %v2291_v1 }
  0x87   : > { %1921 = vmatmul.mubr.msk.bf16.gmra.mrb[56].mxu0 %vm551_vm1, %v2182_v30  ;;  %2021 = vmatmul.mubr.msk.bf16.gmra.mrb[56].mxu1 %vm551_vm1, %v2183_v31 }
  0x88   : > { %1924 = vmatprep.mubr.msk.bf16.mxu0 %vm2292_vm0, %v2291_v1  ;;  %2024 = vmatprep.mubr.msk.bf16.mxu1 %vm2292_vm0, %v2291_v1 }
  0x8f   : > { %1925 = vmatmul.mubr.msk.bf16.gmra.mrb[60].mxu0 %vm551_vm1, %v2184_v32  ;;  %2025 = vmatmul.mubr.msk.bf16.gmra.mrb[60].mxu1 %vm551_vm1, %v2185_v33 }
  0x90   : > { %1928 = vmatprep.mubr.msk.bf16.mxu0 %vm2292_vm0, %v2291_v1  ;;  %2028 = vmatprep.mubr.msk.bf16.mxu1 %vm2292_vm0, %v2291_v1 }
  0x97   : > { %1929 = vmatmul.mubr.msk.bf16.gmra.mrb[64].mxu0 %vm551_vm1, %v2186_v34  ;;  %2029 = vmatmul.mubr.msk.bf16.gmra.mrb[64].mxu1 %vm551_vm1, %v2187_v35 }
  0x98   : > { %1932 = vmatprep.mubr.msk.bf16.mxu0 %vm2292_vm0, %v2291_v1  ;;  %2032 = vmatprep.mubr.msk.bf16.mxu1 %vm2292_vm0, %v2291_v1 }
  0x9f   : > { %1933 = vmatmul.mubr.msk.bf16.gmra.mrb[68].mxu0 %vm551_vm1, %v2188_v36  ;;  %2033 = vmatmul.mubr.msk.bf16.gmra.mrb[68].mxu1 %vm551_vm1, %v2189_v37 }
  0xa0   : > { %1936 = vmatprep.mubr.msk.bf16.mxu0 %vm2292_vm0, %v2291_v1  ;;  %2036 = vmatprep.mubr.msk.bf16.mxu1 %vm2292_vm0, %v2291_v1 }
  0xa7   : > { %1937 = vmatmul.mubr.msk.bf16.gmra.mrb[72].mxu0 %vm551_vm1, %v2190_v38  ;;  %2037 = vmatmul.mubr.msk.bf16.gmra.mrb[72].mxu1 %vm551_vm1, %v2191_v39 }
  0xa8   : > { %1940 = vmatprep.mubr.msk.bf16.mxu0 %vm2292_vm0, %v2291_v1  ;;  %2040 = vmatprep.mubr.msk.bf16.mxu1 %vm2292_vm0, %v2291_v1 }
  0xaf   : > { %1941 = vmatmul.mubr.msk.bf16.gmra.mrb[76].mxu0 %vm551_vm1, %v2192_v40  ;;  %2041 = vmatmul.mubr.msk.bf16.gmra.mrb[76].mxu1 %vm551_vm1, %v2193_v41 }
  0xb0   : > { %1944 = vmatprep.mubr.msk.bf16.mxu0 %vm2292_vm0, %v2291_v1  ;;  %2044 = vmatprep.mubr.msk.bf16.mxu1 %vm2292_vm0, %v2291_v1 }
  0xb7   : > { %1945 = vmatmul.mubr.msk.bf16.gmra.mrb[80].mxu0 %vm551_vm1, %v2194_v42  ;;  %2045 = vmatmul.mubr.msk.bf16.gmra.mrb[80].mxu1 %vm551_vm1, %v2195_v43 }
  0xb8   : > { %1948 = vmatprep.mubr.msk.bf16.mxu0 %vm2292_vm0, %v2291_v1  ;;  %2048 = vmatprep.mubr.msk.bf16.mxu1 %vm2292_vm0, %v2291_v1 }
  0xbf   : > { %1949 = vmatmul.mubr.msk.bf16.gmra.mrb[84].mxu0 %vm551_vm1, %v2196_v44  ;;  %2049 = vmatmul.mubr.msk.bf16.gmra.mrb[84].mxu1 %vm551_vm1, %v2197_v45 }
  0xc0   : > { %1952 = vmatprep.mubr.msk.bf16.mxu0 %vm2292_vm0, %v2291_v1  ;;  %2052 = vmatprep.mubr.msk.bf16.mxu1 %vm2292_vm0, %v2291_v1 }
  0xc7   : > { %1953 = vmatmul.mubr.msk.bf16.gmra.mrb[88].mxu0 %vm551_vm1, %v2198_v46  ;;  %2053 = vmatmul.mubr.msk.bf16.gmra.mrb[88].mxu1 %vm551_vm1, %v2199_v47 }
  0xc8   : > { %1956 = vmatprep.mubr.msk.bf16.mxu0 %vm2292_vm0, %v2291_v1  ;;  %2056 = vmatprep.mubr.msk.bf16.mxu1 %vm2292_vm0, %v2291_v1 }
  0xcf   : > { %1957 = vmatmul.mubr.msk.bf16.gmra.mrb[92].mxu0 %vm551_vm1, %v2200_v48  ;;  %2057 = vmatmul.mubr.msk.bf16.gmra.mrb[92].mxu1 %vm551_vm1, %v2201_v49 }
  0xd0   : > { %1960 = vmatprep.mubr.msk.bf16.mxu0 %vm2292_vm0, %v2291_v1 }
  0xd7   : > { %1961 = vmatmul.mubr.msk.bf16.gmra.mrb[96].mxu0 %vm551_vm1, %v2202_v50 }
  0xea   : > { %v733_v52 = vpop.f32.mrb[0].mxu0  ;;  %v933_v55 = vpop.f32.mrb[0].mxu1 }
  0xeb   : > { %v734_v53 = vadd.f32 %v2557_v51, %v733_v52  ;;  %v1866_v54 = vpop.f32.mrb[1].mxu0  ;;  %v934_v57 = vadd.f32 %v2557_v51, %v933_v55  ;;  %v1966_v58 = vpop.f32.mrb[1].mxu1 }
  0xec   : > { %v736_v56 = vpop.f32.mrb[2].mxu0  ;;  %v936_v61 = vpop.f32.mrb[2].mxu1 }
  0xed   : > { %1124 = vst [vmem:[%s2561_s6] sm:$0xff] %v734_v53  ;;  %v737_v59 = vadd.f32 %v2557_v51, %v736_v56  ;;  %v1867_v60 = vpop.f32.mrb[3].mxu0  ;;  %1174 = vst [vmem:[%s2561_s6 + $0x190] sm:$0xff] %v934_v57  ;;  %v937_v62 = vadd.f32 %v2557_v51, %v936_v61  ;;  %v1967_v63 = vpop.f32.mrb[3].mxu1 }
  0xef   : > { %1125 = vst [vmem:[%s2561_s6 + $0x8] sm:$0xff] %v737_v59  ;;  %1175 = vst [vmem:[%s2561_s6 + $0x198] sm:$0xff] %v937_v62 }
  0xf2   : > { %v741_v0 = vpop.f32.mrb[4].mxu0  ;;  %v941_v3 = vpop.f32.mrb[4].mxu1 }
  0xf3   : > { %v742_v1 = vadd.f32 %v2557_v51, %v741_v0  ;;  %v1870_v2 = vpop.f32.mrb[5].mxu0  ;;  %v942_v5 = vadd.f32 %v2557_v51, %v941_v3  ;;  %v1970_v6 = vpop.f32.mrb[5].mxu1 }
  0xf4   : > { %v744_v4 = vpop.f32.mrb[6].mxu0  ;;  %v944_v9 = vpop.f32.mrb[6].mxu1 }
  0xf5   : > { %1126 = vst [vmem:[%s2561_s6 + $0x10] sm:$0xff] %v742_v1  ;;  %v745_v7 = vadd.f32 %v2557_v51, %v744_v4  ;;  %v1871_v8 = vpop.f32.mrb[7].mxu0  ;;  %1176 = vst [vmem:[%s2561_s6 + $0x1a0] sm:$0xff] %v942_v5  ;;  %v945_v10 = vadd.f32 %v2557_v51, %v944_v9  ;;  %v1971_v11 = vpop.f32.mrb[7].mxu1 }
  0xf7   : > { %1127 = vst [vmem:[%s2561_s6 + $0x18] sm:$0xff] %v745_v7  ;;  %1177 = vst [vmem:[%s2561_s6 + $0x1a8] sm:$0xff] %v945_v10 }
  0xfa   : > { %v749_v12 = vpop.f32.mrb[8].mxu0  ;;  %v949_v15 = vpop.f32.mrb[8].mxu1 }
  0xfb   : > { %v750_v13 = vadd.f32 %v2557_v51, %v749_v12  ;;  %v1874_v14 = vpop.f32.mrb[9].mxu0  ;;  %v950_v17 = vadd.f32 %v2557_v51, %v949_v15  ;;  %v1974_v18 = vpop.f32.mrb[9].mxu1 }
  0xfc   : > { %v752_v16 = vpop.f32.mrb[10].mxu0  ;;  %v952_v21 = vpop.f32.mrb[10].mxu1 }
  0xfd   : > { %1128 = vst [vmem:[%s2561_s6 + $0x20] sm:$0xff] %v750_v13  ;;  %v753_v19 = vadd.f32 %v2557_v51, %v752_v16  ;;  %v1875_v20 = vpop.f32.mrb[11].mxu0  ;;  %1178 = vst [vmem:[%s2561_s6 + $0x1b0] sm:$0xff] %v950_v17  ;;  %v953_v22 = vadd.f32 %v2557_v51, %v952_v21  ;;  %v1975_v23 = vpop.f32.mrb[11].mxu1 }
  0xff   : > { %1129 = vst [vmem:[%s2561_s6 + $0x28] sm:$0xff] %v753_v19  ;;  %1179 = vst [vmem:[%s2561_s6 + $0x1b8] sm:$0xff] %v953_v22 }
 0x102   : > { %v757_v24 = vpop.f32.mrb[12].mxu0  ;;  %v957_v27 = vpop.f32.mrb[12].mxu1 }
 0x103   : > { %v758_v25 = vadd.f32 %v2557_v51, %v757_v24  ;;  %v1878_v26 = vpop.f32.mrb[13].mxu0  ;;  %v958_v29 = vadd.f32 %v2557_v51, %v957_v27  ;;  %v1978_v30 = vpop.f32.mrb[13].mxu1 }
 0x104   : > { %v760_v28 = vpop.f32.mrb[14].mxu0  ;;  %v960_v33 = vpop.f32.mrb[14].mxu1 }
 0x105   : > { %1130 = vst [vmem:[%s2561_s6 + $0x30] sm:$0xff] %v758_v25  ;;  %v761_v31 = vadd.f32 %v2557_v51, %v760_v28  ;;  %v1879_v32 = vpop.f32.mrb[15].mxu0  ;;  %1180 = vst [vmem:[%s2561_s6 + $0x1c0] sm:$0xff] %v958_v29  ;;  %v961_v34 = vadd.f32 %v2557_v51, %v960_v33  ;;  %v1979_v35 = vpop.f32.mrb[15].mxu1 }
 0x107   : > { %1131 = vst [vmem:[%s2561_s6 + $0x38] sm:$0xff] %v761_v31  ;;  %1181 = vst [vmem:[%s2561_s6 + $0x1c8] sm:$0xff] %v961_v34 }
 0x10a   : > { %v765_v36 = vpop.f32.mrb[16].mxu0  ;;  %v965_v39 = vpop.f32.mrb[16].mxu1 }
 0x10b   : > { %v766_v37 = vadd.f32 %v2557_v51, %v765_v36  ;;  %v1882_v38 = vpop.f32.mrb[17].mxu0  ;;  %v966_v41 = vadd.f32 %v2557_v51, %v965_v39  ;;  %v1982_v42 = vpop.f32.mrb[17].mxu1 }
 0x10c   : > { %v768_v40 = vpop.f32.mrb[18].mxu0  ;;  %v968_v45 = vpop.f32.mrb[18].mxu1 }
 0x10d   : > { %1132 = vst [vmem:[%s2561_s6 + $0x40] sm:$0xff] %v766_v37  ;;  %v769_v43 = vadd.f32 %v2557_v51, %v768_v40  ;;  %v1883_v44 = vpop.f32.mrb[19].mxu0  ;;  %1182 = vst [vmem:[%s2561_s6 + $0x1d0] sm:$0xff] %v966_v41  ;;  %v969_v46 = vadd.f32 %v2557_v51, %v968_v45  ;;  %v1983_v47 = vpop.f32.mrb[19].mxu1 }
 0x10f   : > { %1133 = vst [vmem:[%s2561_s6 + $0x48] sm:$0xff] %v769_v43  ;;  %1183 = vst [vmem:[%s2561_s6 + $0x1d8] sm:$0xff] %v969_v46 }
 0x112   : > { %v773_v48 = vpop.f32.mrb[20].mxu0  ;;  %v973_v52 = vpop.f32.mrb[20].mxu1 }
 0x113   : > { %v774_v49 = vadd.f32 %v2557_v51, %v773_v48  ;;  %v1886_v50 = vpop.f32.mrb[21].mxu0  ;;  %v974_v54 = vadd.f32 %v2557_v51, %v973_v52  ;;  %v1986_v55 = vpop.f32.mrb[21].mxu1 }
 0x114   : > { %v776_v53 = vpop.f32.mrb[22].mxu0  ;;  %v976_v58 = vpop.f32.mrb[22].mxu1 }
 0x115   : > { %1134 = vst [vmem:[%s2561_s6 + $0x50] sm:$0xff] %v774_v49  ;;  %v777_v56 = vadd.f32 %v2557_v51, %v776_v53  ;;  %v1887_v57 = vpop.f32.mrb[23].mxu0  ;;  %1184 = vst [vmem:[%s2561_s6 + $0x1e0] sm:$0xff] %v974_v54  ;;  %v977_v59 = vadd.f32 %v2557_v51, %v976_v58  ;;  %v1987_v60 = vpop.f32.mrb[23].mxu1 }
 0x117   : > { %1135 = vst [vmem:[%s2561_s6 + $0x58] sm:$0xff] %v777_v56  ;;  %1185 = vst [vmem:[%s2561_s6 + $0x1e8] sm:$0xff] %v977_v59 }
 0x11a   : > { %v781_v61 = vpop.f32.mrb[24].mxu0  ;;  %v981_v0 = vpop.f32.mrb[24].mxu1 }
 0x11b   : > { %v782_v62 = vadd.f32 %v2557_v51, %v781_v61  ;;  %v1890_v63 = vpop.f32.mrb[25].mxu0  ;;  %v982_v2 = vadd.f32 %v2557_v51, %v981_v0  ;;  %v1990_v3 = vpop.f32.mrb[25].mxu1 }
 0x11c   : > { %v784_v1 = vpop.f32.mrb[26].mxu0  ;;  %v984_v6 = vpop.f32.mrb[26].mxu1 }
 0x11d   : > { %1136 = vst [vmem:[%s2561_s6 + $0x60] sm:$0xff] %v782_v62  ;;  %v785_v4 = vadd.f32 %v2557_v51, %v784_v1  ;;  %v1891_v5 = vpop.f32.mrb[27].mxu0  ;;  %1186 = vst [vmem:[%s2561_s6 + $0x1f0] sm:$0xff] %v982_v2  ;;  %v985_v7 = vadd.f32 %v2557_v51, %v984_v6  ;;  %v1991_v8 = vpop.f32.mrb[27].mxu1 }
 0x11f   : > { %1137 = vst [vmem:[%s2561_s6 + $0x68] sm:$0xff] %v785_v4  ;;  %1187 = vst [vmem:[%s2561_s6 + $0x1f8] sm:$0xff] %v985_v7 }
 0x122   : > { %v789_v9 = vpop.f32.mrb[28].mxu0  ;;  %v989_v12 = vpop.f32.mrb[28].mxu1 }
 0x123   : > { %v790_v10 = vadd.f32 %v2557_v51, %v789_v9  ;;  %v1894_v11 = vpop.f32.mrb[29].mxu0  ;;  %v990_v14 = vadd.f32 %v2557_v51, %v989_v12  ;;  %v1994_v15 = vpop.f32.mrb[29].mxu1 }
 0x124   : > { %v792_v13 = vpop.f32.mrb[30].mxu0  ;;  %v992_v18 = vpop.f32.mrb[30].mxu1 }
 0x125   : > { %1138 = vst [vmem:[%s2561_s6 + $0x70] sm:$0xff] %v790_v10  ;;  %v793_v16 = vadd.f32 %v2557_v51, %v792_v13  ;;  %v1895_v17 = vpop.f32.mrb[31].mxu0  ;;  %1188 = vst [vmem:[%s2561_s6 + $0x200] sm:$0xff] %v990_v14  ;;  %v993_v19 = vadd.f32 %v2557_v51, %v992_v18  ;;  %v1995_v20 = vpop.f32.mrb[31].mxu1 }
 0x127   : > { %1139 = vst [vmem:[%s2561_s6 + $0x78] sm:$0xff] %v793_v16  ;;  %1189 = vst [vmem:[%s2561_s6 + $0x208] sm:$0xff] %v993_v19 }
 0x12a   : > { %v797_v21 = vpop.f32.mrb[32].mxu0  ;;  %v997_v24 = vpop.f32.mrb[32].mxu1 }
 0x12b   : > { %v798_v22 = vadd.f32 %v2557_v51, %v797_v21  ;;  %v1898_v23 = vpop.f32.mrb[33].mxu0  ;;  %v998_v26 = vadd.f32 %v2557_v51, %v997_v24  ;;  %v1998_v27 = vpop.f32.mrb[33].mxu1 }
 0x12c   : > { %v800_v25 = vpop.f32.mrb[34].mxu0  ;;  %v1000_v30 = vpop.f32.mrb[34].mxu1 }
 0x12d   : > { %1140 = vst [vmem:[%s2561_s6 + $0x80] sm:$0xff] %v798_v22  ;;  %v801_v28 = vadd.f32 %v2557_v51, %v800_v25  ;;  %v1899_v29 = vpop.f32.mrb[35].mxu0  ;;  %1190 = vst [vmem:[%s2561_s6 + $0x210] sm:$0xff] %v998_v26  ;;  %v1001_v31 = vadd.f32 %v2557_v51, %v1000_v30  ;;  %v1999_v32 = vpop.f32.mrb[35].mxu1 }
 0x12f   : > { %1141 = vst [vmem:[%s2561_s6 + $0x88] sm:$0xff] %v801_v28  ;;  %1191 = vst [vmem:[%s2561_s6 + $0x218] sm:$0xff] %v1001_v31 }
 0x132   : > { %v805_v33 = vpop.f32.mrb[36].mxu0  ;;  %v1005_v36 = vpop.f32.mrb[36].mxu1 }
 0x133   : > { %v806_v34 = vadd.f32 %v2557_v51, %v805_v33  ;;  %v1902_v35 = vpop.f32.mrb[37].mxu0  ;;  %v1006_v38 = vadd.f32 %v2557_v51, %v1005_v36  ;;  %v2002_v39 = vpop.f32.mrb[37].mxu1 }
 0x134   : > { %v808_v37 = vpop.f32.mrb[38].mxu0  ;;  %v1008_v42 = vpop.f32.mrb[38].mxu1 }
 0x135   : > { %1142 = vst [vmem:[%s2561_s6 + $0x90] sm:$0xff] %v806_v34  ;;  %v809_v40 = vadd.f32 %v2557_v51, %v808_v37  ;;  %v1903_v41 = vpop.f32.mrb[39].mxu0  ;;  %1192 = vst [vmem:[%s2561_s6 + $0x220] sm:$0xff] %v1006_v38  ;;  %v1009_v43 = vadd.f32 %v2557_v51, %v1008_v42  ;;  %v2003_v44 = vpop.f32.mrb[39].mxu1 }
 0x137   : > { %1143 = vst [vmem:[%s2561_s6 + $0x98] sm:$0xff] %v809_v40  ;;  %1193 = vst [vmem:[%s2561_s6 + $0x228] sm:$0xff] %v1009_v43 }
 0x13a   : > { %v813_v45 = vpop.f32.mrb[40].mxu0  ;;  %v1013_v48 = vpop.f32.mrb[40].mxu1 }
 0x13b   : > { %v814_v46 = vadd.f32 %v2557_v51, %v813_v45  ;;  %v1906_v47 = vpop.f32.mrb[41].mxu0  ;;  %v1014_v50 = vadd.f32 %v2557_v51, %v1013_v48  ;;  %v2006_v52 = vpop.f32.mrb[41].mxu1 }
 0x13c   : > { %v816_v49 = vpop.f32.mrb[42].mxu0  ;;  %v1016_v55 = vpop.f32.mrb[42].mxu1 }
 0x13d   : > { %1144 = vst [vmem:[%s2561_s6 + $0xa0] sm:$0xff] %v814_v46  ;;  %v817_v53 = vadd.f32 %v2557_v51, %v816_v49  ;;  %v1907_v54 = vpop.f32.mrb[43].mxu0  ;;  %1194 = vst [vmem:[%s2561_s6 + $0x230] sm:$0xff] %v1014_v50  ;;  %v1017_v56 = vadd.f32 %v2557_v51, %v1016_v55  ;;  %v2007_v57 = vpop.f32.mrb[43].mxu1 }
 0x13f   : > { %1145 = vst [vmem:[%s2561_s6 + $0xa8] sm:$0xff] %v817_v53  ;;  %1195 = vst [vmem:[%s2561_s6 + $0x238] sm:$0xff] %v1017_v56 }
 0x142   : > { %v821_v58 = vpop.f32.mrb[44].mxu0  ;;  %v1021_v61 = vpop.f32.mrb[44].mxu1 }
 0x143   : > { %v822_v59 = vadd.f32 %v2557_v51, %v821_v58  ;;  %v1910_v60 = vpop.f32.mrb[45].mxu0  ;;  %v1022_v63 = vadd.f32 %v2557_v51, %v1021_v61  ;;  %v2010_v0 = vpop.f32.mrb[45].mxu1 }
 0x144   : > { %v824_v62 = vpop.f32.mrb[46].mxu0  ;;  %v1024_v3 = vpop.f32.mrb[46].mxu1 }
 0x145   : > { %1146 = vst [vmem:[%s2561_s6 + $0xb0] sm:$0xff] %v822_v59  ;;  %v825_v1 = vadd.f32 %v2557_v51, %v824_v62  ;;  %v1911_v2 = vpop.f32.mrb[47].mxu0  ;;  %1196 = vst [vmem:[%s2561_s6 + $0x240] sm:$0xff] %v1022_v63  ;;  %v1025_v4 = vadd.f32 %v2557_v51, %v1024_v3  ;;  %v2011_v5 = vpop.f32.mrb[47].mxu1 }
 0x147   : > { %1147 = vst [vmem:[%s2561_s6 + $0xb8] sm:$0xff] %v825_v1  ;;  %1197 = vst [vmem:[%s2561_s6 + $0x248] sm:$0xff] %v1025_v4 }
 0x14a   : > { %v829_v6 = vpop.f32.mrb[48].mxu0  ;;  %v1029_v9 = vpop.f32.mrb[48].mxu1 }
 0x14b   : > { %v830_v7 = vadd.f32 %v2557_v51, %v829_v6  ;;  %v1914_v8 = vpop.f32.mrb[49].mxu0  ;;  %v1030_v11 = vadd.f32 %v2557_v51, %v1029_v9  ;;  %v2014_v12 = vpop.f32.mrb[49].mxu1 }
 0x14c   : > { %v832_v10 = vpop.f32.mrb[50].mxu0  ;;  %v1032_v15 = vpop.f32.mrb[50].mxu1 }
 0x14d   : > { %1148 = vst [vmem:[%s2561_s6 + $0xc0] sm:$0xff] %v830_v7  ;;  %v833_v13 = vadd.f32 %v2557_v51, %v832_v10  ;;  %v1915_v14 = vpop.f32.mrb[51].mxu0  ;;  %1198 = vst [vmem:[%s2561_s6 + $0x250] sm:$0xff] %v1030_v11  ;;  %v1033_v16 = vadd.f32 %v2557_v51, %v1032_v15  ;;  %v2015_v17 = vpop.f32.mrb[51].mxu1 }
 0x14f   : > { %1149 = vst [vmem:[%s2561_s6 + $0xc8] sm:$0xff] %v833_v13  ;;  %1199 = vst [vmem:[%s2561_s6 + $0x258] sm:$0xff] %v1033_v16 }
 0x152   : > { %v837_v18 = vpop.f32.mrb[52].mxu0  ;;  %v1037_v21 = vpop.f32.mrb[52].mxu1 }
 0x153   : > { %v838_v19 = vadd.f32 %v2557_v51, %v837_v18  ;;  %v1918_v20 = vpop.f32.mrb[53].mxu0  ;;  %v1038_v23 = vadd.f32 %v2557_v51, %v1037_v21  ;;  %v2018_v24 = vpop.f32.mrb[53].mxu1 }
 0x154   : > { %v840_v22 = vpop.f32.mrb[54].mxu0  ;;  %v1040_v27 = vpop.f32.mrb[54].mxu1 }
 0x155   : > { %1150 = vst [vmem:[%s2561_s6 + $0xd0] sm:$0xff] %v838_v19  ;;  %v841_v25 = vadd.f32 %v2557_v51, %v840_v22  ;;  %v1919_v26 = vpop.f32.mrb[55].mxu0  ;;  %1200 = vst [vmem:[%s2561_s6 + $0x260] sm:$0xff] %v1038_v23  ;;  %v1041_v28 = vadd.f32 %v2557_v51, %v1040_v27  ;;  %v2019_v29 = vpop.f32.mrb[55].mxu1 }
 0x157   : > { %1151 = vst [vmem:[%s2561_s6 + $0xd8] sm:$0xff] %v841_v25  ;;  %1201 = vst [vmem:[%s2561_s6 + $0x268] sm:$0xff] %v1041_v28 }
 0x15a   : > { %v845_v30 = vpop.f32.mrb[56].mxu0  ;;  %v1045_v33 = vpop.f32.mrb[56].mxu1 }
 0x15b   : > { %v846_v31 = vadd.f32 %v2557_v51, %v845_v30  ;;  %v1922_v32 = vpop.f32.mrb[57].mxu0  ;;  %v1046_v35 = vadd.f32 %v2557_v51, %v1045_v33  ;;  %v2022_v36 = vpop.f32.mrb[57].mxu1 }
 0x15c   : > { %v848_v34 = vpop.f32.mrb[58].mxu0  ;;  %v1048_v39 = vpop.f32.mrb[58].mxu1 }
 0x15d   : > { %1152 = vst [vmem:[%s2561_s6 + $0xe0] sm:$0xff] %v846_v31  ;;  %v849_v37 = vadd.f32 %v2557_v51, %v848_v34  ;;  %v1923_v38 = vpop.f32.mrb[59].mxu0  ;;  %1202 = vst [vmem:[%s2561_s6 + $0x270] sm:$0xff] %v1046_v35  ;;  %v1049_v40 = vadd.f32 %v2557_v51, %v1048_v39  ;;  %v2023_v41 = vpop.f32.mrb[59].mxu1 }
 0x15f   : > { %1153 = vst [vmem:[%s2561_s6 + $0xe8] sm:$0xff] %v849_v37  ;;  %1203 = vst [vmem:[%s2561_s6 + $0x278] sm:$0xff] %v1049_v40 }
 0x162   : > { %v853_v42 = vpop.f32.mrb[60].mxu0  ;;  %v1053_v45 = vpop.f32.mrb[60].mxu1 }
 0x163   : > { %v854_v43 = vadd.f32 %v2557_v51, %v853_v42  ;;  %v1926_v44 = vpop.f32.mrb[61].mxu0  ;;  %v1054_v47 = vadd.f32 %v2557_v51, %v1053_v45  ;;  %v2026_v48 = vpop.f32.mrb[61].mxu1 }
 0x164   : > { %v856_v46 = vpop.f32.mrb[62].mxu0  ;;  %v1056_v52 = vpop.f32.mrb[62].mxu1 }
 0x165   : > { %1154 = vst [vmem:[%s2561_s6 + $0xf0] sm:$0xff] %v854_v43  ;;  %v857_v49 = vadd.f32 %v2557_v51, %v856_v46  ;;  %v1927_v50 = vpop.f32.mrb[63].mxu0  ;;  %1204 = vst [vmem:[%s2561_s6 + $0x280] sm:$0xff] %v1054_v47  ;;  %v1057_v53 = vadd.f32 %v2557_v51, %v1056_v52  ;;  %v2027_v54 = vpop.f32.mrb[63].mxu1 }
 0x167   : > { %1155 = vst [vmem:[%s2561_s6 + $0xf8] sm:$0xff] %v857_v49  ;;  %1205 = vst [vmem:[%s2561_s6 + $0x288] sm:$0xff] %v1057_v53 }
 0x16a   : > { %v861_v55 = vpop.f32.mrb[64].mxu0  ;;  %v1061_v58 = vpop.f32.mrb[64].mxu1 }
 0x16b   : > { %v862_v56 = vadd.f32 %v2557_v51, %v861_v55  ;;  %v1930_v57 = vpop.f32.mrb[65].mxu0  ;;  %v1062_v60 = vadd.f32 %v2557_v51, %v1061_v58  ;;  %v2030_v61 = vpop.f32.mrb[65].mxu1 }
 0x16c   : > { %v864_v59 = vpop.f32.mrb[66].mxu0  ;;  %v1064_v0 = vpop.f32.mrb[66].mxu1 }
 0x16d   : > { %1156 = vst [vmem:[%s2561_s6 + $0x100] sm:$0xff] %v862_v56  ;;  %v865_v62 = vadd.f32 %v2557_v51, %v864_v59  ;;  %v1931_v63 = vpop.f32.mrb[67].mxu0  ;;  %1206 = vst [vmem:[%s2561_s6 + $0x290] sm:$0xff] %v1062_v60  ;;  %v1065_v1 = vadd.f32 %v2557_v51, %v1064_v0  ;;  %v2031_v2 = vpop.f32.mrb[67].mxu1 }
 0x16f   : > { %1157 = vst [vmem:[%s2561_s6 + $0x108] sm:$0xff] %v865_v62  ;;  %1207 = vst [vmem:[%s2561_s6 + $0x298] sm:$0xff] %v1065_v1 }
 0x172   : > { %v869_v3 = vpop.f32.mrb[68].mxu0  ;;  %v1069_v6 = vpop.f32.mrb[68].mxu1 }
 0x173   : > { %v870_v4 = vadd.f32 %v2557_v51, %v869_v3  ;;  %v1934_v5 = vpop.f32.mrb[69].mxu0  ;;  %v1070_v8 = vadd.f32 %v2557_v51, %v1069_v6  ;;  %v2034_v9 = vpop.f32.mrb[69].mxu1 }
 0x174   : > { %v872_v7 = vpop.f32.mrb[70].mxu0  ;;  %v1072_v12 = vpop.f32.mrb[70].mxu1 }
 0x175   : > { %1158 = vst [vmem:[%s2561_s6 + $0x110] sm:$0xff] %v870_v4  ;;  %v873_v10 = vadd.f32 %v2557_v51, %v872_v7  ;;  %v1935_v11 = vpop.f32.mrb[71].mxu0  ;;  %1208 = vst [vmem:[%s2561_s6 + $0x2a0] sm:$0xff] %v1070_v8  ;;  %v1073_v13 = vadd.f32 %v2557_v51, %v1072_v12  ;;  %v2035_v14 = vpop.f32.mrb[71].mxu1 }
 0x177   : > { %1159 = vst [vmem:[%s2561_s6 + $0x118] sm:$0xff] %v873_v10  ;;  %1209 = vst [vmem:[%s2561_s6 + $0x2a8] sm:$0xff] %v1073_v13 }
 0x17a   : > { %v877_v15 = vpop.f32.mrb[72].mxu0  ;;  %v1077_v18 = vpop.f32.mrb[72].mxu1 }
 0x17b   : > { %v878_v16 = vadd.f32 %v2557_v51, %v877_v15  ;;  %v1938_v17 = vpop.f32.mrb[73].mxu0  ;;  %v1078_v20 = vadd.f32 %v2557_v51, %v1077_v18  ;;  %v2038_v21 = vpop.f32.mrb[73].mxu1 }
 0x17c   : > { %v880_v19 = vpop.f32.mrb[74].mxu0  ;;  %v1080_v24 = vpop.f32.mrb[74].mxu1 }
 0x17d   : > { %1160 = vst [vmem:[%s2561_s6 + $0x120] sm:$0xff] %v878_v16  ;;  %v881_v22 = vadd.f32 %v2557_v51, %v880_v19  ;;  %v1939_v23 = vpop.f32.mrb[75].mxu0  ;;  %1210 = vst [vmem:[%s2561_s6 + $0x2b0] sm:$0xff] %v1078_v20  ;;  %v1081_v25 = vadd.f32 %v2557_v51, %v1080_v24  ;;  %v2039_v26 = vpop.f32.mrb[75].mxu1 }
 0x17f   : > { %1161 = vst [vmem:[%s2561_s6 + $0x128] sm:$0xff] %v881_v22  ;;  %1211 = vst [vmem:[%s2561_s6 + $0x2b8] sm:$0xff] %v1081_v25 }
 0x182   : > { %v885_v27 = vpop.f32.mrb[76].mxu0  ;;  %v1085_v30 = vpop.f32.mrb[76].mxu1 }
 0x183   : > { %v886_v28 = vadd.f32 %v2557_v51, %v885_v27  ;;  %v1942_v29 = vpop.f32.mrb[77].mxu0  ;;  %v1086_v32 = vadd.f32 %v2557_v51, %v1085_v30  ;;  %v2042_v33 = vpop.f32.mrb[77].mxu1 }
 0x184   : > { %v888_v31 = vpop.f32.mrb[78].mxu0  ;;  %v1088_v36 = vpop.f32.mrb[78].mxu1 }
 0x185   : > { %1162 = vst [vmem:[%s2561_s6 + $0x130] sm:$0xff] %v886_v28  ;;  %v889_v34 = vadd.f32 %v2557_v51, %v888_v31  ;;  %v1943_v35 = vpop.f32.mrb[79].mxu0  ;;  %1212 = vst [vmem:[%s2561_s6 + $0x2c0] sm:$0xff] %v1086_v32  ;;  %v1089_v37 = vadd.f32 %v2557_v51, %v1088_v36  ;;  %v2043_v38 = vpop.f32.mrb[79].mxu1 }
 0x187   : > { %1163 = vst [vmem:[%s2561_s6 + $0x138] sm:$0xff] %v889_v34  ;;  %1213 = vst [vmem:[%s2561_s6 + $0x2c8] sm:$0xff] %v1089_v37 }
 0x18a   : > { %v893_v39 = vpop.f32.mrb[80].mxu0  ;;  %v1093_v42 = vpop.f32.mrb[80].mxu1 }
 0x18b   : > { %v894_v40 = vadd.f32 %v2557_v51, %v893_v39  ;;  %v1946_v41 = vpop.f32.mrb[81].mxu0  ;;  %v1094_v44 = vadd.f32 %v2557_v51, %v1093_v42  ;;  %v2046_v45 = vpop.f32.mrb[81].mxu1 }
 0x18c   : > { %v896_v43 = vpop.f32.mrb[82].mxu0  ;;  %v1096_v48 = vpop.f32.mrb[82].mxu1 }
 0x18d   : > { %1164 = vst [vmem:[%s2561_s6 + $0x140] sm:$0xff] %v894_v40  ;;  %v897_v46 = vadd.f32 %v2557_v51, %v896_v43  ;;  %v1947_v47 = vpop.f32.mrb[83].mxu0  ;;  %1214 = vst [vmem:[%s2561_s6 + $0x2d0] sm:$0xff] %v1094_v44  ;;  %v1097_v49 = vadd.f32 %v2557_v51, %v1096_v48  ;;  %v2047_v50 = vpop.f32.mrb[83].mxu1 }
 0x18f   : > { %1165 = vst [vmem:[%s2561_s6 + $0x148] sm:$0xff] %v897_v46  ;;  %1215 = vst [vmem:[%s2561_s6 + $0x2d8] sm:$0xff] %v1097_v49 }
 0x192   : > { %v901_v52 = vpop.f32.mrb[84].mxu0  ;;  %v1101_v55 = vpop.f32.mrb[84].mxu1 }
 0x193   : > { %v902_v53 = vadd.f32 %v2557_v51, %v901_v52  ;;  %v1950_v54 = vpop.f32.mrb[85].mxu0  ;;  %v1102_v57 = vadd.f32 %v2557_v51, %v1101_v55  ;;  %v2050_v58 = vpop.f32.mrb[85].mxu1 }
 0x194   : > { %v904_v56 = vpop.f32.mrb[86].mxu0  ;;  %v1104_v61 = vpop.f32.mrb[86].mxu1 }
 0x195   : > { %1166 = vst [vmem:[%s2561_s6 + $0x150] sm:$0xff] %v902_v53  ;;  %v905_v59 = vadd.f32 %v2557_v51, %v904_v56  ;;  %v1951_v60 = vpop.f32.mrb[87].mxu0  ;;  %1216 = vst [vmem:[%s2561_s6 + $0x2e0] sm:$0xff] %v1102_v57  ;;  %v1105_v62 = vadd.f32 %v2557_v51, %v1104_v61  ;;  %v2051_v63 = vpop.f32.mrb[87].mxu1 }
 0x197   : > { %1167 = vst [vmem:[%s2561_s6 + $0x158] sm:$0xff] %v905_v59  ;;  %1217 = vst [vmem:[%s2561_s6 + $0x2e8] sm:$0xff] %v1105_v62 }
 0x19a   : > { %v909_v0 = vpop.f32.mrb[88].mxu0  ;;  %v1109_v3 = vpop.f32.mrb[88].mxu1 }
 0x19b   : > { %v910_v1 = vadd.f32 %v2557_v51, %v909_v0  ;;  %v1954_v2 = vpop.f32.mrb[89].mxu0  ;;  %v1110_v5 = vadd.f32 %v2557_v51, %v1109_v3  ;;  %v2054_v6 = vpop.f32.mrb[89].mxu1 }
 0x19c   : > { %v912_v4 = vpop.f32.mrb[90].mxu0  ;;  %v1112_v9 = vpop.f32.mrb[90].mxu1 }
 0x19d   : > { %1168 = vst [vmem:[%s2561_s6 + $0x160] sm:$0xff] %v910_v1  ;;  %v913_v7 = vadd.f32 %v2557_v51, %v912_v4  ;;  %v1955_v8 = vpop.f32.mrb[91].mxu0  ;;  %1218 = vst [vmem:[%s2561_s6 + $0x2f0] sm:$0xff] %v1110_v5  ;;  %v1113_v10 = vadd.f32 %v2557_v51, %v1112_v9  ;;  %v2055_v11 = vpop.f32.mrb[91].mxu1 }
 0x19f   : > { %1169 = vst [vmem:[%s2561_s6 + $0x168] sm:$0xff] %v913_v7  ;;  %1219 = vst [vmem:[%s2561_s6 + $0x2f8] sm:$0xff] %v1113_v10 }
 0x1a2   : > { %v917_v12 = vpop.f32.mrb[92].mxu0  ;;  %v1117_v15 = vpop.f32.mrb[92].mxu1 }
 0x1a3   : > { %v918_v13 = vadd.f32 %v2557_v51, %v917_v12  ;;  %v1958_v14 = vpop.f32.mrb[93].mxu0  ;;  %v1118_v17 = vadd.f32 %v2557_v51, %v1117_v15  ;;  %v2058_v18 = vpop.f32.mrb[93].mxu1 }
 0x1a4   : > { %v920_v16 = vpop.f32.mrb[94].mxu0  ;;  %v1120_v21 = vpop.f32.mrb[94].mxu1 }
 0x1a5   : > { %1170 = vst [vmem:[%s2561_s6 + $0x170] sm:$0xff] %v918_v13  ;;  %v921_v19 = vadd.f32 %v2557_v51, %v920_v16  ;;  %v1959_v20 = vpop.f32.mrb[95].mxu0  ;;  %1220 = vst [vmem:[%s2561_s6 + $0x300] sm:$0xff] %v1118_v17  ;;  %v1121_v22 = vadd.f32 %v2557_v51, %v1120_v21  ;;  %v2059_v23 = vpop.f32.mrb[95].mxu1 }
 0x1a7   : > { %1171 = vst [vmem:[%s2561_s6 + $0x178] sm:$0xff] %v921_v19  ;;  %1221 = vst [vmem:[%s2561_s6 + $0x308] sm:$0xff] %v1121_v22 }
 0x1a9   : > { %1228 = sbr.rel (!%p2338_p4) target bundleno = 504 (0x1f8), region = 36 }
 0x1aa   : > { %v925_v24 = vpop.f32.mrb[96].mxu0 }
 0x1ab   : > { %v926_v25 = vadd.f32 %v2557_v51, %v925_v24  ;;  %v1962_v26 = vpop.f32.mrb[97].mxu0 }
 0x1ac   : > { %v928_v27 = vpop.f32.mrb[98].mxu0 }
 0x1ad   : > { %1172 = vst [vmem:[%s2561_s6 + $0x180] sm:$0xff] %v926_v25  ;;  %v929_v28 = vadd.f32 %v2557_v51, %v928_v27  ;;  %v1963_v29 = vpop.f32.mrb[99].mxu0 }
 0x1af   : > { %1173 = vst [vmem:[%s2561_s6 + $0x188] sm:$0xff] %v929_v28 }
 0x1b0   : > { %s2977_s7 = smov (!%p1231_p8, %s1230_s7), 98 }
 0x1b1   : > { %s1794_s12 = sshll.u32 %s2977_s7, 7 }
 0x1b2   : > { %p1797_p9 = scmp.eq.s32.totalorder %s1794_s12, 0 }
 0x1b3   : > { %s2770_s14 = sshrl.u32 (!%p1797_p9), %s2977_s7, 6 }
 0x1b4   : > { %1239 = sbr.rel (%p1797_p9) target bundleno = 504 (0x1f8), region = 40  ;;  %p1798_p10 = scmp.le.s32.totalorder (!%p1797_p9), %s2770_s14, 0 }
 0x1bb   : > { %1645 = sbr.rel (%p1798_p10) target bundleno = 483 (0x1e3), region = 116  ;;  %s2968_s15 = smov (!%p1798_p10), %s2764_s11 }
 0x1bc   : > { %s2969_s17 = smov (!%p1798_p10), %s2561_s6  ;;  %s2779_s18 = smov (!%p1798_p10), 0  }
 0x1bd   : > { %s2781_s20 = smov (!%p1798_p10), 0  }
 0x1c2 LB: >> { %v1427_v51 = vld [vmem:[%s2265_s17] sm:$0xff]  ;;  %v1429_v30 = vld [vmem:[%s2265_s17 + $0x8] sm:$0xff]  ;;  %v1431_v31 = vld [vmem:[%s2265_s17 + $0x10] sm:$0xff]  ;;  %s1555_s21 = sadd.s32 1, %s2269_s18  ;;  %s1421_s20 = sadd.s32 1, %s2273_s20   ;;  %s2273_s20 = sphi %s2781_s20, %s1421_s20   ;;  %s2269_s18 = sphi %s2779_s18, %s2972_s18   ;;  %s2265_s17 = sphi %s2969_s17, %s2971_s17   ;;  %s2261_s15 = sphi %s2968_s15, %s2970_s15  }
 0x1c3   : >> { %1428 = vst [vmem:[%s2261_s15] sm:$0xff] %v1427_v51  ;;  %1430 = vst [vmem:[%s2261_s15 + $0x8] sm:$0xff] %v1429_v30  ;;  %v1433_v32 = vld [vmem:[%s2265_s17 + $0x18] sm:$0xff]  ;;  %v1435_v33 = vld [vmem:[%s2265_s17 + $0x20] sm:$0xff]  ;;  %p1556_p11 = scmp.ge.s32.totalorder %s1555_s21, %s2770_s14  ;;  %p1420_p12 = scmp.ge.s32.totalorder %s1421_s20, %s2770_s14 }
 0x1c4   : >> { %1432 = vst [vmem:[%s2261_s15 + $0x10] sm:$0xff] %v1431_v31  ;;  %v1437_v34 = vld [vmem:[%s2265_s17 + $0x28] sm:$0xff]  ;;  %1434 = vst [vmem:[%s2261_s15 + $0x18] sm:$0xff] %v1433_v32  ;;  %v1439_v35 = vld [vmem:[%s2265_s17 + $0x30] sm:$0xff] }
 0x1c5   : >> { %1436 = vst [vmem:[%s2261_s15 + $0x20] sm:$0xff] %v1435_v33  ;;  %1438 = vst [vmem:[%s2261_s15 + $0x28] sm:$0xff] %v1437_v34  ;;  %v1441_v36 = vld [vmem:[%s2265_s17 + $0x38] sm:$0xff]  ;;  %v1443_v37 = vld [vmem:[%s2265_s17 + $0x40] sm:$0xff]  ;;  %s2979_s21 = smov (%p1556_p11, %s1555_s21), 0 }
 0x1c6   : >> { %1440 = vst [vmem:[%s2261_s15 + $0x30] sm:$0xff] %v1439_v35  ;;  %1442 = vst [vmem:[%s2261_s15 + $0x38] sm:$0xff] %v1441_v36  ;;  %v1445_v38 = vld [vmem:[%s2265_s17 + $0x48] sm:$0xff]  ;;  %v1447_v39 = vld [vmem:[%s2265_s17 + $0x50] sm:$0xff]  ;;  %s1799_s22 = sshll.u32 %s2979_s21, 9  ;;  %s2972_s18 = smov %s2979_s21 }
 0x1c7   : >> { %1444 = vst [vmem:[%s2261_s15 + $0x40] sm:$0xff] %v1443_v37  ;;  %v1449_v40 = vld [vmem:[%s2265_s17 + $0x58] sm:$0xff]  ;;  %1446 = vst [vmem:[%s2261_s15 + $0x48] sm:$0xff] %v1445_v38  ;;  %v1451_v41 = vld [vmem:[%s2265_s17 + $0x60] sm:$0xff]  ;;  %s2837_s23 = scalar_lea.vmem %s2561_s6, %s1799_s22 [#allocation2]   ;;  %s2840_s24 = scalar_lea.vmem %s2764_s11, %s1799_s22  }
 0x1c8   : >> { %1448 = vst [vmem:[%s2261_s15 + $0x50] sm:$0xff] %v1447_v39  ;;  %1450 = vst [vmem:[%s2261_s15 + $0x58] sm:$0xff] %v1449_v40  ;;  %v1453_v42 = vld [vmem:[%s2265_s17 + $0x68] sm:$0xff]  ;;  %v1455_v43 = vld [vmem:[%s2265_s17 + $0x70] sm:$0xff] }
 0x1c9   : >> { %1452 = vst [vmem:[%s2261_s15 + $0x60] sm:$0xff] %v1451_v41  ;;  %1454 = vst [vmem:[%s2261_s15 + $0x68] sm:$0xff] %v1453_v42  ;;  %v1457_v44 = vld [vmem:[%s2265_s17 + $0x78] sm:$0xff]  ;;  %v1459_v45 = vld [vmem:[%s2265_s17 + $0x80] sm:$0xff] }
 0x1ca   : >> { %1456 = vst [vmem:[%s2261_s15 + $0x70] sm:$0xff] %v1455_v43  ;;  %v1461_v46 = vld [vmem:[%s2265_s17 + $0x88] sm:$0xff]  ;;  %1458 = vst [vmem:[%s2261_s15 + $0x78] sm:$0xff] %v1457_v44  ;;  %v1463_v47 = vld [vmem:[%s2265_s17 + $0x90] sm:$0xff] }
 0x1cb   : >> { %1460 = vst [vmem:[%s2261_s15 + $0x80] sm:$0xff] %v1459_v45  ;;  %1462 = vst [vmem:[%s2261_s15 + $0x88] sm:$0xff] %v1461_v46  ;;  %v1465_v48 = vld [vmem:[%s2265_s17 + $0x98] sm:$0xff]  ;;  %v1467_v49 = vld [vmem:[%s2265_s17 + $0xa0] sm:$0xff] }
 0x1cc   : >> { %1464 = vst [vmem:[%s2261_s15 + $0x90] sm:$0xff] %v1463_v47  ;;  %1466 = vst [vmem:[%s2261_s15 + $0x98] sm:$0xff] %v1465_v48  ;;  %v1469_v50 = vld [vmem:[%s2265_s17 + $0xa8] sm:$0xff]  ;;  %v1471_v52 = vld [vmem:[%s2265_s17 + $0xb0] sm:$0xff] }
 0x1cd   : >> { %1468 = vst [vmem:[%s2261_s15 + $0xa0] sm:$0xff] %v1467_v49  ;;  %v1473_v53 = vld [vmem:[%s2265_s17 + $0xb8] sm:$0xff]  ;;  %1470 = vst [vmem:[%s2261_s15 + $0xa8] sm:$0xff] %v1469_v50  ;;  %v1475_v54 = vld [vmem:[%s2265_s17 + $0xc0] sm:$0xff] }
 0x1ce   : >> { %1472 = vst [vmem:[%s2261_s15 + $0xb0] sm:$0xff] %v1471_v52  ;;  %1474 = vst [vmem:[%s2261_s15 + $0xb8] sm:$0xff] %v1473_v53  ;;  %v1477_v55 = vld [vmem:[%s2265_s17 + $0xc8] sm:$0xff]  ;;  %v1479_v56 = vld [vmem:[%s2265_s17 + $0xd0] sm:$0xff] }
 0x1cf   : >> { %1476 = vst [vmem:[%s2261_s15 + $0xc0] sm:$0xff] %v1475_v54  ;;  %1478 = vst [vmem:[%s2261_s15 + $0xc8] sm:$0xff] %v1477_v55  ;;  %v1481_v57 = vld [vmem:[%s2265_s17 + $0xd8] sm:$0xff]  ;;  %v1483_v58 = vld [vmem:[%s2265_s17 + $0xe0] sm:$0xff] }
 0x1d0   : >> { %1480 = vst [vmem:[%s2261_s15 + $0xd0] sm:$0xff] %v1479_v56  ;;  %v1485_v59 = vld [vmem:[%s2265_s17 + $0xe8] sm:$0xff]  ;;  %1482 = vst [vmem:[%s2261_s15 + $0xd8] sm:$0xff] %v1481_v57  ;;  %v1487_v60 = vld [vmem:[%s2265_s17 + $0xf0] sm:$0xff] }
 0x1d1   : >> { %1484 = vst [vmem:[%s2261_s15 + $0xe0] sm:$0xff] %v1483_v58  ;;  %1486 = vst [vmem:[%s2261_s15 + $0xe8] sm:$0xff] %v1485_v59  ;;  %v1489_v61 = vld [vmem:[%s2265_s17 + $0xf8] sm:$0xff]  ;;  %v1491_v62 = vld [vmem:[%s2265_s17 + $0x100] sm:$0xff] }
 0x1d2   : >> { %1488 = vst [vmem:[%s2261_s15 + $0xf0] sm:$0xff] %v1487_v60  ;;  %1490 = vst [vmem:[%s2261_s15 + $0xf8] sm:$0xff] %v1489_v61  ;;  %v1493_v63 = vld [vmem:[%s2265_s17 + $0x108] sm:$0xff]  ;;  %v1495_v0 = vld [vmem:[%s2265_s17 + $0x110] sm:$0xff] }
 0x1d3   : >> { %1492 = vst [vmem:[%s2261_s15 + $0x100] sm:$0xff] %v1491_v62  ;;  %v1497_v1 = vld [vmem:[%s2265_s17 + $0x118] sm:$0xff]  ;;  %1494 = vst [vmem:[%s2261_s15 + $0x108] sm:$0xff] %v1493_v63  ;;  %v1499_v2 = vld [vmem:[%s2265_s17 + $0x120] sm:$0xff] }
 0x1d4   : >> { %1496 = vst [vmem:[%s2261_s15 + $0x110] sm:$0xff] %v1495_v0  ;;  %1498 = vst [vmem:[%s2261_s15 + $0x118] sm:$0xff] %v1497_v1  ;;  %v1501_v3 = vld [vmem:[%s2265_s17 + $0x128] sm:$0xff]  ;;  %v1503_v4 = vld [vmem:[%s2265_s17 + $0x130] sm:$0xff] }
 0x1d5   : >> { %1500 = vst [vmem:[%s2261_s15 + $0x120] sm:$0xff] %v1499_v2  ;;  %1502 = vst [vmem:[%s2261_s15 + $0x128] sm:$0xff] %v1501_v3  ;;  %v1505_v5 = vld [vmem:[%s2265_s17 + $0x138] sm:$0xff]  ;;  %v1507_v6 = vld [vmem:[%s2265_s17 + $0x140] sm:$0xff] }
 0x1d6   : >> { %1504 = vst [vmem:[%s2261_s15 + $0x130] sm:$0xff] %v1503_v4  ;;  %v1509_v7 = vld [vmem:[%s2265_s17 + $0x148] sm:$0xff]  ;;  %1506 = vst [vmem:[%s2261_s15 + $0x138] sm:$0xff] %v1505_v5  ;;  %v1511_v8 = vld [vmem:[%s2265_s17 + $0x150] sm:$0xff] }
 0x1d7   : >> { %1508 = vst [vmem:[%s2261_s15 + $0x140] sm:$0xff] %v1507_v6  ;;  %1510 = vst [vmem:[%s2261_s15 + $0x148] sm:$0xff] %v1509_v7  ;;  %v1513_v9 = vld [vmem:[%s2265_s17 + $0x158] sm:$0xff]  ;;  %v1515_v10 = vld [vmem:[%s2265_s17 + $0x160] sm:$0xff] }
 0x1d8   : >> { %1512 = vst [vmem:[%s2261_s15 + $0x150] sm:$0xff] %v1511_v8  ;;  %1514 = vst [vmem:[%s2261_s15 + $0x158] sm:$0xff] %v1513_v9  ;;  %v1517_v11 = vld [vmem:[%s2265_s17 + $0x168] sm:$0xff]  ;;  %v1519_v12 = vld [vmem:[%s2265_s17 + $0x170] sm:$0xff] }
 0x1d9   : >> { %1516 = vst [vmem:[%s2261_s15 + $0x160] sm:$0xff] %v1515_v10  ;;  %v1521_v13 = vld [vmem:[%s2265_s17 + $0x178] sm:$0xff]  ;;  %1518 = vst [vmem:[%s2261_s15 + $0x168] sm:$0xff] %v1517_v11  ;;  %v1523_v14 = vld [vmem:[%s2265_s17 + $0x180] sm:$0xff] }
 0x1da   : >> { %1520 = vst [vmem:[%s2261_s15 + $0x170] sm:$0xff] %v1519_v12  ;;  %1522 = vst [vmem:[%s2261_s15 + $0x178] sm:$0xff] %v1521_v13  ;;  %v1525_v15 = vld [vmem:[%s2265_s17 + $0x188] sm:$0xff]  ;;  %v1527_v16 = vld [vmem:[%s2265_s17 + $0x190] sm:$0xff] }
 0x1db   : >> { %1524 = vst [vmem:[%s2261_s15 + $0x180] sm:$0xff] %v1523_v14  ;;  %1526 = vst [vmem:[%s2261_s15 + $0x188] sm:$0xff] %v1525_v15  ;;  %v1529_v17 = vld [vmem:[%s2265_s17 + $0x198] sm:$0xff]  ;;  %v1531_v18 = vld [vmem:[%s2265_s17 + $0x1a0] sm:$0xff] }
 0x1dc   : >> { %1528 = vst [vmem:[%s2261_s15 + $0x190] sm:$0xff] %v1527_v16  ;;  %v1533_v19 = vld [vmem:[%s2265_s17 + $0x1a8] sm:$0xff]  ;;  %1530 = vst [vmem:[%s2261_s15 + $0x198] sm:$0xff] %v1529_v17  ;;  %v1535_v20 = vld [vmem:[%s2265_s17 + $0x1b0] sm:$0xff]  ;;  %1423 = sbr.rel (!%p1420_p12) target bundleno = 450 (0x1c2), region = 122 }
 0x1dd   : >> { %1532 = vst [vmem:[%s2261_s15 + $0x1a0] sm:$0xff] %v1531_v18  ;;  %1534 = vst [vmem:[%s2261_s15 + $0x1a8] sm:$0xff] %v1533_v19  ;;  %v1537_v21 = vld [vmem:[%s2265_s17 + $0x1b8] sm:$0xff]  ;;  %v1539_v22 = vld [vmem:[%s2265_s17 + $0x1c0] sm:$0xff] }
 0x1de   : >> { %1536 = vst [vmem:[%s2261_s15 + $0x1b0] sm:$0xff] %v1535_v20  ;;  %1538 = vst [vmem:[%s2261_s15 + $0x1b8] sm:$0xff] %v1537_v21  ;;  %v1541_v23 = vld [vmem:[%s2265_s17 + $0x1c8] sm:$0xff]  ;;  %v1543_v24 = vld [vmem:[%s2265_s17 + $0x1d0] sm:$0xff] }
 0x1df   : >> { %1540 = vst [vmem:[%s2261_s15 + $0x1c0] sm:$0xff] %v1539_v22  ;;  %v1545_v25 = vld [vmem:[%s2265_s17 + $0x1d8] sm:$0xff]  ;;  %1542 = vst [vmem:[%s2261_s15 + $0x1c8] sm:$0xff] %v1541_v23  ;;  %v1547_v26 = vld [vmem:[%s2265_s17 + $0x1e0] sm:$0xff] }
 0x1e0   : >> { %1544 = vst [vmem:[%s2261_s15 + $0x1d0] sm:$0xff] %v1543_v24  ;;  %1546 = vst [vmem:[%s2261_s15 + $0x1d8] sm:$0xff] %v1545_v25  ;;  %v1549_v27 = vld [vmem:[%s2265_s17 + $0x1e8] sm:$0xff]  ;;  %v1551_v28 = vld [vmem:[%s2265_s17 + $0x1f0] sm:$0xff] }
 0x1e1   : >> { %1548 = vst [vmem:[%s2261_s15 + $0x1e0] sm:$0xff] %v1547_v26  ;;  %1550 = vst [vmem:[%s2261_s15 + $0x1e8] sm:$0xff] %v1549_v27  ;;  %v1553_v29 = vld [vmem:[%s2265_s17 + $0x1f8] sm:$0xff]  ;;  %s2971_s17 = smov %s2837_s23 }
 0x1e2   : >> { %1552 = vst [vmem:[%s2261_s15 + $0x1f0] sm:$0xff] %v1551_v28  ;;  %1554 = vst [vmem:[%s2261_s15 + $0x1f8] sm:$0xff] %v1553_v29  ;;  %s2970_s15 = smov %s2840_s24 }
 0x1e3 PF: > { %s2945_s25 = sand.u32 63, %s2977_s7   ;;  %s1810_s26 = sshll.u32 %s2770_s14, 9 }
 0x1e4   : > { %s1566_s27 = scalar_lea.vmem %s2561_s6, %s1810_s26 [#allocation2]   ;;  %s1568_s28 = scalar_lea.vmem %s2764_s11, %s1810_s26  }
 0x1e5   : > { %p1804_p13 = scmp.le.s32.totalorder %s2945_s25, 0 }
 0x1e6   : > { %s2275_s29 = smov (!%p1804_p13), %s1568_s28   ;;  %s2279_s30 = smov (!%p1804_p13), %s1566_s27  }
 0x1e7   : > { %1659 = sbr.rel (%p1804_p13) target bundleno = 504 (0x1f8), region = 127  ;;  %s2283_s4 = smov (!%p1804_p13), 0  }
 0x1e8   : > { %s2287_s5 = smov (!%p1804_p13), 0  }
 0x1ee LB: >> { %v1578_v51 = vld [vmem:[%s2281_s30] sm:$0xff]  ;;  %s1580_s7 = sadd.s32 1, %s2285_s4  ;;  %s1572_s5 = sadd.s32 1, %s2289_s5   ;;  %s2289_s5 = sphi %s2287_s5, %s1572_s5   ;;  %s2285_s4 = sphi %s2283_s4, %s2284_s4   ;;  %s2281_s30 = sphi %s2279_s30, %s1585_s30   ;;  %s2277_s29 = sphi %s2275_s29, %s1586_s29  }
 0x1ef   : >> { %1579 = vst [vmem:[%s2277_s29] sm:$0xff] %v1578_v51  ;;  %p1581_p0 = scmp.ge.s32.totalorder %s1580_s7, %s2945_s25  ;;  %p1571_p1 = scmp.ge.s32.totalorder %s1572_s5, %s2945_s25 }
 0x1f1   : >> { %s2981_s7 = smov (%p1581_p0, %s1580_s7), 0  ;;  %1574 = sbr.rel (!%p1571_p1) target bundleno = 494 (0x1ee), region = 133 }
 0x1f2   : >> { %s1805_s6 = sshll.u32 %s2981_s7, 3  ;;  %s2284_s4 = smov %s2981_s7  }
 0x1f3   : >> { %s1585_s30 = scalar_lea.vmem %s1566_s27, %s1805_s6 [#allocation2]   ;;  %s1586_s29 = scalar_lea.vmem %s1568_s28, %s1805_s6  }
 0x1f8 PF: > { %p10_p2 = scmp.ge.s32.totalorder %s2328_s16, 5   ;;  %s2973_s12 = smov %s2253_s13 }
 0x1f9   : > { %s2974_s13 = smov %s2336_s19  ;;  %s2975_s14 = smov %s2328_s16 }
 0x1fa   :  { %12 = sbr.rel (!%p10_p2) target bundleno = 2 (0x2), region = 144 }

</bundles_post_ra>
